<compile_context>
chip_gen: v7x
topology: tpu7x:2x2x1
jax: 0.10.0
libtpu: 0.0.40
codegen_flags: <defaults>
</compile_context>

<pallas_src>
import jax
import jax.numpy as jnp
from jax.experimental import pallas as pl
from jax.experimental.pallas import tpu as pltpu

LANES = 128


def _round_up(x, m):
    return ((x + m - 1) // m) * m


def _cdiv(a, b):
    return (a + b - 1) // b


def _pick_tile(m, cap):
    """Largest multiple-of-16 tile <= cap that still yields >=2 grid steps
    whenever m allows it (v7x megacore wants >=2 'parallel' steps)."""
    return max(16, min(cap, _round_up(_cdiv(m, 2), 16)))


# ---------------------------------------------------------------------------
# Pallas kernels
# ---------------------------------------------------------------------------
def _conv_pool_kernel(p_ref, w_ref, b_ref, o_ref):
    """Fused conv(matmul) + bias + ReLU + 2x2 max-pool.

    p_ref: (4, tm, K) bf16 -- im2col patches of the four 2x2 pool positions
    w_ref: (K, 128)   bf16 -- conv weights, Cout zero-padded to 128 lanes
    b_ref: (1, 128)   f32
    o_ref: (tm, 128)  bf16 -- pooled activation (lane-dense store)
    """
    w = w_ref[...]
    # Four independent MXU matmuls (no interleaved VPU max between pops/pushes),
    # then one tree-max.  maxpool(relu(conv+b)) == relu(max_s(conv_s)+b): the
    # bias is constant over the window and ReLU is monotone.
    a0 = jnp.dot(p_ref[0], w, preferred_element_type=jnp.float32)
    a1 = jnp.dot(p_ref[1], w, preferred_element_type=jnp.float32)
    a2 = jnp.dot(p_ref[2], w, preferred_element_type=jnp.float32)
    a3 = jnp.dot(p_ref[3], w, preferred_element_type=jnp.float32)
    acc = jnp.maximum(jnp.maximum(a0, a1), jnp.maximum(a2, a3))
    o_ref[...] = jnp.maximum(acc + b_ref[...], 0.0).astype(o_ref.dtype)


def _fc_fused_kernel(x_ref, w1_ref, b1_ref, w2_ref, b2_ref, o_ref):
    """out = relu(x @ w1 + b1) @ w2 + b2 in one kernel (no HBM roundtrip).

    x_ref: (tm, 1024) bf16; w1: (1024, 256) bf16; b1: (1, 256) f32
    w2: (256, 128) bf16 (10 -> 128 zero-padded); b2: (1, 128) f32
    o_ref: (tm, 128) f32
    """
    h = jnp.dot(x_ref[...], w1_ref[...], preferred_element_type=jnp.float32)
    h = jnp.maximum(h + b1_ref[...], 0.0)
    out = jnp.dot(h.astype(jnp.bfloat16), w2_ref[...],
                  preferred_element_type=jnp.float32)
    o_ref[...] = out + b2_ref[...]


# ---------------------------------------------------------------------------
# Glue: bf16 im2col with the four 2x2-pool patch sets
# ---------------------------------------------------------------------------
def im2col_pool4(x_nhwc, k, pad):
    """x:(N,H,W,C) bf16 -> (4, N*(H//2)*(W//2), k*k*C) bf16 patch sets.

    Set s=(di,dj) holds the im2col patches of conv-output positions
    (2i+di, 2j+dj) for pooled output position (i, j).  'same' pad, stride 1.
    """
    n, h, w, c = x_nhwc.shape
    ho, wo = h // 2, w // 2
    xp = jnp.pad(x_nhwc, ((0, 0), (pad, pad), (pad, pad), (0, 0)))
    cols = []
    for i in range(k):
        for j in range(k):
            cols.append(xp[:, i:i + h, j:j + w, :])
    patches = jnp.stack(cols, axis=3).reshape(n, h, w, k * k * c)
    sets = []
    for di in range(2):
        for dj in range(2):
            sets.append(patches[:, di::2, dj::2, :].reshape(n * ho * wo, k * k * c))
    return jnp.stack(sets, axis=0)                      # (4, M, K)


# ---------------------------------------------------------------------------
# Layer wrappers
# ---------------------------------------------------------------------------
def conv_pool(x_nhwc, w_mat, b_row, *, ksize, pad, cout):
    """Conv (stride 1, 'same') + bias + ReLU + 2x2 max-pool as one Pallas call.

    w_mat: (K, 128) bf16 pre-prepared weights; b_row: (1, 128) f32.
    Returns bf16 NHWC pooled output.
    """
    n, h, w, cin = x_nhwc.shape
    ho, wo = h // 2, w // 2
    K = ksize * ksize * cin
    M = n * ho * wo
    assert w_mat.shape == (K, LANES)

    # bf16 BEFORE im2col so the k*k-blown-up patch tensor is half-width in HBM.
    patches4 = im2col_pool4(x_nhwc.astype(jnp.bfloat16), ksize, pad)  # (4,M,K)

    tm = _pick_tile(M, 1024)
    Mp = _round_up(M, tm)
    if Mp != M:
        patches4 = jnp.pad(patches4, ((0, 0), (0, Mp - M), (0, 0)))

    out = pl.pallas_call(
        _conv_pool_kernel,
        out_shape=jax.ShapeDtypeStruct((Mp, LANES), jnp.bfloat16),
        grid_spec=pltpu.PrefetchScalarGridSpec(
            num_scalar_prefetch=0,
            grid=(Mp // tm,),
            in_specs=[
                pl.BlockSpec((4, tm, K), lambda i: (0, i, 0)),
                pl.BlockSpec((K, LANES), lambda i: (0, 0)),
                pl.BlockSpec((1, LANES), lambda i: (0, 0)),
            ],
            out_specs=pl.BlockSpec((tm, LANES), lambda i: (i, 0)),
        ),
        compiler_params=pltpu.CompilerParams(
            dimension_semantics=("parallel",),
            vmem_limit_bytes=32 * 1024 * 1024),   # headroom on v5e (16 MiB default)
    )(patches4, w_mat, b_row)

    # Slice back to the true channels; under jit this fuses into the next
    # layer's im2col glue rather than materializing a narrow-lane copy.
    return out[:M, :cout].reshape(n, ho, wo, cout)


def fc_head(x_bf16, w1, b1, w2, b2):
    """relu(x @ w1 + b1) @ w2 + b2 as one fused Pallas call, 128-lane output."""
    n, k1 = x_bf16.shape                 # (N, 1024)
    n1 = w1.shape[1]                     # 256

    tm = _pick_tile(n, 512)
    Mp = _round_up(n, tm)
    xp = x_bf16 if Mp == n else jnp.pad(x_bf16, ((0, Mp - n), (0, 0)))

    out = pl.pallas_call(
        _fc_fused_kernel,
        out_shape=jax.ShapeDtypeStruct((Mp, LANES), jnp.float32),
        grid_spec=pltpu.PrefetchScalarGridSpec(
            num_scalar_prefetch=0,
            grid=(Mp // tm,),
            in_specs=[
                pl.BlockSpec((tm, k1), lambda i: (i, 0)),
                pl.BlockSpec((k1, n1), lambda i: (0, 0)),
                pl.BlockSpec((1, n1), lambda i: (0, 0)),
                pl.BlockSpec((n1, LANES), lambda i: (0, 0)),
                pl.BlockSpec((1, LANES), lambda i: (0, 0)),
            ],
            out_specs=pl.BlockSpec((tm, LANES), lambda i: (i, 0)),
        ),
        compiler_params=pltpu.CompilerParams(
            dimension_semantics=("parallel",),
            vmem_limit_bytes=32 * 1024 * 1024),
    )(xp, w1, b1, w2, b2)

    return out[:n]                        # (n, 128); caller slices the 10 logits


# ---------------------------------------------------------------------------
# Parameter init (deterministic, PyTorch-like uniform(-1/sqrt(fan_in), +))
# ---------------------------------------------------------------------------
def _uniform(key, shape, fan_in):
    bound = 1.0 / jnp.sqrt(jnp.float32(fan_in))
    return jax.random.uniform(key, shape, jnp.float32, -bound, bound)


def init_params(key):
    ks = jax.random.split(key, 10)
    p = {}
    p["conv1_w"] = _uniform(ks[0], (8, 3, 5, 5), 3 * 5 * 5)
    p["conv1_b"] = _uniform(ks[1], (8,), 3 * 5 * 5)
    p["conv2_w"] = _uniform(ks[2], (32, 8, 5, 5), 8 * 5 * 5)
    p["conv2_b"] = _uniform(ks[3], (32,), 8 * 5 * 5)
    p["conv3_w"] = _uniform(ks[4], (64, 32, 3, 3), 32 * 3 * 3)
    p["conv3_b"] = _uniform(ks[5], (64,), 32 * 3 * 3)
    p["fc1_w"] = _uniform(ks[6], (1024, 256), 1024)   # stored as (in, out)
    p["fc1_b"] = _uniform(ks[7], (256,), 1024)
    p["fc2_w"] = _uniform(ks[8], (256, 10), 256)
    p["fc2_b"] = _uniform(ks[9], (10,), 256)
    return p


def prepare_params(p):
    """One-time conversion of PyTorch-layout f32 params into kernel-ready
    bf16 / lane-padded tensors (constant per model — not a per-forward cost)."""
    def conv_w(w_oihw):
        cout, cin, kh, kw = w_oihw.shape
        m = jnp.transpose(w_oihw, (2, 3, 1, 0)).reshape(kh * kw * cin, cout)
        return jnp.pad(m, ((0, 0), (0, LANES - cout))).astype(jnp.bfloat16)

    def conv_b(b):
        return jnp.pad(b, (0, LANES - b.shape[0])).reshape(1, LANES).astype(jnp.float32)

    q = {}
    q["conv1_w"], q["conv1_b"] = conv_w(p["conv1_w"]), conv_b(p["conv1_b"])
    q["conv2_w"], q["conv2_b"] = conv_w(p["conv2_w"]), conv_b(p["conv2_b"])
    q["conv3_w"], q["conv3_b"] = conv_w(p["conv3_w"]), conv_b(p["conv3_b"])

    # Fold PyTorch's NCHW flatten (row index c*16 + h*4 + w) into fc1's input
    # rows so the conv3 output can be flattened in natural NHWC order with no
    # per-forward activation transpose.
    c, hh, ww = 64, 4, 4
    idx = jnp.arange(c * hh * ww)
    h_i = idx // (ww * c)
    w_i = (idx // c) % ww
    c_i = idx % c
    chw = c_i * (hh * ww) + h_i * ww + w_i
    q["fc1_w"] = p["fc1_w"][chw, :].astype(jnp.bfloat16)            # (1024, 256)
    q["fc1_b"] = p["fc1_b"].reshape(1, -1).astype(jnp.float32)      # (1, 256)
    q["fc2_w"] = jnp.pad(p["fc2_w"],
                         ((0, 0), (0, LANES - p["fc2_w"].shape[1]))
                         ).astype(jnp.bfloat16)                     # (256, 128)
    q["fc2_b"] = jnp.pad(p["fc2_b"], (0, LANES - p["fc2_b"].shape[0])
                         ).reshape(1, LANES).astype(jnp.float32)    # (1, 128)
    return q


# ---------------------------------------------------------------------------
# Forward pass (matches Net.forward; dropout = identity in eval mode)
# ---------------------------------------------------------------------------
@jax.jit
def net_forward(prep, x_nchw):
    n = x_nchw.shape[0]
    # NCHW -> NHWC and cast to bf16 ONCE; all downstream glue runs at half width.
    x = jnp.transpose(x_nchw, (0, 2, 3, 1)).astype(jnp.bfloat16)        # (N,32,32,3)

    x = conv_pool(x, prep["conv1_w"], prep["conv1_b"], ksize=5, pad=2, cout=8)   # (N,16,16,8)
    x = conv_pool(x, prep["conv2_w"], prep["conv2_b"], ksize=5, pad=2, cout=32)  # (N,8,8,32)
    x = conv_pool(x, prep["conv3_w"], prep["conv3_b"], ksize=3, pad=1, cout=64)  # (N,4,4,64)

    x = x.reshape(n, 1024)        # natural NHWC flatten; fc1_w rows pre-permuted

    logits = fc_head(x, prep["fc1_w"], prep["fc1_b"],
                     prep["fc2_w"], prep["fc2_b"])                       # (N, 128)
    return logits[:, :10]


# ---------------------------------------------------------------------------
# Pure-JAX (f32) reference for a correctness sanity check
# ---------------------------------------------------------------------------
def reference_forward(params, x_nchw):
    hi = jax.lax.Precision.HIGHEST

    def conv(x, w, b, pad):
        y = jax.lax.conv_general_dilated(
            x, w, (1, 1), [(pad, pad), (pad, pad)],
            dimension_numbers=("NCHW", "OIHW", "NCHW"), precision=hi)
        return y + b.reshape(1, -1, 1, 1)

    def pool(x):
        return jax.lax.reduce_window(x, -jnp.inf, jax.lax.max,
                                     (1, 1, 2, 2), (1, 1, 2, 2), "VALID")

    x = x_nchw.astype(jnp.float32)
    x = pool(jax.nn.relu(conv(x, params["conv1_w"], params["conv1_b"], 2)))
    x = pool(jax.nn.relu(conv(x, params["conv2_w"], params["conv2_b"], 2)))
    x = pool(jax.nn.relu(conv(x, params["conv3_w"], params["conv3_b"], 1)))
    x = x.reshape(x.shape[0], -1)                       # NCHW flatten (PyTorch order)
    x = jax.nn.relu(jnp.dot(x, params["fc1_w"], precision=hi) + params["fc1_b"])
    return jnp.dot(x, params["fc2_w"], precision=hi) + params["fc2_b"]


# ---------------------------------------------------------------------------
if __name__ == "__main__":
    key = jax.random.PRNGKey(0)
    k_in, _ = jax.random.split(key)

    # Input must be 32x32 spatial so that 64 * 4 * 4 == 1024 (fc1 input).
    x = jax.random.normal(k_in, (2, 3, 32, 32), jnp.float32)   # NCHW like PyTorch
    params = init_params(jax.random.PRNGKey(42))
    prep = prepare_params(params)                              # one-time weight prep

    out = jax.block_until_ready(net_forward(prep, x))
    assert out.shape == (2, 10), out.shape
    assert out.dtype == jnp.float32

    ref = jax.block_until_ready(reference_forward(params, x))
    max_diff = float(jnp.max(jnp.abs(out - ref)))
    assert bool(jnp.allclose(out, ref, rtol=0.15, atol=0.15)), f"max diff {max_diff}"

    print("KERNEL_OK")
</pallas_src>

<mosaic_0001>
module attributes {stable_mosaic.version = 11 : i64} {
  func.func @_conv_pool_kernel(%arg0: i32, %arg1: memref<4x256x75xbf16, #tpu.memory_space<vmem>>, %arg2: memref<75x128xbf16, #tpu.memory_space<vmem>>, %arg3: memref<1x128xf32, #tpu.memory_space<vmem>>, %arg4: memref<256x128xbf16, #tpu.memory_space<vmem>>) attributes {dimension_semantics = [#tpu.dimension_semantics<parallel>], iteration_bounds = array<i64: 2>, scalar_prefetch = 0 : i64, scratch_operands = 0 : i64, tpu.core_type = #tpu.core_type<tc>, window_params = [{transform_indices = @transform_0, window_bounds = array<i64: 4, 256, 75>}, {pipeline_mode = #tpu.pipeline_mode<synchronous>, transform_indices = @transform_1, window_bounds = array<i64: 75, 128>}, {pipeline_mode = #tpu.pipeline_mode<synchronous>, transform_indices = @transform_2, window_bounds = array<i64: 1, 128>}, {transform_indices = @transform_3, window_bounds = array<i64: 256, 128>}]} {
    %c0 = arith.constant 0 : index
    %c0_0 = arith.constant 0 : index
    %0 = vector.load %arg2[%c0, %c0_0] : memref<75x128xbf16, #tpu.memory_space<vmem>>, vector<75x128xbf16>
    %c0_1 = arith.constant 0 : index
    %c0_2 = arith.constant 0 : index
    %c0_3 = arith.constant 0 : index
    %1 = vector.load %arg1[%c0_1, %c0_2, %c0_3] : memref<4x256x75xbf16, #tpu.memory_space<vmem>>, vector<1x256x75xbf16>
    %2 = vector.shape_cast %1 : vector<1x256x75xbf16> to vector<256x75xbf16>
    %cst = arith.constant dense<0.000000e+00> : vector<256x128xf32>
    %3 = tpu.matmul %2, %0, %cst {dimension_numbers = #tpu.dot_dimension_numbers<[1], [0], [0], [1], [0, 0, 1, 1], [], []>} : vector<256x75xbf16>, vector<75x128xbf16>, vector<256x128xf32> -> vector<256x128xf32>
    %c1 = arith.constant 1 : index
    %c0_4 = arith.constant 0 : index
    %c0_5 = arith.constant 0 : index
    %4 = vector.load %arg1[%c1, %c0_4, %c0_5] : memref<4x256x75xbf16, #tpu.memory_space<vmem>>, vector<1x256x75xbf16>
    %5 = vector.shape_cast %4 : vector<1x256x75xbf16> to vector<256x75xbf16>
    %cst_6 = arith.constant dense<0.000000e+00> : vector<256x128xf32>
    %6 = tpu.matmul %5, %0, %cst_6 {dimension_numbers = #tpu.dot_dimension_numbers<[1], [0], [0], [1], [0, 0, 1, 1], [], []>} : vector<256x75xbf16>, vector<75x128xbf16>, vector<256x128xf32> -> vector<256x128xf32>
    %c2 = arith.constant 2 : index
    %c0_7 = arith.constant 0 : index
    %c0_8 = arith.constant 0 : index
    %7 = vector.load %arg1[%c2, %c0_7, %c0_8] : memref<4x256x75xbf16, #tpu.memory_space<vmem>>, vector<1x256x75xbf16>
    %8 = vector.shape_cast %7 : vector<1x256x75xbf16> to vector<256x75xbf16>
    %cst_9 = arith.constant dense<0.000000e+00> : vector<256x128xf32>
    %9 = tpu.matmul %8, %0, %cst_9 {dimension_numbers = #tpu.dot_dimension_numbers<[1], [0], [0], [1], [0, 0, 1, 1], [], []>} : vector<256x75xbf16>, vector<75x128xbf16>, vector<256x128xf32> -> vector<256x128xf32>
    %c3 = arith.constant 3 : index
    %c0_10 = arith.constant 0 : index
    %c0_11 = arith.constant 0 : index
    %10 = vector.load %arg1[%c3, %c0_10, %c0_11] : memref<4x256x75xbf16, #tpu.memory_space<vmem>>, vector<1x256x75xbf16>
    %11 = vector.shape_cast %10 : vector<1x256x75xbf16> to vector<256x75xbf16>
    %cst_12 = arith.constant dense<0.000000e+00> : vector<256x128xf32>
    %12 = tpu.matmul %11, %0, %cst_12 {dimension_numbers = #tpu.dot_dimension_numbers<[1], [0], [0], [1], [0, 0, 1, 1], [], []>} : vector<256x75xbf16>, vector<75x128xbf16>, vector<256x128xf32> -> vector<256x128xf32>
    %13 = arith.maximumf %3, %6 : vector<256x128xf32>
    %14 = arith.maximumf %9, %12 : vector<256x128xf32>
    %15 = arith.maximumf %13, %14 : vector<256x128xf32>
    %c0_13 = arith.constant 0 : index
    %c0_14 = arith.constant 0 : index
    %16 = vector.load %arg3[%c0_13, %c0_14] : memref<1x128xf32, #tpu.memory_space<vmem>>, vector<1x128xf32>
    %17 = vector.broadcast %16 : vector<1x128xf32> to vector<256x128xf32>
    %18 = arith.addf %15, %17 : vector<256x128xf32>
    %cst_15 = arith.constant 0.000000e+00 : f32
    %19 = vector.broadcast %cst_15 : f32 to vector<256x128xf32>
    %20 = arith.maximumf %18, %19 : vector<256x128xf32>
    %21 = arith.truncf %20 : vector<256x128xf32> to vector<256x128xbf16>
    %c0_16 = arith.constant 0 : index
    %c0_17 = arith.constant 0 : index
    %22 = vector.load %arg4[%c0_16, %c0_17] : memref<256x128xbf16, #tpu.memory_space<vmem>>, vector<256x128xbf16>
    tpu.vector_store %arg4[%c0_16, %c0_17], %21 {strides = array<i32>} : memref<256x128xbf16, #tpu.memory_space<vmem>>, vector<256x128xbf16>,
    return
  }
  func.func @transform_0(%arg0: i32) -> (i32, i32, i32) {
    %c0_i32 = arith.constant 0 : i32
    %c0_i32_0 = arith.constant 0 : i32
    %c0_i32_1 = arith.constant 0 : i32
    return %c0_i32, %arg0, %c0_i32_0 : i32, i32, i32
  }
  func.func @transform_1(%arg0: i32) -> (i32, i32) {
    %c0_i32 = arith.constant 0 : i32
    %c0_i32_0 = arith.constant 0 : i32
    %c0_i32_1 = arith.constant 0 : i32
    return %c0_i32, %c0_i32_0 : i32, i32
  }
  func.func @transform_2(%arg0: i32) -> (i32, i32) {
    %c0_i32 = arith.constant 0 : i32
    %c0_i32_0 = arith.constant 0 : i32
    %c0_i32_1 = arith.constant 0 : i32
    return %c0_i32, %c0_i32_0 : i32, i32
  }
  func.func @transform_3(%arg0: i32) -> (i32, i32) {
    %c0_i32 = arith.constant 0 : i32
    %c0_i32_0 = arith.constant 0 : i32
    return %arg0, %c0_i32 : i32, i32
  }
}

module attributes {stable_mosaic.version = 11 : i64} {
  func.func @_conv_pool_kernel(%arg0: i32, %arg1: memref<4x64x200xbf16, #tpu.memory_space<vmem>>, %arg2: memref<200x128xbf16, #tpu.memory_space<vmem>>, %arg3: memref<1x128xf32, #tpu.memory_space<vmem>>, %arg4: memref<64x128xbf16, #tpu.memory_space<vmem>>) attributes {dimension_semantics = [#tpu.dimension_semantics<parallel>], iteration_bounds = array<i64: 2>, scalar_prefetch = 0 : i64, scratch_operands = 0 : i64, tpu.core_type = #tpu.core_type<tc>, window_params = [{transform_indices = @transform_0, window_bounds = array<i64: 4, 64, 200>}, {pipeline_mode = #tpu.pipeline_mode<synchronous>, transform_indices = @transform_1, window_bounds = array<i64: 200, 128>}, {pipeline_mode = #tpu.pipeline_mode<synchronous>, transform_indices = @transform_2, window_bounds = array<i64: 1, 128>}, {transform_indices = @transform_3, window_bounds = array<i64: 64, 128>}]} {
    %c0 = arith.constant 0 : index
    %c0_0 = arith.constant 0 : index
    %0 = vector.load %arg2[%c0, %c0_0] : memref<200x128xbf16, #tpu.memory_space<vmem>>, vector<200x128xbf16>
    %c0_1 = arith.constant 0 : index
    %c0_2 = arith.constant 0 : index
    %c0_3 = arith.constant 0 : index
    %1 = vector.load %arg1[%c0_1, %c0_2, %c0_3] : memref<4x64x200xbf16, #tpu.memory_space<vmem>>, vector<1x64x200xbf16>
    %2 = vector.shape_cast %1 : vector<1x64x200xbf16> to vector<64x200xbf16>
    %cst = arith.constant dense<0.000000e+00> : vector<64x128xf32>
    %3 = tpu.matmul %2, %0, %cst {dimension_numbers = #tpu.dot_dimension_numbers<[1], [0], [0], [1], [0, 0, 1, 1], [], []>} : vector<64x200xbf16>, vector<200x128xbf16>, vector<64x128xf32> -> vector<64x128xf32>
    %c1 = arith.constant 1 : index
    %c0_4 = arith.constant 0 : index
    %c0_5 = arith.constant 0 : index
    %4 = vector.load %arg1[%c1, %c0_4, %c0_5] : memref<4x64x200xbf16, #tpu.memory_space<vmem>>, vector<1x64x200xbf16>
    %5 = vector.shape_cast %4 : vector<1x64x200xbf16> to vector<64x200xbf16>
    %cst_6 = arith.constant dense<0.000000e+00> : vector<64x128xf32>
    %6 = tpu.matmul %5, %0, %cst_6 {dimension_numbers = #tpu.dot_dimension_numbers<[1], [0], [0], [1], [0, 0, 1, 1], [], []>} : vector<64x200xbf16>, vector<200x128xbf16>, vector<64x128xf32> -> vector<64x128xf32>
    %c2 = arith.constant 2 : index
    %c0_7 = arith.constant 0 : index
    %c0_8 = arith.constant 0 : index
    %7 = vector.load %arg1[%c2, %c0_7, %c0_8] : memref<4x64x200xbf16, #tpu.memory_space<vmem>>, vector<1x64x200xbf16>
    %8 = vector.shape_cast %7 : vector<1x64x200xbf16> to vector<64x200xbf16>
    %cst_9 = arith.constant dense<0.000000e+00> : vector<64x128xf32>
    %9 = tpu.matmul %8, %0, %cst_9 {dimension_numbers = #tpu.dot_dimension_numbers<[1], [0], [0], [1], [0, 0, 1, 1], [], []>} : vector<64x200xbf16>, vector<200x128xbf16>, vector<64x128xf32> -> vector<64x128xf32>
    %c3 = arith.constant 3 : index
    %c0_10 = arith.constant 0 : index
    %c0_11 = arith.constant 0 : index
    %10 = vector.load %arg1[%c3, %c0_10, %c0_11] : memref<4x64x200xbf16, #tpu.memory_space<vmem>>, vector<1x64x200xbf16>
    %11 = vector.shape_cast %10 : vector<1x64x200xbf16> to vector<64x200xbf16>
    %cst_12 = arith.constant dense<0.000000e+00> : vector<64x128xf32>
    %12 = tpu.matmul %11, %0, %cst_12 {dimension_numbers = #tpu.dot_dimension_numbers<[1], [0], [0], [1], [0, 0, 1, 1], [], []>} : vector<64x200xbf16>, vector<200x128xbf16>, vector<64x128xf32> -> vector<64x128xf32>
    %13 = arith.maximumf %3, %6 : vector<64x128xf32>
    %14 = arith.maximumf %9, %12 : vector<64x128xf32>
    %15 = arith.maximumf %13, %14 : vector<64x128xf32>
    %c0_13 = arith.constant 0 : index
    %c0_14 = arith.constant 0 : index
    %16 = vector.load %arg3[%c0_13, %c0_14] : memref<1x128xf32, #tpu.memory_space<vmem>>, vector<1x128xf32>
    %17 = vector.broadcast %16 : vector<1x128xf32> to vector<64x128xf32>
    %18 = arith.addf %15, %17 : vector<64x128xf32>
    %cst_15 = arith.constant 0.000000e+00 : f32
    %19 = vector.broadcast %cst_15 : f32 to vector<64x128xf32>
    %20 = arith.maximumf %18, %19 : vector<64x128xf32>
    %21 = arith.truncf %20 : vector<64x128xf32> to vector<64x128xbf16>
    %c0_16 = arith.constant 0 : index
    %c0_17 = arith.constant 0 : index
    %22 = vector.load %arg4[%c0_16, %c0_17] : memref<64x128xbf16, #tpu.memory_space<vmem>>, vector<64x128xbf16>
    tpu.vector_store %arg4[%c0_16, %c0_17], %21 {strides = array<i32>} : memref<64x128xbf16, #tpu.memory_space<vmem>>, vector<64x128xbf16>,
    return
  }
  func.func @transform_0(%arg0: i32) -> (i32, i32, i32) {
    %c0_i32 = arith.constant 0 : i32
    %c0_i32_0 = arith.constant 0 : i32
    %c0_i32_1 = arith.constant 0 : i32
    return %c0_i32, %arg0, %c0_i32_0 : i32, i32, i32
  }
  func.func @transform_1(%arg0: i32) -> (i32, i32) {
    %c0_i32 = arith.constant 0 : i32
    %c0_i32_0 = arith.constant 0 : i32
    %c0_i32_1 = arith.constant 0 : i32
    return %c0_i32, %c0_i32_0 : i32, i32
  }
  func.func @transform_2(%arg0: i32) -> (i32, i32) {
    %c0_i32 = arith.constant 0 : i32
    %c0_i32_0 = arith.constant 0 : i32
    %c0_i32_1 = arith.constant 0 : i32
    return %c0_i32, %c0_i32_0 : i32, i32
  }
  func.func @transform_3(%arg0: i32) -> (i32, i32) {
    %c0_i32 = arith.constant 0 : i32
    %c0_i32_0 = arith.constant 0 : i32
    return %arg0, %c0_i32 : i32, i32
  }
}

module attributes {stable_mosaic.version = 11 : i64} {
  func.func @_conv_pool_kernel(%arg0: i32, %arg1: memref<4x16x288xbf16, #tpu.memory_space<vmem>>, %arg2: memref<288x128xbf16, #tpu.memory_space<vmem>>, %arg3: memref<1x128xf32, #tpu.memory_space<vmem>>, %arg4: memref<16x128xbf16, #tpu.memory_space<vmem>>) attributes {dimension_semantics = [#tpu.dimension_semantics<parallel>], iteration_bounds = array<i64: 2>, scalar_prefetch = 0 : i64, scratch_operands = 0 : i64, tpu.core_type = #tpu.core_type<tc>, window_params = [{transform_indices = @transform_0, window_bounds = array<i64: 4, 16, 288>}, {pipeline_mode = #tpu.pipeline_mode<synchronous>, transform_indices = @transform_1, window_bounds = array<i64: 288, 128>}, {pipeline_mode = #tpu.pipeline_mode<synchronous>, transform_indices = @transform_2, window_bounds = array<i64: 1, 128>}, {transform_indices = @transform_3, window_bounds = array<i64: 16, 128>}]} {
    %c0 = arith.constant 0 : index
    %c0_0 = arith.constant 0 : index
    %0 = vector.load %arg2[%c0, %c0_0] : memref<288x128xbf16, #tpu.memory_space<vmem>>, vector<288x128xbf16>
    %c0_1 = arith.constant 0 : index
    %c0_2 = arith.constant 0 : index
    %c0_3 = arith.constant 0 : index
    %1 = vector.load %arg1[%c0_1, %c0_2, %c0_3] : memref<4x16x288xbf16, #tpu.memory_space<vmem>>, vector<1x16x288xbf16>
    %2 = vector.shape_cast %1 : vector<1x16x288xbf16> to vector<16x288xbf16>
    %cst = arith.constant dense<0.000000e+00> : vector<16x128xf32>
    %3 = tpu.matmul %2, %0, %cst {dimension_numbers = #tpu.dot_dimension_numbers<[1], [0], [0], [1], [0, 0, 1, 1], [], []>} : vector<16x288xbf16>, vector<288x128xbf16>, vector<16x128xf32> -> vector<16x128xf32>
    %c1 = arith.constant 1 : index
    %c0_4 = arith.constant 0 : index
    %c0_5 = arith.constant 0 : index
    %4 = vector.load %arg1[%c1, %c0_4, %c0_5] : memref<4x16x288xbf16, #tpu.memory_space<vmem>>, vector<1x16x288xbf16>
    %5 = vector.shape_cast %4 : vector<1x16x288xbf16> to vector<16x288xbf16>
    %cst_6 = arith.constant dense<0.000000e+00> : vector<16x128xf32>
    %6 = tpu.matmul %5, %0, %cst_6 {dimension_numbers = #tpu.dot_dimension_numbers<[1], [0], [0], [1], [0, 0, 1, 1], [], []>} : vector<16x288xbf16>, vector<288x128xbf16>, vector<16x128xf32> -> vector<16x128xf32>
    %c2 = arith.constant 2 : index
    %c0_7 = arith.constant 0 : index
    %c0_8 = arith.constant 0 : index
    %7 = vector.load %arg1[%c2, %c0_7, %c0_8] : memref<4x16x288xbf16, #tpu.memory_space<vmem>>, vector<1x16x288xbf16>
    %8 = vector.shape_cast %7 : vector<1x16x288xbf16> to vector<16x288xbf16>
    %cst_9 = arith.constant dense<0.000000e+00> : vector<16x128xf32>
    %9 = tpu.matmul %8, %0, %cst_9 {dimension_numbers = #tpu.dot_dimension_numbers<[1], [0], [0], [1], [0, 0, 1, 1], [], []>} : vector<16x288xbf16>, vector<288x128xbf16>, vector<16x128xf32> -> vector<16x128xf32>
    %c3 = arith.constant 3 : index
    %c0_10 = arith.constant 0 : index
    %c0_11 = arith.constant 0 : index
    %10 = vector.load %arg1[%c3, %c0_10, %c0_11] : memref<4x16x288xbf16, #tpu.memory_space<vmem>>, vector<1x16x288xbf16>
    %11 = vector.shape_cast %10 : vector<1x16x288xbf16> to vector<16x288xbf16>
    %cst_12 = arith.constant dense<0.000000e+00> : vector<16x128xf32>
    %12 = tpu.matmul %11, %0, %cst_12 {dimension_numbers = #tpu.dot_dimension_numbers<[1], [0], [0], [1], [0, 0, 1, 1], [], []>} : vector<16x288xbf16>, vector<288x128xbf16>, vector<16x128xf32> -> vector<16x128xf32>
    %13 = arith.maximumf %3, %6 : vector<16x128xf32>
    %14 = arith.maximumf %9, %12 : vector<16x128xf32>
    %15 = arith.maximumf %13, %14 : vector<16x128xf32>
    %c0_13 = arith.constant 0 : index
    %c0_14 = arith.constant 0 : index
    %16 = vector.load %arg3[%c0_13, %c0_14] : memref<1x128xf32, #tpu.memory_space<vmem>>, vector<1x128xf32>
    %17 = vector.broadcast %16 : vector<1x128xf32> to vector<16x128xf32>
    %18 = arith.addf %15, %17 : vector<16x128xf32>
    %cst_15 = arith.constant 0.000000e+00 : f32
    %19 = vector.broadcast %cst_15 : f32 to vector<16x128xf32>
    %20 = arith.maximumf %18, %19 : vector<16x128xf32>
    %21 = arith.truncf %20 : vector<16x128xf32> to vector<16x128xbf16>
    %c0_16 = arith.constant 0 : index
    %c0_17 = arith.constant 0 : index
    %22 = vector.load %arg4[%c0_16, %c0_17] : memref<16x128xbf16, #tpu.memory_space<vmem>>, vector<16x128xbf16>
    tpu.vector_store %arg4[%c0_16, %c0_17], %21 {strides = array<i32>} : memref<16x128xbf16, #tpu.memory_space<vmem>>, vector<16x128xbf16>,
    return
  }
  func.func @transform_0(%arg0: i32) -> (i32, i32, i32) {
    %c0_i32 = arith.constant 0 : i32
    %c0_i32_0 = arith.constant 0 : i32
    %c0_i32_1 = arith.constant 0 : i32
    return %c0_i32, %arg0, %c0_i32_0 : i32, i32, i32
  }
  func.func @transform_1(%arg0: i32) -> (i32, i32) {
    %c0_i32 = arith.constant 0 : i32
    %c0_i32_0 = arith.constant 0 : i32
    %c0_i32_1 = arith.constant 0 : i32
    return %c0_i32, %c0_i32_0 : i32, i32
  }
  func.func @transform_2(%arg0: i32) -> (i32, i32) {
    %c0_i32 = arith.constant 0 : i32
    %c0_i32_0 = arith.constant 0 : i32
    %c0_i32_1 = arith.constant 0 : i32
    return %c0_i32, %c0_i32_0 : i32, i32
  }
  func.func @transform_3(%arg0: i32) -> (i32, i32) {
    %c0_i32 = arith.constant 0 : i32
    %c0_i32_0 = arith.constant 0 : i32
    return %arg0, %c0_i32 : i32, i32
  }
}

module attributes {stable_mosaic.version = 11 : i64} {
  func.func @_fc_fused_kernel(%arg0: i32, %arg1: memref<16x1024xbf16, #tpu.memory_space<vmem>>, %arg2: memref<1024x256xbf16, #tpu.memory_space<vmem>>, %arg3: memref<1x256xf32, #tpu.memory_space<vmem>>, %arg4: memref<256x128xbf16, #tpu.memory_space<vmem>>, %arg5: memref<1x128xf32, #tpu.memory_space<vmem>>, %arg6: memref<16x128xf32, #tpu.memory_space<vmem>>) attributes {dimension_semantics = [#tpu.dimension_semantics<parallel>], iteration_bounds = array<i64: 1>, scalar_prefetch = 0 : i64, scratch_operands = 0 : i64, tpu.core_type = #tpu.core_type<tc>, window_params = [{transform_indices = @transform_0, window_bounds = array<i64: 16, 1024>}, {pipeline_mode = #tpu.pipeline_mode<synchronous>, transform_indices = @transform_1, window_bounds = array<i64: 1024, 256>}, {pipeline_mode = #tpu.pipeline_mode<synchronous>, transform_indices = @transform_2, window_bounds = array<i64: 1, 256>}, {pipeline_mode = #tpu.pipeline_mode<synchronous>, transform_indices = @transform_3, window_bounds = array<i64: 256, 128>}, {pipeline_mode = #tpu.pipeline_mode<synchronous>, transform_indices = @transform_4, window_bounds = array<i64: 1, 128>}, {transform_indices = @transform_5, window_bounds = array<i64: 16, 128>}]} {
    %c0 = arith.constant 0 : index
    %c0_0 = arith.constant 0 : index
    %0 = vector.load %arg1[%c0, %c0_0] : memref<16x1024xbf16, #tpu.memory_space<vmem>>, vector<16x1024xbf16>
    %c0_1 = arith.constant 0 : index
    %c0_2 = arith.constant 0 : index
    %1 = vector.load %arg2[%c0_1, %c0_2] : memref<1024x256xbf16, #tpu.memory_space<vmem>>, vector<1024x256xbf16>
    %cst = arith.constant dense<0.000000e+00> : vector<16x256xf32>
    %2 = tpu.matmul %0, %1, %cst {dimension_numbers = #tpu.dot_dimension_numbers<[1], [0], [0], [1], [0, 0, 1, 1], [], []>} : vector<16x1024xbf16>, vector<1024x256xbf16>, vector<16x256xf32> -> vector<16x256xf32>
    %c0_3 = arith.constant 0 : index
    %c0_4 = arith.constant 0 : index
    %3 = vector.load %arg3[%c0_3, %c0_4] : memref<1x256xf32, #tpu.memory_space<vmem>>, vector<1x256xf32>
    %4 = vector.broadcast %3 : vector<1x256xf32> to vector<16x256xf32>
    %5 = arith.addf %2, %4 : vector<16x256xf32>
    %cst_5 = arith.constant 0.000000e+00 : f32
    %6 = vector.broadcast %cst_5 : f32 to vector<16x256xf32>
    %7 = arith.maximumf %5, %6 : vector<16x256xf32>
    %8 = arith.truncf %7 : vector<16x256xf32> to vector<16x256xbf16>
    %c0_6 = arith.constant 0 : index
    %c0_7 = arith.constant 0 : index
    %9 = vector.load %arg4[%c0_6, %c0_7] : memref<256x128xbf16, #tpu.memory_space<vmem>>, vector<256x128xbf16>
    %cst_8 = arith.constant dense<0.000000e+00> : vector<16x128xf32>
    %10 = tpu.matmul %8, %9, %cst_8 {dimension_numbers = #tpu.dot_dimension_numbers<[1], [0], [0], [1], [0, 0, 1, 1], [], []>} : vector<16x256xbf16>, vector<256x128xbf16>, vector<16x128xf32> -> vector<16x128xf32>
    %c0_9 = arith.constant 0 : index
    %c0_10 = arith.constant 0 : index
    %11 = vector.load %arg5[%c0_9, %c0_10] : memref<1x128xf32, #tpu.memory_space<vmem>>, vector<1x128xf32>
    %12 = vector.broadcast %11 : vector<1x128xf32> to vector<16x128xf32>
    %13 = arith.addf %10, %12 : vector<16x128xf32>
    %c0_11 = arith.constant 0 : index
    %c0_12 = arith.constant 0 : index
    %14 = vector.load %arg6[%c0_11, %c0_12] : memref<16x128xf32, #tpu.memory_space<vmem>>, vector<16x128xf32>
    tpu.vector_store %arg6[%c0_11, %c0_12], %13 {strides = array<i32>} : memref<16x128xf32, #tpu.memory_space<vmem>>, vector<16x128xf32>,
    return
  }
  func.func @transform_0(%arg0: i32) -> (i32, i32) {
    %c0_i32 = arith.constant 0 : i32
    %c0_i32_0 = arith.constant 0 : i32
    return %arg0, %c0_i32 : i32, i32
  }
  func.func @transform_1(%arg0: i32) -> (i32, i32) {
    %c0_i32 = arith.constant 0 : i32
    %c0_i32_0 = arith.constant 0 : i32
    %c0_i32_1 = arith.constant 0 : i32
    return %c0_i32, %c0_i32_0 : i32, i32
  }
  func.func @transform_2(%arg0: i32) -> (i32, i32) {
    %c0_i32 = arith.constant 0 : i32
    %c0_i32_0 = arith.constant 0 : i32
    %c0_i32_1 = arith.constant 0 : i32
    return %c0_i32, %c0_i32_0 : i32, i32
  }
  func.func @transform_3(%arg0: i32) -> (i32, i32) {
    %c0_i32 = arith.constant 0 : i32
    %c0_i32_0 = arith.constant 0 : i32
    %c0_i32_1 = arith.constant 0 : i32
    return %c0_i32, %c0_i32_0 : i32, i32
  }
  func.func @transform_4(%arg0: i32) -> (i32, i32) {
    %c0_i32 = arith.constant 0 : i32
    %c0_i32_0 = arith.constant 0 : i32
    %c0_i32_1 = arith.constant 0 : i32
    return %c0_i32, %c0_i32_0 : i32, i32
  }
  func.func @transform_5(%arg0: i32) -> (i32, i32) {
    %c0_i32 = arith.constant 0 : i32
    %c0_i32_0 = arith.constant 0 : i32
    return %arg0, %c0_i32 : i32, i32
  }
}

</mosaic_0001>

<bundles_post_ra>
// kernel: net_forward.4
= control target key start
LH: loop header
LB: loop body
LE: loop exit
PB: predicated region body
PF: predicated region fallthrough
CT: control target
= control target key end

     0   :  { %s3241_s12 = smov 0   ;;  %s3243_s13 = smov 0   ;;  %s3913_s0 = inlined_call_operand.vmem [shape: bf16[4,512,75], index: 0, kind: input, shape index: {}]   ;;  %s3914_s1 = inlined_call_operand.vmem [shape: bf16[75,128], index: 1, kind: input, shape index: {}]   ;;  %s3915_s2 = inlined_call_operand.vmem [shape: f32[1,128], index: 2, kind: input, shape index: {}]   ;;  %s3916_s3 = inlined_call_operand.vmem [shape: bf16[512,128], index: 3, kind: output, shape index: {}]  }
   0x1   :  { %s3245_s14 = smov 0  }
   0x2 LB: > { %s2447_s15 = sadd.s32 4294967295, %s3218_s14   ;;  %s3258_s16 = sadd.s32 1, %s3218_s14   ;;  %s3218_s14 = sphi %s3245_s14, %s4002_s14   ;;  %s3214_s13 = sphi %s3243_s13, %s4001_s13   ;;  %s3210_s12 = sphi %s3241_s12, %s4000_s12  }
   0x3   : > { %s17_s17 = ssub.s32 %s3218_s14, %s3258_s16  ;;  %s20_s18 = sadd.s32 1, %s3214_s13 }
   0x4   : > { %p18_p0 = scmp.eq.s32.totalorder %s17_s17, 0  ;;  %p27_p1 = scmp.ne.s32.totalorder %s3214_s13, %s3210_s12 }
   0x5   : > { %p28_p2 = scmp.eq.s32.totalorder %s3218_s14, 0  ;;  %p2450_p4 = scmp.ge.s32.totalorder %s3218_s14, 2 }
   0x6   : > { %s3267_s19 = scalar_select %p18_p0, %s3214_s13, %s20_s18  }
   0x7   : > { %p29_p3 = por %p28_p2, %p27_p1  ;;  %127 = sbr.rel (%p2450_p4) target bundleno = 50 (0x32), region = 24 }
   0xe   : > { %130 = sbr.rel (!%p29_p3) target bundleno = 50 (0x32), region = 28  ;;  %s132_s20 = sand.u32 (%p29_p3), 1, %s3214_s13  }
   0xf   : > { %s2722_s21 = sshll.u32 (%p29_p3), %s3218_s14, 7  ;;  %s2451_s22 = sshll.u32 (%p29_p3), %s132_s20, 9 }
  0x10   : > { %s3275_s25 = scalar_lea.vmem (%p29_p3), %s3913_s0, %s2722_s21  ;;  %s3280_s26 = scalar_lea.vmem (%p29_p3), [#allocation2], %s2451_s22 }
  0x11   : > { %v153_v0 = vld [vmem:[%s3275_s25] sm:$0xff] (%p29_p3)   ;;  %v157_v1 = vld [vmem:[%s3275_s25 + $0x8] sm:$0xff] (%p29_p3)   ;;  %v161_v2 = vld [vmem:[%s3275_s25 + $0x10] sm:$0xff] (%p29_p3)  }
  0x12   : > { %154 = vst [vmem:[%s3280_s26] sm:$0xff] (%p29_p3), %v153_v0   ;;  %158 = vst [vmem:[%s3280_s26 + $0x8] sm:$0xff] (%p29_p3), %v157_v1   ;;  %v165_v3 = vld [vmem:[%s3275_s25 + $0x18] sm:$0xff] (%p29_p3)   ;;  %v169_v4 = vld [vmem:[%s3275_s25 + $0x20] sm:$0xff] (%p29_p3)  }
  0x13   : > { %162 = vst [vmem:[%s3280_s26 + $0x10] sm:$0xff] (%p29_p3), %v161_v2   ;;  %v173_v5 = vld [vmem:[%s3275_s25 + $0x28] sm:$0xff] (%p29_p3)   ;;  %166 = vst [vmem:[%s3280_s26 + $0x18] sm:$0xff] (%p29_p3), %v165_v3   ;;  %v177_v6 = vld [vmem:[%s3275_s25 + $0x30] sm:$0xff] (%p29_p3)  }
  0x14   : > { %170 = vst [vmem:[%s3280_s26 + $0x20] sm:$0xff] (%p29_p3), %v169_v4   ;;  %174 = vst [vmem:[%s3280_s26 + $0x28] sm:$0xff] (%p29_p3), %v173_v5   ;;  %v181_v7 = vld [vmem:[%s3275_s25 + $0x38] sm:$0xff] (%p29_p3)   ;;  %v185_v8 = vld [vmem:[%s3275_s25 + $0x40] sm:$0xff] (%p29_p3)  }
  0x15   : > { %178 = vst [vmem:[%s3280_s26 + $0x30] sm:$0xff] %v177_v6   ;;  %182 = vst [vmem:[%s3280_s26 + $0x38] sm:$0xff] %v181_v7   ;;  %v189_v9 = vld [vmem:[%s3275_s25 + $0x48] sm:$0xff]   ;;  %v193_v10 = vld [vmem:[%s3275_s25 + $0x50] sm:$0xff]  }
  0x16   : > { %186 = vst [vmem:[%s3280_s26 + $0x40] sm:$0xff] %v185_v8   ;;  %v197_v11 = vld [vmem:[%s3275_s25 + $0x58] sm:$0xff]   ;;  %190 = vst [vmem:[%s3280_s26 + $0x48] sm:$0xff] %v189_v9   ;;  %v201_v12 = vld [vmem:[%s3275_s25 + $0x60] sm:$0xff]  }
  0x17   : > { %194 = vst [vmem:[%s3280_s26 + $0x50] sm:$0xff] %v193_v10   ;;  %198 = vst [vmem:[%s3280_s26 + $0x58] sm:$0xff] %v197_v11   ;;  %v205_v13 = vld [vmem:[%s3275_s25 + $0x68] sm:$0xff]   ;;  %v209_v14 = vld [vmem:[%s3275_s25 + $0x70] sm:$0xff]  }
  0x18   : > { %202 = vst [vmem:[%s3280_s26 + $0x60] sm:$0xff] %v201_v12   ;;  %206 = vst [vmem:[%s3280_s26 + $0x68] sm:$0xff] %v205_v13   ;;  %v213_v15 = vld [vmem:[%s3275_s25 + $0x78] sm:$0xff]   ;;  %v217_v16 = vld [vmem:[%s3275_s25 + $0x100] sm:$0xff]  }
  0x19   : > { %210 = vst [vmem:[%s3280_s26 + $0x70] sm:$0xff] %v209_v14   ;;  %v221_v17 = vld [vmem:[%s3275_s25 + $0x108] sm:$0xff]   ;;  %214 = vst [vmem:[%s3280_s26 + $0x78] sm:$0xff] %v213_v15   ;;  %v225_v18 = vld [vmem:[%s3275_s25 + $0x110] sm:$0xff]  }
  0x1a   : > { %218 = vst [vmem:[%s3280_s26 + $0x80] sm:$0xff] %v217_v16   ;;  %222 = vst [vmem:[%s3280_s26 + $0x88] sm:$0xff] %v221_v17   ;;  %v229_v19 = vld [vmem:[%s3275_s25 + $0x118] sm:$0xff]   ;;  %v233_v20 = vld [vmem:[%s3275_s25 + $0x120] sm:$0xff]  }
  0x1b   : > { %226 = vst [vmem:[%s3280_s26 + $0x90] sm:$0xff] %v225_v18   ;;  %230 = vst [vmem:[%s3280_s26 + $0x98] sm:$0xff] %v229_v19   ;;  %v237_v21 = vld [vmem:[%s3275_s25 + $0x128] sm:$0xff]   ;;  %v241_v22 = vld [vmem:[%s3275_s25 + $0x130] sm:$0xff]  }
  0x1c   : > { %234 = vst [vmem:[%s3280_s26 + $0xa0] sm:$0xff] %v233_v20   ;;  %v245_v23 = vld [vmem:[%s3275_s25 + $0x138] sm:$0xff]   ;;  %238 = vst [vmem:[%s3280_s26 + $0xa8] sm:$0xff] %v237_v21   ;;  %v249_v24 = vld [vmem:[%s3275_s25 + $0x140] sm:$0xff]  }
  0x1d   : > { %242 = vst [vmem:[%s3280_s26 + $0xb0] sm:$0xff] %v241_v22   ;;  %246 = vst [vmem:[%s3280_s26 + $0xb8] sm:$0xff] %v245_v23   ;;  %v253_v25 = vld [vmem:[%s3275_s25 + $0x148] sm:$0xff]   ;;  %v257_v26 = vld [vmem:[%s3275_s25 + $0x150] sm:$0xff]  }
  0x1e   : > { %250 = vst [vmem:[%s3280_s26 + $0xc0] sm:$0xff] %v249_v24   ;;  %254 = vst [vmem:[%s3280_s26 + $0xc8] sm:$0xff] %v253_v25   ;;  %v261_v27 = vld [vmem:[%s3275_s25 + $0x158] sm:$0xff]   ;;  %v265_v28 = vld [vmem:[%s3275_s25 + $0x160] sm:$0xff]  }
  0x1f   : > { %258 = vst [vmem:[%s3280_s26 + $0xd0] sm:$0xff] %v257_v26   ;;  %v269_v29 = vld [vmem:[%s3275_s25 + $0x168] sm:$0xff]   ;;  %262 = vst [vmem:[%s3280_s26 + $0xd8] sm:$0xff] %v261_v27   ;;  %v273_v30 = vld [vmem:[%s3275_s25 + $0x170] sm:$0xff]  }
  0x20   : > { %266 = vst [vmem:[%s3280_s26 + $0xe0] sm:$0xff] %v265_v28   ;;  %270 = vst [vmem:[%s3280_s26 + $0xe8] sm:$0xff] %v269_v29   ;;  %v277_v31 = vld [vmem:[%s3275_s25 + $0x178] sm:$0xff]   ;;  %v281_v32 = vld [vmem:[%s3275_s25 + $0x200] sm:$0xff]  }
  0x21   : > { %274 = vst [vmem:[%s3280_s26 + $0xf0] sm:$0xff] %v273_v30   ;;  %278 = vst [vmem:[%s3280_s26 + $0xf8] sm:$0xff] %v277_v31   ;;  %v285_v33 = vld [vmem:[%s3275_s25 + $0x208] sm:$0xff]   ;;  %v289_v34 = vld [vmem:[%s3275_s25 + $0x210] sm:$0xff]  }
  0x22   : > { %282 = vst [vmem:[%s3280_s26 + $0x100] sm:$0xff] %v281_v32   ;;  %v293_v35 = vld [vmem:[%s3275_s25 + $0x218] sm:$0xff]   ;;  %286 = vst [vmem:[%s3280_s26 + $0x108] sm:$0xff] %v285_v33   ;;  %v297_v36 = vld [vmem:[%s3275_s25 + $0x220] sm:$0xff]  }
  0x23   : > { %290 = vst [vmem:[%s3280_s26 + $0x110] sm:$0xff] %v289_v34   ;;  %294 = vst [vmem:[%s3280_s26 + $0x118] sm:$0xff] %v293_v35   ;;  %v301_v37 = vld [vmem:[%s3275_s25 + $0x228] sm:$0xff]   ;;  %v305_v38 = vld [vmem:[%s3275_s25 + $0x230] sm:$0xff]  }
  0x24   : > { %298 = vst [vmem:[%s3280_s26 + $0x120] sm:$0xff] %v297_v36   ;;  %302 = vst [vmem:[%s3280_s26 + $0x128] sm:$0xff] %v301_v37   ;;  %v309_v39 = vld [vmem:[%s3275_s25 + $0x238] sm:$0xff]   ;;  %v313_v40 = vld [vmem:[%s3275_s25 + $0x240] sm:$0xff]  }
  0x25   : > { %306 = vst [vmem:[%s3280_s26 + $0x130] sm:$0xff] %v305_v38   ;;  %v317_v41 = vld [vmem:[%s3275_s25 + $0x248] sm:$0xff]   ;;  %310 = vst [vmem:[%s3280_s26 + $0x138] sm:$0xff] %v309_v39   ;;  %v321_v42 = vld [vmem:[%s3275_s25 + $0x250] sm:$0xff]  }
  0x26   : > { %314 = vst [vmem:[%s3280_s26 + $0x140] sm:$0xff] %v313_v40   ;;  %318 = vst [vmem:[%s3280_s26 + $0x148] sm:$0xff] %v317_v41   ;;  %v325_v43 = vld [vmem:[%s3275_s25 + $0x258] sm:$0xff]   ;;  %v329_v44 = vld [vmem:[%s3275_s25 + $0x260] sm:$0xff]  }
  0x27   : > { %322 = vst [vmem:[%s3280_s26 + $0x150] sm:$0xff] %v321_v42   ;;  %326 = vst [vmem:[%s3280_s26 + $0x158] sm:$0xff] %v325_v43   ;;  %v333_v45 = vld [vmem:[%s3275_s25 + $0x268] sm:$0xff]   ;;  %v337_v46 = vld [vmem:[%s3275_s25 + $0x270] sm:$0xff]  }
  0x28   : > { %330 = vst [vmem:[%s3280_s26 + $0x160] sm:$0xff] %v329_v44   ;;  %v341_v47 = vld [vmem:[%s3275_s25 + $0x278] sm:$0xff]   ;;  %334 = vst [vmem:[%s3280_s26 + $0x168] sm:$0xff] %v333_v45   ;;  %v345_v48 = vld [vmem:[%s3275_s25 + $0x300] sm:$0xff]  }
  0x29   : > { %338 = vst [vmem:[%s3280_s26 + $0x170] sm:$0xff] %v337_v46   ;;  %342 = vst [vmem:[%s3280_s26 + $0x178] sm:$0xff] %v341_v47   ;;  %v349_v49 = vld [vmem:[%s3275_s25 + $0x308] sm:$0xff]   ;;  %v353_v50 = vld [vmem:[%s3275_s25 + $0x310] sm:$0xff]  }
  0x2a   : > { %346 = vst [vmem:[%s3280_s26 + $0x180] sm:$0xff] %v345_v48   ;;  %350 = vst [vmem:[%s3280_s26 + $0x188] sm:$0xff] %v349_v49   ;;  %v357_v51 = vld [vmem:[%s3275_s25 + $0x318] sm:$0xff]   ;;  %v361_v52 = vld [vmem:[%s3275_s25 + $0x320] sm:$0xff]  }
  0x2b   : > { %354 = vst [vmem:[%s3280_s26 + $0x190] sm:$0xff] %v353_v50   ;;  %v365_v53 = vld [vmem:[%s3275_s25 + $0x328] sm:$0xff]   ;;  %358 = vst [vmem:[%s3280_s26 + $0x198] sm:$0xff] %v357_v51   ;;  %v369_v54 = vld [vmem:[%s3275_s25 + $0x330] sm:$0xff]  }
  0x2c   : > { %362 = vst [vmem:[%s3280_s26 + $0x1a0] sm:$0xff] %v361_v52   ;;  %366 = vst [vmem:[%s3280_s26 + $0x1a8] sm:$0xff] %v365_v53   ;;  %v373_v55 = vld [vmem:[%s3275_s25 + $0x338] sm:$0xff]   ;;  %v377_v56 = vld [vmem:[%s3275_s25 + $0x340] sm:$0xff]  }
  0x2d   : > { %370 = vst [vmem:[%s3280_s26 + $0x1b0] sm:$0xff] %v369_v54   ;;  %374 = vst [vmem:[%s3280_s26 + $0x1b8] sm:$0xff] %v373_v55   ;;  %v381_v57 = vld [vmem:[%s3275_s25 + $0x348] sm:$0xff]   ;;  %v385_v58 = vld [vmem:[%s3275_s25 + $0x350] sm:$0xff]  }
  0x2e   : > { %378 = vst [vmem:[%s3280_s26 + $0x1c0] sm:$0xff] %v377_v56   ;;  %v389_v59 = vld [vmem:[%s3275_s25 + $0x358] sm:$0xff]   ;;  %382 = vst [vmem:[%s3280_s26 + $0x1c8] sm:$0xff] %v381_v57   ;;  %v393_v60 = vld [vmem:[%s3275_s25 + $0x360] sm:$0xff]  }
  0x2f   : > { %386 = vst [vmem:[%s3280_s26 + $0x1d0] sm:$0xff] %v385_v58   ;;  %390 = vst [vmem:[%s3280_s26 + $0x1d8] sm:$0xff] %v389_v59   ;;  %v397_v61 = vld [vmem:[%s3275_s25 + $0x368] sm:$0xff]   ;;  %v401_v62 = vld [vmem:[%s3275_s25 + $0x370] sm:$0xff]  }
  0x30   : > { %394 = vst [vmem:[%s3280_s26 + $0x1e0] sm:$0xff] %v393_v60   ;;  %398 = vst [vmem:[%s3280_s26 + $0x1e8] sm:$0xff] %v397_v61   ;;  %v405_v63 = vld [vmem:[%s3275_s25 + $0x378] sm:$0xff]  }
  0x31   : > { %402 = vst [vmem:[%s3280_s26 + $0x1f0] sm:$0xff] %v401_v62   ;;  %406 = vst [vmem:[%s3280_s26 + $0x1f8] sm:$0xff] %v405_v63  }
  0x32 PF: > { %p2454_p5 = scmp.ge.s32.totalorder %s3218_s14, 1  ;;  %p686_p6 = scmp.lt.s32.totalorder %s3218_s14, 3 }
  0x34   : > { %p687_p7 = pnand %p2454_p5, %p686_p6 }
  0x36   : > { %690 = sbr.rel (%p687_p7) target bundleno = 428 (0x1ac), region = 69 }
  0x3d   : > { %v3127_v0 = vld [vmem:[%s3914_s1] sm:$0xff]   ;;  %v3128_v1 = vld [vmem:[%s3914_s1 + $0x8] sm:$0xff]   ;;  %vm924_vm0 = vcmask 1044480   ;;  %v3129_v2 = vld [vmem:[%s3914_s1 + $0x10] sm:$0xff]   ;;  %s693_s6 = sand.u32 1, %s3210_s12   ;;  %vm925_vm1 = vcmask 1045504  }
  0x3e   : > { %2934 = vmatprep.subr.bf16.mxu0 %v3127_v0  ;;  %2976 = vmatprep.subr.bf16.mxu1 %v3127_v0  ;;  %v3220_v3 = vmov 65535   ;;  %s2455_s7 = sshll.u32 %s693_s6, 9  ;;  %v3130_v5 = vld [vmem:[%s3914_s1 + $0x18] sm:$0xff]   ;;  %v3131_v6 = vld [vmem:[%s3914_s1 + $0x20] sm:$0x3f]   ;;  %vm875_vm2 = vcmask 613376  }
  0x3f   : > { %2935 = vmatpush3.bf16.msra.mxu0 %v3127_v0  ;;  %2977 = vmatpush3.bf16.msra.mxu1 %v3127_v0  ;;  %v926_v4 = vsel %vm924_vm0, 4294967295, %v3220_v3  ;;  %s3425_s17 = scalar_lea.vmem [#allocation2], %s2455_s7  ;;  %s2456_s12 = sshll.u32 %s2447_s15, 5 }
  0x40   : > { %2936 = vmatprep.subr.bf16.mxu0 %v3128_v1  ;;  %2978 = vmatprep.subr.bf16.mxu1 %v3128_v1  ;;  %v3132_v7 = vld [vmem:[%s3425_s17] sm:$0xff]   ;;  %v927_v8 = vsel %vm925_vm1, %v926_v4, 0  ;;  %v3134_v11 = vld [vmem:[%s3425_s17 + $0x8] sm:$0xff]   ;;  %v3136_v13 = vld [vmem:[%s3425_s17 + $0x10] sm:$0xff]   ;;  %p718_p8 = scmp.lt.s32.totalorder %s2456_s12, 63 }
  0x41   : > { %v3133_v9 = vld [vmem:[%s3425_s17 + $0x80] sm:$0xff]   ;;  %2944 = vmatprep.mubr.msk.bf16.mxu0 %vm875_vm2, %v3132_v7  ;;  %v929_v10 = vand.u32 %v3131_v6, %v927_v8  ;;  %v3135_v12 = vld [vmem:[%s3425_s17 + $0x88] sm:$0xff]   ;;  %v3137_v14 = vld [vmem:[%s3425_s17 + $0x90] sm:$0xff]  }
  0x42   : > { %2986 = vmatprep.mubr.msk.bf16.mxu1 %vm875_vm2, %v3133_v9  ;;  %v3138_v15 = vld [vmem:[%s3425_s17 + $0x18] sm:$0xff]   ;;  %v3140_v17 = vld [vmem:[%s3425_s17 + $0x20] sm:$0xff]   ;;  %v3142_v19 = vld [vmem:[%s3425_s17 + $0x28] sm:$0xff]   ;;  %s4004_s12 = smov (!%p718_p8, %s2456_s12), 63 }
  0x43   : > { %2937 = vmatpush3.bf16.msra.mxu0 %v3128_v1  ;;  %2979 = vmatpush3.bf16.msra.mxu1 %v3128_v1  ;;  %v3139_v16 = vld [vmem:[%s3425_s17 + $0x98] sm:$0xff]   ;;  %v3141_v18 = vld [vmem:[%s3425_s17 + $0xa0] sm:$0xff]   ;;  %v3143_v20 = vld [vmem:[%s3425_s17 + $0xa8] sm:$0xff]   ;;  %s2457_s14 = sshll.u32 %s4004_s12, 2 }
  0x44   : > { %2938 = vmatprep.subr.bf16.mxu0 %v3129_v2  ;;  %2980 = vmatprep.subr.bf16.mxu1 %v3129_v2  ;;  %v3144_v21 = vld [vmem:[%s3425_s17 + $0x30] sm:$0xff]   ;;  %v3146_v23 = vld [vmem:[%s3425_s17 + $0x38] sm:$0xff]   ;;  %v3148_v25 = vld [vmem:[%s3425_s17 + $0x40] sm:$0xff]   ;;  %s3773_s22 = scalar_lea.vmem %s3916_s3, %s2457_s14 }
  0x45   : > { %v3145_v22 = vld [vmem:[%s3425_s17 + $0xb0] sm:$0xff]   ;;  %v3147_v24 = vld [vmem:[%s3425_s17 + $0xb8] sm:$0xff]   ;;  %v3149_v26 = vld [vmem:[%s3425_s17 + $0xc0] sm:$0xff]  }
  0x46   : > { %v3150_v27 = vld [vmem:[%s3425_s17 + $0x48] sm:$0xff]   ;;  %v3152_v29 = vld [vmem:[%s3425_s17 + $0x50] sm:$0xff]   ;;  %v3154_v31 = vld [vmem:[%s3425_s17 + $0x58] sm:$0xff]  }
  0x47   : > { %2939 = vmatpush3.bf16.msra.mxu0 %v3129_v2  ;;  %2981 = vmatpush3.bf16.msra.mxu1 %v3129_v2  ;;  %v3151_v28 = vld [vmem:[%s3425_s17 + $0xc8] sm:$0xff]   ;;  %v3153_v30 = vld [vmem:[%s3425_s17 + $0xd0] sm:$0xff]   ;;  %v3155_v32 = vld [vmem:[%s3425_s17 + $0xd8] sm:$0xff]  }
  0x48   : > { %2940 = vmatprep.subr.bf16.mxu0 %v3130_v5  ;;  %2982 = vmatprep.subr.bf16.mxu1 %v3130_v5  ;;  %v3156_v33 = vld [vmem:[%s3425_s17 + $0x60] sm:$0xff]   ;;  %v3158_v35 = vld [vmem:[%s3425_s17 + $0x68] sm:$0xff]   ;;  %v3160_v37 = vld [vmem:[%s3425_s17 + $0x70] sm:$0xff]  }
  0x49   : > { %v3157_v34 = vld [vmem:[%s3425_s17 + $0xe0] sm:$0xff]   ;;  %v3159_v36 = vld [vmem:[%s3425_s17 + $0xe8] sm:$0xff]   ;;  %v3161_v38 = vld [vmem:[%s3425_s17 + $0xf0] sm:$0xff]  }
  0x4a   : > { %v3162_v39 = vld [vmem:[%s3425_s17 + $0x78] sm:$0xff]   ;;  %v3164_v41 = vld [vmem:[%s3425_s17 + $0x100] sm:$0xff]   ;;  %v3166_v43 = vld [vmem:[%s3425_s17 + $0x108] sm:$0xff]  }
  0x4b   : > { %2941 = vmatpush3.bf16.msra.mxu0 %v3130_v5  ;;  %2983 = vmatpush3.bf16.msra.mxu1 %v3130_v5  ;;  %v3163_v40 = vld [vmem:[%s3425_s17 + $0xf8] sm:$0xff]   ;;  %v3165_v42 = vld [vmem:[%s3425_s17 + $0x180] sm:$0xff]   ;;  %v3167_v44 = vld [vmem:[%s3425_s17 + $0x188] sm:$0xff]  }
  0x4c   : > { %2942 = vmatprep.subr.bf16.mxu0 %v929_v10  ;;  %2984 = vmatprep.subr.bf16.mxu1 %v929_v10  ;;  %v3168_v45 = vld [vmem:[%s3425_s17 + $0x110] sm:$0xff]   ;;  %v3170_v47 = vld [vmem:[%s3425_s17 + $0x118] sm:$0xff]   ;;  %v3172_v49 = vld [vmem:[%s3425_s17 + $0x120] sm:$0xff]  }
  0x4d   : > { %v3169_v46 = vld [vmem:[%s3425_s17 + $0x190] sm:$0xff]   ;;  %v3171_v48 = vld [vmem:[%s3425_s17 + $0x198] sm:$0xff]   ;;  %v3173_v50 = vld [vmem:[%s3425_s17 + $0x1a0] sm:$0xff]  }
  0x4e   : > { %v3174_v51 = vld [vmem:[%s3425_s17 + $0x128] sm:$0xff]   ;;  %v3176_v53 = vld [vmem:[%s3425_s17 + $0x130] sm:$0xff]   ;;  %v3178_v55 = vld [vmem:[%s3425_s17 + $0x138] sm:$0xff]  }
  0x4f   : > { %2943 = vmatpush3.bf16.msra.mxu0 %v929_v10  ;;  %2985 = vmatpush3.bf16.msra.mxu1 %v929_v10  ;;  %v3175_v52 = vld [vmem:[%s3425_s17 + $0x1a8] sm:$0xff]   ;;  %v3177_v54 = vld [vmem:[%s3425_s17 + $0x1b0] sm:$0xff]   ;;  %v3179_v56 = vld [vmem:[%s3425_s17 + $0x1b8] sm:$0xff]  }
  0x50   : > { %3018 = vmatprep.subr.bf16.mxu0 %v3127_v0  ;;  %3060 = vmatprep.subr.bf16.mxu1 %v3127_v0  ;;  %v3180_v57 = vld [vmem:[%s3425_s17 + $0x140] sm:$0xff]   ;;  %v3182_v59 = vld [vmem:[%s3425_s17 + $0x148] sm:$0xff]   ;;  %v3184_v61 = vld [vmem:[%s3425_s17 + $0x150] sm:$0xff]  }
  0x51   : > { %v3181_v58 = vld [vmem:[%s3425_s17 + $0x1c0] sm:$0xff]   ;;  %v3183_v60 = vld [vmem:[%s3425_s17 + $0x1c8] sm:$0xff]   ;;  %v3185_v62 = vld [vmem:[%s3425_s17 + $0x1d0] sm:$0xff]  }
  0x52   : > { %2945 = vmatmul.mubr.msk.bf16.vlgmr.msra.gmra.mrb[0].mxu0 %vm875_vm2, %v3134_v11  ;;  %2987 = vmatmul.mubr.msk.bf16.vlgmr.msra.gmra.mrb[0].mxu1 %vm875_vm2, %v3135_v12  ;;  %v3186_v63 = vld [vmem:[%s3425_s17 + $0x158] sm:$0xff]   ;;  %v3190_v3 = vld [vmem:[%s3425_s17 + $0x168] sm:$0xff]   ;;  %v3193_v6 = vld [vmem:[%s3425_s17 + $0x1f0] sm:$0xff]  }
  0x53   : > { %3019 = vmatpush3.bf16.msra.mxu0 %v3127_v0  ;;  %3061 = vmatpush3.bf16.msra.mxu1 %v3127_v0  ;;  %v3187_v0 = vld [vmem:[%s3425_s17 + $0x1d8] sm:$0xff]   ;;  %v3191_v4 = vld [vmem:[%s3425_s17 + $0x1e8] sm:$0xff]  }
  0x54   : > { %2948 = vmatprep.mubr.msk.bf16.mxu0 %vm875_vm2, %v3136_v13  ;;  %2990 = vmatprep.mubr.msk.bf16.mxu1 %vm875_vm2, %v3137_v14  ;;  %v3194_v7 = vld [vmem:[%s3425_s17 + $0x178] sm:$0xff]  }
  0x55   : > { %3020 = vmatprep.subr.bf16.mxu0 %v3128_v1  ;;  %3062 = vmatprep.subr.bf16.mxu1 %v3128_v1  ;;  %v3195_v8 = vld [vmem:[%s3425_s17 + $0x1f8] sm:$0xff]  }
  0x57   : > { %3021 = vmatpush3.bf16.msra.mxu0 %v3128_v1  ;;  %3063 = vmatpush3.bf16.msra.mxu1 %v3128_v1  ;;  %v3188_v1 = vld [vmem:[%s3425_s17 + $0x160] sm:$0xff]  }
  0x58   : > { %3022 = vmatprep.subr.bf16.mxu0 %v3129_v2  ;;  %3064 = vmatprep.subr.bf16.mxu1 %v3129_v2 }
  0x5a   : > { %2949 = vmatmul.mubr.msk.bf16.gmra.mrb[4].mxu0 %vm875_vm2, %v3138_v15  ;;  %2991 = vmatmul.mubr.msk.bf16.gmra.mrb[4].mxu1 %vm875_vm2, %v3139_v16 }
  0x5b   : > { %2952 = vmatprep.mubr.msk.bf16.mxu0 %vm875_vm2, %v3140_v17  ;;  %2994 = vmatprep.mubr.msk.bf16.mxu1 %vm875_vm2, %v3141_v18 }
  0x5c   : > { %3023 = vmatpush3.bf16.msra.mxu0 %v3129_v2  ;;  %3065 = vmatpush3.bf16.msra.mxu1 %v3129_v2  ;;  %v3189_v2 = vld [vmem:[%s3425_s17 + $0x1e0] sm:$0xff]  }
  0x5d   : > { %3024 = vmatprep.subr.bf16.mxu0 %v3130_v5  ;;  %3066 = vmatprep.subr.bf16.mxu1 %v3130_v5 }
  0x60   : > { %3025 = vmatpush3.bf16.msra.mxu0 %v3130_v5  ;;  %3067 = vmatpush3.bf16.msra.mxu1 %v3130_v5  ;;  %v3192_v5 = vld [vmem:[%s3425_s17 + $0x170] sm:$0xff]  }
  0x61   : > { %3026 = vmatprep.subr.bf16.mxu0 %v929_v10  ;;  %3068 = vmatprep.subr.bf16.mxu1 %v929_v10 }
  0x62   : > { %2953 = vmatmul.mubr.msk.bf16.gmra.mrb[8].mxu0 %vm875_vm2, %v3142_v19  ;;  %2995 = vmatmul.mubr.msk.bf16.gmra.mrb[8].mxu1 %vm875_vm2, %v3143_v20 }
  0x63   : > { %2956 = vmatprep.mubr.msk.bf16.mxu0 %vm875_vm2, %v3144_v21  ;;  %2998 = vmatprep.mubr.msk.bf16.mxu1 %vm875_vm2, %v3145_v22 }
  0x64   : > { %3027 = vmatpush3.bf16.msra.mxu0 %v929_v10  ;;  %3069 = vmatpush3.bf16.msra.mxu1 %v929_v10 }
  0x6a   : > { %2957 = vmatmul.mubr.msk.bf16.gmra.mrb[12].mxu0 %vm875_vm2, %v3146_v23  ;;  %2999 = vmatmul.mubr.msk.bf16.gmra.mrb[12].mxu1 %vm875_vm2, %v3147_v24 }
  0x6b   : > { %2960 = vmatprep.mubr.msk.bf16.mxu0 %vm875_vm2, %v3148_v25  ;;  %3002 = vmatprep.mubr.msk.bf16.mxu1 %vm875_vm2, %v3149_v26 }
  0x72   : > { %2961 = vmatmul.mubr.msk.bf16.gmra.mrb[16].mxu0 %vm875_vm2, %v3150_v27  ;;  %3003 = vmatmul.mubr.msk.bf16.gmra.mrb[16].mxu1 %vm875_vm2, %v3151_v28 }
  0x73   : > { %2964 = vmatprep.mubr.msk.bf16.mxu0 %vm875_vm2, %v3152_v29  ;;  %3006 = vmatprep.mubr.msk.bf16.mxu1 %vm875_vm2, %v3153_v30 }
  0x7a   : > { %2965 = vmatmul.mubr.msk.bf16.gmra.mrb[20].mxu0 %vm875_vm2, %v3154_v31  ;;  %3007 = vmatmul.mubr.msk.bf16.gmra.mrb[20].mxu1 %vm875_vm2, %v3155_v32 }
  0x7b   : > { %2968 = vmatprep.mubr.msk.bf16.mxu0 %vm875_vm2, %v3156_v33  ;;  %3010 = vmatprep.mubr.msk.bf16.mxu1 %vm875_vm2, %v3157_v34 }
  0x82   : > { %2969 = vmatmul.mubr.msk.bf16.gmra.mrb[24].mxu0 %vm875_vm2, %v3158_v35  ;;  %3011 = vmatmul.mubr.msk.bf16.gmra.mrb[24].mxu1 %vm875_vm2, %v3159_v36 }
  0x83   : > { %2972 = vmatprep.mubr.msk.bf16.mxu0 %vm875_vm2, %v3160_v37  ;;  %3014 = vmatprep.mubr.msk.bf16.mxu1 %vm875_vm2, %v3161_v38 }
  0x8a   : > { %2973 = vmatmul.mubr.msk.bf16.gmra.mrb[28].mxu0 %vm875_vm2, %v3162_v39  ;;  %3015 = vmatmul.mubr.msk.bf16.gmra.mrb[28].mxu1 %vm875_vm2, %v3163_v40 }
  0x8b   : > { %3028 = vmatprep.mubr.msk.bf16.mxu0 %vm875_vm2, %v3164_v41  ;;  %3070 = vmatprep.mubr.msk.bf16.mxu1 %vm875_vm2, %v3165_v42 }
  0x92   : > { %3029 = vmatmul.mubr.msk.bf16.vlgmr.msra.gmra.mrb[32].mxu0 %vm875_vm2, %v3166_v43  ;;  %3071 = vmatmul.mubr.msk.bf16.vlgmr.msra.gmra.mrb[32].mxu1 %vm875_vm2, %v3167_v44 }
  0x93   : > { %3032 = vmatprep.mubr.msk.bf16.mxu0 %vm875_vm2, %v3168_v45  ;;  %3074 = vmatprep.mubr.msk.bf16.mxu1 %vm875_vm2, %v3169_v46 }
  0x9a   : > { %3033 = vmatmul.mubr.msk.bf16.gmra.mrb[36].mxu0 %vm875_vm2, %v3170_v47  ;;  %3075 = vmatmul.mubr.msk.bf16.gmra.mrb[36].mxu1 %vm875_vm2, %v3171_v48 }
  0x9b   : > { %3036 = vmatprep.mubr.msk.bf16.mxu0 %vm875_vm2, %v3172_v49  ;;  %3078 = vmatprep.mubr.msk.bf16.mxu1 %vm875_vm2, %v3173_v50 }
  0xa2   : > { %3037 = vmatmul.mubr.msk.bf16.gmra.mrb[40].mxu0 %vm875_vm2, %v3174_v51  ;;  %3079 = vmatmul.mubr.msk.bf16.gmra.mrb[40].mxu1 %vm875_vm2, %v3175_v52 }
  0xa3   : > { %3040 = vmatprep.mubr.msk.bf16.mxu0 %vm875_vm2, %v3176_v53  ;;  %3082 = vmatprep.mubr.msk.bf16.mxu1 %vm875_vm2, %v3177_v54 }
  0xaa   : > { %3041 = vmatmul.mubr.msk.bf16.gmra.mrb[44].mxu0 %vm875_vm2, %v3178_v55  ;;  %3083 = vmatmul.mubr.msk.bf16.gmra.mrb[44].mxu1 %vm875_vm2, %v3179_v56 }
  0xab   : > { %3044 = vmatprep.mubr.msk.bf16.mxu0 %vm875_vm2, %v3180_v57  ;;  %3086 = vmatprep.mubr.msk.bf16.mxu1 %vm875_vm2, %v3181_v58 }
  0xb2   : > { %3045 = vmatmul.mubr.msk.bf16.gmra.mrb[48].mxu0 %vm875_vm2, %v3182_v59  ;;  %3087 = vmatmul.mubr.msk.bf16.gmra.mrb[48].mxu1 %vm875_vm2, %v3183_v60 }
  0xb3   : > { %3048 = vmatprep.mubr.msk.bf16.mxu0 %vm875_vm2, %v3184_v61  ;;  %3090 = vmatprep.mubr.msk.bf16.mxu1 %vm875_vm2, %v3185_v62 }
  0xba   : > { %3049 = vmatmul.mubr.msk.bf16.gmra.mrb[52].mxu0 %vm875_vm2, %v3186_v63  ;;  %3091 = vmatmul.mubr.msk.bf16.gmra.mrb[52].mxu1 %vm875_vm2, %v3187_v0 }
  0xbb   : > { %3052 = vmatprep.mubr.msk.bf16.mxu0 %vm875_vm2, %v3188_v1  ;;  %3094 = vmatprep.mubr.msk.bf16.mxu1 %vm875_vm2, %v3189_v2 }
  0xc2   : > { %3053 = vmatmul.mubr.msk.bf16.gmra.mrb[56].mxu0 %vm875_vm2, %v3190_v3  ;;  %3095 = vmatmul.mubr.msk.bf16.gmra.mrb[56].mxu1 %vm875_vm2, %v3191_v4 }
  0xc3   : > { %3056 = vmatprep.mubr.msk.bf16.mxu0 %vm875_vm2, %v3192_v5  ;;  %3098 = vmatprep.mubr.msk.bf16.mxu1 %vm875_vm2, %v3193_v6 }
  0xca   : > { %3057 = vmatmul.mubr.msk.bf16.gmra.mrb[60].mxu0 %vm875_vm2, %v3194_v7  ;;  %3099 = vmatmul.mubr.msk.bf16.gmra.mrb[60].mxu1 %vm875_vm2, %v3195_v8 }
 0x125   : > { %v3555_v9 = vpop.f32.mrb[0].mxu0  ;;  %v3557_v10 = vpop.f32.mrb[0].mxu1 }
 0x126   : > { %v3561_v12 = vpop.f32.mrb[1].mxu0  ;;  %v3563_v13 = vpop.f32.mrb[1].mxu1 }
 0x127   : > { %v3567_v15 = vpop.f32.mrb[2].mxu0  ;;  %v3569_v16 = vpop.f32.mrb[2].mxu1 }
 0x128   : > { %v3573_v18 = vpop.f32.mrb[3].mxu0  ;;  %v3575_v19 = vpop.f32.mrb[3].mxu1 }
 0x12d   : > { %v3579_v21 = vpop.f32.mrb[4].mxu0  ;;  %v3581_v22 = vpop.f32.mrb[4].mxu1 }
 0x12e   : > { %v3585_v24 = vpop.f32.mrb[5].mxu0  ;;  %v3587_v25 = vpop.f32.mrb[5].mxu1 }
 0x12f   : > { %v3591_v27 = vpop.f32.mrb[6].mxu0  ;;  %v3593_v28 = vpop.f32.mrb[6].mxu1 }
 0x130   : > { %v3597_v30 = vpop.f32.mrb[7].mxu0  ;;  %v3599_v31 = vpop.f32.mrb[7].mxu1 }
 0x135   : > { %v3603_v33 = vpop.f32.mrb[8].mxu0  ;;  %v3605_v34 = vpop.f32.mrb[8].mxu1 }
 0x136   : > { %v3609_v36 = vpop.f32.mrb[9].mxu0  ;;  %v3611_v37 = vpop.f32.mrb[9].mxu1 }
 0x137   : > { %v3615_v39 = vpop.f32.mrb[10].mxu0  ;;  %v3617_v40 = vpop.f32.mrb[10].mxu1 }
 0x138   : > { %v3621_v42 = vpop.f32.mrb[11].mxu0  ;;  %v3623_v43 = vpop.f32.mrb[11].mxu1 }
 0x13d   : > { %v3627_v45 = vpop.f32.mrb[12].mxu0  ;;  %v3629_v46 = vpop.f32.mrb[12].mxu1 }
 0x13e   : > { %v3633_v48 = vpop.f32.mrb[13].mxu0  ;;  %v3635_v49 = vpop.f32.mrb[13].mxu1 }
 0x13f   : > { %v3639_v51 = vpop.f32.mrb[14].mxu0  ;;  %v3641_v52 = vpop.f32.mrb[14].mxu1 }
 0x140   : > { %v3645_v54 = vpop.f32.mrb[15].mxu0  ;;  %v3647_v55 = vpop.f32.mrb[15].mxu1 }
 0x145   : > { %v3651_v57 = vpop.f32.mrb[16].mxu0  ;;  %v3653_v58 = vpop.f32.mrb[16].mxu1 }
 0x146   : > { %v3657_v60 = vpop.f32.mrb[17].mxu0  ;;  %v3659_v61 = vpop.f32.mrb[17].mxu1 }
 0x147   : > { %v3663_v63 = vpop.f32.mrb[18].mxu0  ;;  %v3665_v0 = vpop.f32.mrb[18].mxu1 }
 0x148   : > { %v3669_v2 = vpop.f32.mrb[19].mxu0  ;;  %v3671_v3 = vpop.f32.mrb[19].mxu1 }
 0x14d   : > { %v3675_v5 = vpop.f32.mrb[20].mxu0  ;;  %v3677_v6 = vpop.f32.mrb[20].mxu1 }
 0x14e   : > { %v3681_v8 = vpop.f32.mrb[21].mxu0  ;;  %v3683_v62 = vpop.f32.mrb[21].mxu1 }
 0x14f   : > { %v3687_v59 = vpop.f32.mrb[22].mxu0  ;;  %v3689_v56 = vpop.f32.mrb[22].mxu1 }
 0x150   : > { %v3693_v53 = vpop.f32.mrb[23].mxu0  ;;  %v3695_v50 = vpop.f32.mrb[23].mxu1 }
 0x151   : > { %3934 = vst [vmem:[#allocation3_spill] sm:$0xff] %v3695_v50 }
 0x155   : > { %v3699_v47 = vpop.f32.mrb[24].mxu0  ;;  %v3701_v44 = vpop.f32.mrb[24].mxu1 }
 0x156   : > { %3935 = vst [vmem:[#allocation4_spill] sm:$0xff] %v3699_v47  ;;  %3936 = vst [vmem:[#allocation5_spill] sm:$0xff] %v3701_v44  ;;  %v3705_v41 = vpop.f32.mrb[25].mxu0  ;;  %v3707_v38 = vpop.f32.mrb[25].mxu1 }
 0x157   : > { %3937 = vst [vmem:[#allocation6_spill] sm:$0xff] %v3705_v41  ;;  %3938 = vst [vmem:[#allocation7_spill] sm:$0xff] %v3707_v38  ;;  %v3711_v35 = vpop.f32.mrb[26].mxu0  ;;  %v3713_v32 = vpop.f32.mrb[26].mxu1  ;;  %v3951_v38 = vmax.f32 %v3555_v9, %v3557_v10  ;;  %v3954_v9 = vmax.f32 %v3573_v18, %v3575_v19 }
 0x158   : > { %3939 = vst [vmem:[#allocation8_spill] sm:$0xff] %v3711_v35  ;;  %3940 = vst [vmem:[#allocation9_spill] sm:$0xff] %v3713_v32  ;;  %v3717_v29 = vpop.f32.mrb[27].mxu0  ;;  %v3719_v26 = vpop.f32.mrb[27].mxu1  ;;  %v3752_v35 = vld [vmem:[%s3915_s2] ss:$0 sm:$0xff] }
 0x159   : > { %3941 = vst [vmem:[#allocation10_spill] sm:$0xff] %v3717_v29  ;;  %3942 = vst [vmem:[#allocation11_spill] sm:$0xff] %v3719_v26 }
 0x15d   : > { %v3723_v23 = vpop.f32.mrb[28].mxu0  ;;  %v3725_v20 = vpop.f32.mrb[28].mxu1 }
 0x15e   : > { %3943 = vst [vmem:[#allocation12_spill] sm:$0xff] %v3723_v23  ;;  %3944 = vst [vmem:[#allocation13_spill] sm:$0xff] %v3725_v20  ;;  %v3729_v17 = vpop.f32.mrb[29].mxu0  ;;  %v3731_v14 = vpop.f32.mrb[29].mxu1 }
 0x15f   : > { %3945 = vst [vmem:[#allocation14_spill] sm:$0xff] %v3729_v17  ;;  %3946 = vst [vmem:[#allocation15_spill] sm:$0xff] %v3731_v14  ;;  %v3735_v11 = vpop.f32.mrb[30].mxu0  ;;  %v3737_v32 = vpop.f32.mrb[30].mxu1 }
 0x160   : > { %3947 = vst [vmem:[#allocation16_spill] sm:$0xff] %v3735_v11  ;;  %3948 = vst [vmem:[#allocation17_spill] sm:$0xff] %v3737_v32  ;;  %v3741_v26 = vpop.f32.mrb[31].mxu0  ;;  %v3743_v29 = vpop.f32.mrb[31].mxu1 }
 0x161   : > { %3949 = vst [vmem:[#allocation18_spill] sm:$0xff] %v3741_v26  ;;  %3950 = vst [vmem:[#allocation19_spill] sm:$0xff] %v3743_v29 }
 0x165   : > { %v3030_v20 = vpop.f32.mrb[32].mxu0  ;;  %v3072_v23 = vpop.f32.mrb[32].mxu1 }
 0x166   : > { %v2092_v7 = vmax.f32 %v3030_v20, %v3072_v23  ;;  %v1609_v14 = vpop.f32.mrb[33].mxu0  ;;  %v1931_v17 = vpop.f32.mrb[33].mxu1  ;;  %v3952_v20 = vmax.f32 %v3561_v12, %v3563_v13 }
 0x167   : > { %v2090_v1 = vmax.f32 %v1609_v14, %v1931_v17  ;;  %v3031_v32 = vpop.f32.mrb[34].mxu0  ;;  %v3073_v11 = vpop.f32.mrb[34].mxu1  ;;  %v3953_v14 = vmax.f32 %v3567_v15, %v3569_v16 }
 0x168   : > { %v2124_v4 = vmax.f32 %v3951_v38, %v2092_v7  ;;  %v2093_v29 = vmax.f32 %v3031_v32, %v3073_v11  ;;  %v1612_v26 = vpop.f32.mrb[35].mxu0  ;;  %v1934_v41 = vpop.f32.mrb[35].mxu1 }
 0x169   : > { %v2122_v23 = vmax.f32 %v3952_v20, %v2090_v1  ;;  %v2091_v44 = vmax.f32 %v1612_v26, %v1934_v41 }
 0x16a   : > { %v2163_v47 = vadd.f32 %v3752_v35, %v2124_v4  ;;  %v2125_v17 = vmax.f32 %v3953_v14, %v2093_v29 }
 0x16b   : > { %v2161_v50 = vadd.f32 %v3752_v35, %v2122_v23  ;;  %v2123_v10 = vmax.f32 %v3954_v9, %v2091_v44 }
 0x16c   : > { %v2164_v11 = vadd.f32 %v3752_v35, %v2125_v17  ;;  %v2195_v26 = vmax.f32 %v2163_v47, 0.0  ;;  %v3955_v47 = vmax.f32 %v3579_v21, %v3581_v22  ;;  %v3956_v17 = vmax.f32 %v3585_v24, %v3587_v25 }
 0x16d   : > { %v2162_v32 = vadd.f32 %v3752_v35, %v2123_v10  ;;  %v3034_v12 = vpop.f32.mrb[36].mxu0  ;;  %v3076_v13 = vpop.f32.mrb[36].mxu1  ;;  %v2193_v15 = vmax.f32 %v2161_v50, 0.0  ;;  %v3958_v22 = vmax.f32 %v3597_v30, %v3599_v31  ;;  %v3959_v31 = vmax.f32 %v3603_v33, %v3605_v34 }
 0x16e   : > { %v2196_v38 = vmax.f32 %v2164_v11, 0.0  ;;  %v2096_v41 = vmax.f32 %v3034_v12, %v3076_v13  ;;  %v1625_v1 = vpop.f32.mrb[37].mxu0  ;;  %v1947_v4 = vpop.f32.mrb[37].mxu1  ;;  %v3962_v34 = vmax.f32 %v3621_v42, %v3623_v43  ;;  %v3963_v43 = vmax.f32 %v3627_v45, %v3629_v46 }
 0x16f   : > { %v2194_v16 = vmax.f32 %v2162_v32, 0.0  ;;  %v2094_v18 = vmax.f32 %v1625_v1, %v1947_v4  ;;  %v3035_v19 = vpop.f32.mrb[38].mxu0  ;;  %v3077_v29 = vpop.f32.mrb[38].mxu1  ;;  %v3957_v32 = vmax.f32 %v3591_v27, %v3593_v28  ;;  %v3966_v46 = vmax.f32 %v3645_v54, %v3647_v55 }
 0x170   : > { %v2763_v44 = vpack.c.bf16 %v2196_v38, %v2195_v26  ;;  %v2128_v7 = vmax.f32 %v3955_v47, %v2096_v41  ;;  %v2097_v20 = vmax.f32 %v3035_v19, %v3077_v29  ;;  %v1628_v23 = vpop.f32.mrb[39].mxu0  ;;  %v1950_v14 = vpop.f32.mrb[39].mxu1  ;;  %v3967_v55 = vmax.f32 %v3651_v57, %v3653_v58 }
 0x171   : > { %v2758_v50 = vpack.c.bf16 %v2194_v16, %v2193_v15  ;;  %v2126_v9 = vmax.f32 %v3956_v17, %v2094_v18  ;;  %v2095_v10 = vmax.f32 %v1628_v23, %v1950_v14  ;;  %v3960_v14 = vmax.f32 %v3609_v36, %v3611_v37 }
 0x172   : > { %2835 = vst [vmem:[%s3773_s22 + $0x8] sm:$0xff] %v2763_v44   ;;  %v2167_v11 = vadd.f32 %v3752_v35, %v2128_v7  ;;  %v2129_v12 = vmax.f32 %v3957_v32, %v2097_v20  ;;  %v3970_v58 = vmax.f32 %v3669_v2, %v3671_v3  ;;  %v3971_v3 = vmax.f32 %v3675_v5, %v3677_v6  ;;  %v3974_v6 = vld [vmem:[#allocation3_spill] sm:$0xff] }
 0x173   : > { %2759 = vst [vmem:[%s3773_s22] sm:$0xff] %v2758_v50   ;;  %v2165_v21 = vadd.f32 %v3752_v35, %v2126_v9  ;;  %v2127_v13 = vmax.f32 %v3958_v22, %v2095_v10  ;;  %v3961_v10 = vmax.f32 %v3615_v39, %v3617_v40 }
 0x174   : > { %v2168_v26 = vadd.f32 %v3752_v35, %v2129_v12  ;;  %v2199_v41 = vmax.f32 %v2167_v11, 0.0 }
 0x175   : > { %v2166_v24 = vadd.f32 %v3752_v35, %v2127_v13  ;;  %v3038_v25 = vpop.f32.mrb[40].mxu0  ;;  %v3080_v38 = vpop.f32.mrb[40].mxu1  ;;  %v2197_v28 = vmax.f32 %v2165_v21, 0.0 }
 0x176   : > { %v2200_v1 = vmax.f32 %v2168_v26, 0.0  ;;  %v2100_v4 = vmax.f32 %v3038_v25, %v3080_v38  ;;  %v1641_v15 = vpop.f32.mrb[41].mxu0  ;;  %v1963_v27 = vpop.f32.mrb[41].mxu1 }
 0x177   : > { %v2198_v16 = vmax.f32 %v2166_v24, 0.0  ;;  %v2098_v18 = vmax.f32 %v1641_v15, %v1963_v27  ;;  %v3039_v19 = vpop.f32.mrb[42].mxu0  ;;  %v3081_v29 = vpop.f32.mrb[42].mxu1 }
 0x178   : > { %v2773_v30 = vpack.c.bf16 %v2200_v1, %v2199_v41  ;;  %v2132_v44 = vmax.f32 %v3959_v31, %v2100_v4  ;;  %v2101_v47 = vmax.f32 %v3039_v19, %v3081_v29  ;;  %v1644_v7 = vpop.f32.mrb[43].mxu0  ;;  %v1966_v20 = vpop.f32.mrb[43].mxu1  ;;  %v3965_v31 = vmax.f32 %v3639_v51, %v3641_v52 }
 0x179   : > { %v2768_v23 = vpack.c.bf16 %v2198_v16, %v2197_v28  ;;  %v2130_v50 = vmax.f32 %v3960_v14, %v2098_v18  ;;  %v2099_v17 = vmax.f32 %v1644_v7, %v1966_v20  ;;  %v3964_v18 = vmax.f32 %v3633_v48, %v3635_v49 }
 0x17a   : > { %2837 = vst [vmem:[%s3773_s22 + $0x18] sm:$0xff] %v2773_v30   ;;  %v2171_v9 = vadd.f32 %v3752_v35, %v2132_v44  ;;  %v2133_v11 = vmax.f32 %v3961_v10, %v2101_v47 }
 0x17b   : > { %2836 = vst [vmem:[%s3773_s22 + $0x10] sm:$0xff] %v2768_v23   ;;  %v2169_v33 = vadd.f32 %v3752_v35, %v2130_v50  ;;  %v2131_v32 = vmax.f32 %v3962_v34, %v2099_v17 }
 0x17c   : > { %v2172_v12 = vadd.f32 %v3752_v35, %v2133_v11  ;;  %v2203_v22 = vmax.f32 %v2171_v9, 0.0 }
 0x17d   : > { %v2170_v36 = vadd.f32 %v3752_v35, %v2131_v32  ;;  %v3042_v37 = vpop.f32.mrb[44].mxu0  ;;  %v3084_v21 = vpop.f32.mrb[44].mxu1  ;;  %v2201_v40 = vmax.f32 %v2169_v33, 0.0 }
 0x17e   : > { %v2204_v13 = vmax.f32 %v2172_v12, 0.0  ;;  %v2104_v26 = vmax.f32 %v3042_v37, %v3084_v21  ;;  %v1657_v24 = vpop.f32.mrb[45].mxu0  ;;  %v1979_v39 = vpop.f32.mrb[45].mxu1  ;;  %v3968_v21 = vmax.f32 %v3657_v60, %v3659_v61 }
 0x17f   : > { %v2202_v25 = vmax.f32 %v2170_v36, 0.0  ;;  %v2102_v38 = vmax.f32 %v1657_v24, %v1979_v39  ;;  %v3043_v41 = vpop.f32.mrb[46].mxu0  ;;  %v3085_v1 = vpop.f32.mrb[46].mxu1  ;;  %v3969_v24 = vmax.f32 %v3663_v63, %v3665_v0 }
 0x180   : > { %v2783_v42 = vpack.c.bf16 %v2204_v13, %v2203_v22  ;;  %v2136_v4 = vmax.f32 %v3963_v43, %v2104_v26  ;;  %v2105_v15 = vmax.f32 %v3043_v41, %v3085_v1  ;;  %v1660_v27 = vpop.f32.mrb[47].mxu0  ;;  %v1982_v28 = vpop.f32.mrb[47].mxu1 }
 0x181   : > { %v2778_v16 = vpack.c.bf16 %v2202_v25, %v2201_v40  ;;  %v2134_v19 = vmax.f32 %v3964_v18, %v2102_v38  ;;  %v2103_v29 = vmax.f32 %v1660_v27, %v1982_v28 }
 0x182   : > { %2839 = vst [vmem:[%s3773_s22 + $0x28] sm:$0xff] %v2783_v42   ;;  %v2175_v30 = vadd.f32 %v3752_v35, %v2136_v4  ;;  %v2137_v44 = vmax.f32 %v3965_v31, %v2105_v15  ;;  %v3972_v31 = vmax.f32 %v3681_v8, %v3683_v62 }
 0x183   : > { %2838 = vst [vmem:[%s3773_s22 + $0x20] sm:$0xff] %v2778_v16   ;;  %v2173_v45 = vadd.f32 %v3752_v35, %v2134_v19  ;;  %v2135_v47 = vmax.f32 %v3966_v46, %v2103_v29 }
 0x184   : > { %v2176_v7 = vadd.f32 %v3752_v35, %v2137_v44  ;;  %v2207_v23 = vmax.f32 %v2175_v30, 0.0 }
 0x185   : > { %v2174_v48 = vadd.f32 %v3752_v35, %v2135_v47  ;;  %v3046_v49 = vpop.f32.mrb[48].mxu0  ;;  %v3088_v20 = vpop.f32.mrb[48].mxu1  ;;  %v2205_v52 = vmax.f32 %v2173_v45, 0.0  ;;  %v3973_v47 = vmax.f32 %v3687_v59, %v3689_v56 }
 0x186   : > { %v2208_v14 = vmax.f32 %v2176_v7, 0.0  ;;  %v2108_v50 = vmax.f32 %v3046_v49, %v3088_v20  ;;  %v1673_v17 = vpop.f32.mrb[49].mxu0  ;;  %v1995_v51 = vpop.f32.mrb[49].mxu1 }
 0x187   : > { %v2206_v9 = vmax.f32 %v2174_v48, 0.0  ;;  %v2106_v10 = vmax.f32 %v1673_v17, %v1995_v51  ;;  %v3047_v11 = vpop.f32.mrb[50].mxu0  ;;  %v3089_v33 = vpop.f32.mrb[50].mxu1  ;;  %v3975_v48 = vmax.f32 %v3693_v53, %v3974_v6 }
 0x188   : > { %v2793_v54 = vpack.c.bf16 %v2208_v14, %v2207_v23  ;;  %v2140_v34 = vmax.f32 %v3967_v55, %v2108_v50  ;;  %v2109_v32 = vmax.f32 %v3047_v11, %v3089_v33  ;;  %v1676_v12 = vpop.f32.mrb[51].mxu0  ;;  %v1998_v36 = vpop.f32.mrb[51].mxu1  ;;  %v3976_v33 = vld [vmem:[#allocation4_spill] sm:$0xff] }
 0x189   : > { %v2788_v37 = vpack.c.bf16 %v2206_v9, %v2205_v52  ;;  %v2138_v22 = vmax.f32 %v3968_v21, %v2106_v10  ;;  %v2107_v13 = vmax.f32 %v1676_v12, %v1998_v36  ;;  %v3979_v21 = vld [vmem:[#allocation6_spill] sm:$0xff] }
 0x18a   : > { %2841 = vst [vmem:[%s3773_s22 + $0x38] sm:$0xff] %v2793_v54   ;;  %v2179_v26 = vadd.f32 %v3752_v35, %v2140_v34  ;;  %v2141_v39 = vmax.f32 %v3969_v24, %v2109_v32  ;;  %v3977_v54 = vld [vmem:[#allocation5_spill] sm:$0xff] }
 0x18b   : > { %2840 = vst [vmem:[%s3773_s22 + $0x30] sm:$0xff] %v2788_v37   ;;  %v2177_v57 = vadd.f32 %v3752_v35, %v2138_v22  ;;  %v2139_v40 = vmax.f32 %v3970_v58, %v2107_v13  ;;  %v3978_v55 = vmax.f32 %v3976_v33, %v3977_v54  ;;  %v3980_v22 = vld [vmem:[#allocation7_spill] sm:$0xff]  ;;  %v3983_v58 = vld [vmem:[#allocation9_spill] sm:$0xff] }
 0x18c   : > { %v2180_v25 = vadd.f32 %v3752_v35, %v2141_v39  ;;  %v2211_v41 = vmax.f32 %v2179_v26, 0.0  ;;  %v3981_v13 = vmax.f32 %v3979_v21, %v3980_v22 }
 0x18d   : > { %v2178_v60 = vadd.f32 %v3752_v35, %v2139_v40  ;;  %v3050_v61 = vpop.f32.mrb[52].mxu0  ;;  %v3092_v38 = vpop.f32.mrb[52].mxu1  ;;  %v2209_v0 = vmax.f32 %v2177_v57, 0.0  ;;  %v3982_v57 = vld [vmem:[#allocation8_spill] sm:$0xff] }
 0x18e   : > { %v2212_v1 = vmax.f32 %v2180_v25, 0.0  ;;  %v2112_v42 = vmax.f32 %v3050_v61, %v3092_v38  ;;  %v1689_v43 = vpop.f32.mrb[53].mxu0  ;;  %v2011_v63 = vpop.f32.mrb[53].mxu1  ;;  %v3984_v40 = vmax.f32 %v3982_v57, %v3983_v58  ;;  %v3985_v61 = vld [vmem:[#allocation10_spill] sm:$0xff]  ;;  %v3986_v38 = vld [vmem:[#allocation11_spill] sm:$0xff] }
 0x18f   : > { %v2210_v4 = vmax.f32 %v2178_v60, 0.0  ;;  %v2110_v15 = vmax.f32 %v1689_v43, %v2011_v63  ;;  %v3051_v27 = vpop.f32.mrb[54].mxu0  ;;  %v3093_v28 = vpop.f32.mrb[54].mxu1 }
 0x190   : > { %v2803_v2 = vpack.c.bf16 %v2212_v1, %v2211_v41  ;;  %v2144_v16 = vmax.f32 %v3971_v3, %v2112_v42  ;;  %v2113_v18 = vmax.f32 %v3051_v27, %v3093_v28  ;;  %v1692_v19 = vpop.f32.mrb[55].mxu0  ;;  %v2014_v29 = vpop.f32.mrb[55].mxu1  ;;  %v3987_v41 = vmax.f32 %v3985_v61, %v3986_v38 }
 0x191   : > { %v2798_v30 = vpack.c.bf16 %v2210_v4, %v2209_v0  ;;  %v2142_v44 = vmax.f32 %v3972_v31, %v2110_v15  ;;  %v2111_v45 = vmax.f32 %v1692_v19, %v2014_v29  ;;  %v3988_v31 = vld [vmem:[#allocation12_spill] sm:$0xff] }
 0x192   : > { %2843 = vst [vmem:[%s3773_s22 + $0x48] sm:$0xff] %v2803_v2   ;;  %v2183_v46 = vadd.f32 %v3752_v35, %v2144_v16  ;;  %v2145_v7 = vmax.f32 %v3973_v47, %v2113_v18 }
 0x193   : > { %2842 = vst [vmem:[%s3773_s22 + $0x40] sm:$0xff] %v2798_v30   ;;  %v2181_v5 = vadd.f32 %v3752_v35, %v2142_v44  ;;  %v2143_v49 = vmax.f32 %v3975_v48, %v2111_v45  ;;  %v3989_v44 = vld [vmem:[#allocation13_spill] sm:$0xff]  ;;  %v3991_v48 = vld [vmem:[#allocation14_spill] sm:$0xff] }
 0x194   : > { %v2184_v20 = vadd.f32 %v3752_v35, %v2145_v7  ;;  %v2215_v14 = vmax.f32 %v2183_v46, 0.0  ;;  %v3990_v45 = vmax.f32 %v3988_v31, %v3989_v44 }
 0x195   : > { %v2182_v62 = vadd.f32 %v3752_v35, %v2143_v49  ;;  %v3054_v8 = vpop.f32.mrb[56].mxu0  ;;  %v3096_v23 = vpop.f32.mrb[56].mxu1  ;;  %v2213_v59 = vmax.f32 %v2181_v5, 0.0  ;;  %v3992_v49 = vld [vmem:[#allocation15_spill] sm:$0xff] }
 0x196   : > { %v2216_v50 = vmax.f32 %v2184_v20, 0.0  ;;  %v2116_v17 = vmax.f32 %v3054_v8, %v3096_v23  ;;  %v1705_v51 = vpop.f32.mrb[57].mxu0  ;;  %v2027_v56 = vpop.f32.mrb[57].mxu1  ;;  %v3993_v20 = vmax.f32 %v3991_v48, %v3992_v49 }
 0x197   : > { %v2214_v52 = vmax.f32 %v2182_v62, 0.0  ;;  %v2114_v9 = vmax.f32 %v1705_v51, %v2027_v56  ;;  %v3055_v10 = vpop.f32.mrb[58].mxu0  ;;  %v3097_v11 = vpop.f32.mrb[58].mxu1 }
 0x198   : > { %v2813_v53 = vpack.c.bf16 %v2216_v50, %v2215_v14  ;;  %v2148_v34 = vmax.f32 %v3978_v55, %v2116_v17  ;;  %v2117_v32 = vmax.f32 %v3055_v10, %v3097_v11  ;;  %v1708_v12 = vpop.f32.mrb[59].mxu0  ;;  %v2030_v36 = vpop.f32.mrb[59].mxu1  ;;  %v3994_v14 = vld [vmem:[#allocation16_spill] sm:$0xff]  ;;  %v3995_v50 = vld [vmem:[#allocation17_spill] sm:$0xff] }
 0x199   : > { %v2808_v37 = vpack.c.bf16 %v2214_v52, %v2213_v59  ;;  %v2146_v26 = vmax.f32 %v3981_v13, %v2114_v9  ;;  %v2115_v24 = vmax.f32 %v1708_v12, %v2030_v36  ;;  %v3996_v17 = vmax.f32 %v3994_v14, %v3995_v50  ;;  %v3997_v59 = vld [vmem:[#allocation18_spill] sm:$0xff]  ;;  %v3998_v52 = vld [vmem:[#allocation19_spill] sm:$0xff] }
 0x19a   : > { %2845 = vst [vmem:[%s3773_s22 + $0x58] sm:$0xff] %v2813_v53   ;;  %v2187_v39 = vadd.f32 %v3752_v35, %v2148_v34  ;;  %v2149_v25 = vmax.f32 %v3984_v40, %v2117_v32  ;;  %v3999_v9 = vmax.f32 %v3997_v59, %v3998_v52 }
 0x19b   : > { %2844 = vst [vmem:[%s3773_s22 + $0x50] sm:$0xff] %v2808_v37   ;;  %v2185_v60 = vadd.f32 %v3752_v35, %v2146_v26  ;;  %v2147_v1 = vmax.f32 %v3987_v41, %v2115_v24 }
 0x19c   : > { %v2188_v42 = vadd.f32 %v3752_v35, %v2149_v25  ;;  %v2219_v4 = vmax.f32 %v2187_v39, 0.0 }
 0x19d   : > { %v2186_v43 = vadd.f32 %v3752_v35, %v2147_v1  ;;  %v3058_v63 = vpop.f32.mrb[60].mxu0  ;;  %v3100_v0 = vpop.f32.mrb[60].mxu1  ;;  %v2217_v3 = vmax.f32 %v2185_v60, 0.0 }
 0x19e   : > { %v2220_v15 = vmax.f32 %v2188_v42, 0.0  ;;  %v2120_v27 = vmax.f32 %v3058_v63, %v3100_v0  ;;  %v1721_v28 = vpop.f32.mrb[61].mxu0  ;;  %v2043_v2 = vpop.f32.mrb[61].mxu1 }
 0x19f   : > { %v2218_v16 = vmax.f32 %v2186_v43, 0.0  ;;  %v2118_v18 = vmax.f32 %v1721_v28, %v2043_v2  ;;  %v3059_v19 = vpop.f32.mrb[62].mxu0  ;;  %v3101_v29 = vpop.f32.mrb[62].mxu1 }
 0x1a0   : > { %v2823_v30 = vpack.c.bf16 %v2220_v15, %v2219_v4  ;;  %v2152_v46 = vmax.f32 %v3990_v45, %v2120_v27  ;;  %v2121_v47 = vmax.f32 %v3059_v19, %v3101_v29  ;;  %v1724_v7 = vpop.f32.mrb[63].mxu0  ;;  %v2046_v5 = vpop.f32.mrb[63].mxu1 }
 0x1a1   : > { %v2818_v6 = vpack.c.bf16 %v2218_v16, %v2217_v3  ;;  %v2150_v62 = vmax.f32 %v3993_v20, %v2118_v18  ;;  %v2119_v8 = vmax.f32 %v1724_v7, %v2046_v5 }
 0x1a2   : > { %2847 = vst [vmem:[%s3773_s22 + $0x68] sm:$0xff] %v2823_v30   ;;  %v2191_v23 = vadd.f32 %v3752_v35, %v2152_v46  ;;  %v2153_v51 = vmax.f32 %v3996_v17, %v2121_v47 }
 0x1a3   : > { %2846 = vst [vmem:[%s3773_s22 + $0x60] sm:$0xff] %v2818_v6   ;;  %v2189_v56 = vadd.f32 %v3752_v35, %v2150_v62  ;;  %v2151_v10 = vmax.f32 %v3999_v9, %v2119_v8 }
 0x1a4   : > { %v2192_v11 = vadd.f32 %v3752_v35, %v2153_v51  ;;  %v2223_v33 = vmax.f32 %v2191_v23, 0.0 }
 0x1a5   : > { %v2190_v53 = vadd.f32 %v3752_v35, %v2151_v10  ;;  %v2221_v55 = vmax.f32 %v2189_v56, 0.0 }
 0x1a6   : > { %v2224_v54 = vmax.f32 %v2192_v11, 0.0 }
 0x1a7   : > { %v2222_v34 = vmax.f32 %v2190_v53, 0.0 }
 0x1a8   : > { %v2833_v32 = vpack.c.bf16 %v2224_v54, %v2223_v33 }
 0x1a9   : > { %v2828_v12 = vpack.c.bf16 %v2222_v34, %v2221_v55 }
 0x1aa   : > { %2849 = vst [vmem:[%s3773_s22 + $0x78] sm:$0xff] %v2833_v32  }
 0x1ab   : > { %2848 = vst [vmem:[%s3773_s22 + $0x70] sm:$0xff] %v2828_v12  }
 0x1ac PF: > { %p10_p9 = scmp.ge.s32.totalorder %s3258_s16, 4   ;;  %s4000_s12 = smov %s3214_s13 }
 0x1ad   : > { %s4001_s13 = smov %s3267_s19  ;;  %s4002_s14 = smov %s3258_s16 }
 0x1ae   :  { %12 = sbr.rel (!%p10_p9) target bundleno = 2 (0x2), region = 111 }

// kernel: net_forward.5
= control target key start
LH: loop header
LB: loop body
LE: loop exit
PB: predicated region body
PF: predicated region fallthrough
CT: control target
= control target key end

     0   :  { %s1347_s12 = smov 0   ;;  %s1349_s13 = smov 0   ;;  %s1741_s0 = inlined_call_operand.vmem [shape: bf16[4,128,200], index: 0, kind: input, shape index: {}]   ;;  %s1742_s1 = inlined_call_operand.vmem [shape: bf16[200,128], index: 1, kind: input, shape index: {}]   ;;  %s1743_s2 = inlined_call_operand.vmem [shape: f32[1,128], index: 2, kind: input, shape index: {}]   ;;  %s1744_s3 = inlined_call_operand.vmem [shape: bf16[128,128], index: 3, kind: output, shape index: {}]  }
   0x1   :  { %s1351_s14 = smov 0  }
   0x2 LB: > { %s1075_s15 = sadd.s32 4294967295, %s1324_s14   ;;  %s1364_s16 = sadd.s32 1, %s1324_s14   ;;  %s1324_s14 = sphi %s1351_s14, %s1747_s14   ;;  %s1320_s13 = sphi %s1349_s13, %s1746_s13   ;;  %s1316_s12 = sphi %s1347_s12, %s1745_s12  }
   0x3   : > { %s17_s17 = ssub.s32 %s1324_s14, %s1364_s16  ;;  %s20_s18 = sadd.s32 1, %s1320_s13 }
   0x4   : > { %p18_p0 = scmp.eq.s32.totalorder %s17_s17, 0  ;;  %p27_p1 = scmp.ne.s32.totalorder %s1320_s13, %s1316_s12 }
   0x5   : > { %p28_p2 = scmp.eq.s32.totalorder %s1324_s14, 0  ;;  %p1078_p4 = scmp.ge.s32.totalorder %s1324_s14, 2 }
   0x6   : > { %s1373_s19 = scalar_select %p18_p0, %s1320_s13, %s20_s18  }
   0x7   : > { %p29_p3 = por %p28_p2, %p27_p1  ;;  %127 = sbr.rel (%p1078_p4) target bundleno = 34 (0x22), region = 24 }
   0xe   : > { %130 = sbr.rel (!%p29_p3) target bundleno = 34 (0x22), region = 28  ;;  %s132_s20 = sand.u32 (%p29_p3), 1, %s1320_s13  }
   0xf   : > { %s1184_s21 = sshll.u32 (%p29_p3), %s1324_s14, 6  ;;  %s1079_s22 = sshll.u32 (%p29_p3), %s132_s20, 8 }
  0x10   : > { %s1381_s25 = scalar_lea.vmem (%p29_p3), %s1741_s0, %s1184_s21  ;;  %s1386_s26 = scalar_lea.vmem (%p29_p3), [#allocation2], %s1079_s22 }
  0x11   : > { %v228_v0 = vld [vmem:[%s1381_s25] sm:$0xff] (%p29_p3)  ;;  %v230_v1 = vld [vmem:[%s1381_s25 + $0x8] sm:$0xff] (%p29_p3)  ;;  %v232_v2 = vld [vmem:[%s1381_s25 + $0x10] sm:$0xff] (%p29_p3) }
  0x12   : > { %229 = vst [vmem:[%s1386_s26] sm:$0xff] (%p29_p3), %v228_v0  ;;  %231 = vst [vmem:[%s1386_s26 + $0x8] sm:$0xff] (%p29_p3), %v230_v1  ;;  %v234_v3 = vld [vmem:[%s1381_s25 + $0x18] sm:$0xff] (%p29_p3)  ;;  %v236_v4 = vld [vmem:[%s1381_s25 + $0x20] sm:$0xff] (%p29_p3) }
  0x13   : > { %233 = vst [vmem:[%s1386_s26 + $0x10] sm:$0xff] (%p29_p3), %v232_v2  ;;  %v238_v5 = vld [vmem:[%s1381_s25 + $0x28] sm:$0xff] (%p29_p3)  ;;  %235 = vst [vmem:[%s1386_s26 + $0x18] sm:$0xff] (%p29_p3), %v234_v3  ;;  %v240_v6 = vld [vmem:[%s1381_s25 + $0x30] sm:$0xff] (%p29_p3) }
  0x14   : > { %237 = vst [vmem:[%s1386_s26 + $0x20] sm:$0xff] (%p29_p3), %v236_v4  ;;  %239 = vst [vmem:[%s1386_s26 + $0x28] sm:$0xff] (%p29_p3), %v238_v5  ;;  %v242_v7 = vld [vmem:[%s1381_s25 + $0x38] sm:$0xff] (%p29_p3)  ;;  %v244_v8 = vld [vmem:[%s1381_s25 + $0x80] sm:$0xff] (%p29_p3) }
  0x15   : > { %241 = vst [vmem:[%s1386_s26 + $0x30] sm:$0xff] %v240_v6  ;;  %243 = vst [vmem:[%s1386_s26 + $0x38] sm:$0xff] %v242_v7  ;;  %v246_v9 = vld [vmem:[%s1381_s25 + $0x88] sm:$0xff]  ;;  %v248_v10 = vld [vmem:[%s1381_s25 + $0x90] sm:$0xff] }
  0x16   : > { %245 = vst [vmem:[%s1386_s26 + $0x40] sm:$0xff] %v244_v8  ;;  %v250_v11 = vld [vmem:[%s1381_s25 + $0x98] sm:$0xff]  ;;  %247 = vst [vmem:[%s1386_s26 + $0x48] sm:$0xff] %v246_v9  ;;  %v252_v12 = vld [vmem:[%s1381_s25 + $0xa0] sm:$0xff] }
  0x17   : > { %249 = vst [vmem:[%s1386_s26 + $0x50] sm:$0xff] %v248_v10  ;;  %251 = vst [vmem:[%s1386_s26 + $0x58] sm:$0xff] %v250_v11  ;;  %v254_v13 = vld [vmem:[%s1381_s25 + $0xa8] sm:$0xff]  ;;  %v256_v14 = vld [vmem:[%s1381_s25 + $0xb0] sm:$0xff] }
  0x18   : > { %253 = vst [vmem:[%s1386_s26 + $0x60] sm:$0xff] %v252_v12  ;;  %255 = vst [vmem:[%s1386_s26 + $0x68] sm:$0xff] %v254_v13  ;;  %v258_v15 = vld [vmem:[%s1381_s25 + $0xb8] sm:$0xff]  ;;  %v260_v16 = vld [vmem:[%s1381_s25 + $0x100] sm:$0xff] }
  0x19   : > { %257 = vst [vmem:[%s1386_s26 + $0x70] sm:$0xff] %v256_v14  ;;  %v262_v17 = vld [vmem:[%s1381_s25 + $0x108] sm:$0xff]  ;;  %259 = vst [vmem:[%s1386_s26 + $0x78] sm:$0xff] %v258_v15  ;;  %v264_v18 = vld [vmem:[%s1381_s25 + $0x110] sm:$0xff] }
  0x1a   : > { %261 = vst [vmem:[%s1386_s26 + $0x80] sm:$0xff] %v260_v16  ;;  %263 = vst [vmem:[%s1386_s26 + $0x88] sm:$0xff] %v262_v17  ;;  %v266_v19 = vld [vmem:[%s1381_s25 + $0x118] sm:$0xff]  ;;  %v268_v20 = vld [vmem:[%s1381_s25 + $0x120] sm:$0xff] }
  0x1b   : > { %265 = vst [vmem:[%s1386_s26 + $0x90] sm:$0xff] %v264_v18  ;;  %267 = vst [vmem:[%s1386_s26 + $0x98] sm:$0xff] %v266_v19  ;;  %v270_v21 = vld [vmem:[%s1381_s25 + $0x128] sm:$0xff]  ;;  %v272_v22 = vld [vmem:[%s1381_s25 + $0x130] sm:$0xff] }
  0x1c   : > { %269 = vst [vmem:[%s1386_s26 + $0xa0] sm:$0xff] %v268_v20  ;;  %v274_v23 = vld [vmem:[%s1381_s25 + $0x138] sm:$0xff]  ;;  %271 = vst [vmem:[%s1386_s26 + $0xa8] sm:$0xff] %v270_v21  ;;  %v276_v24 = vld [vmem:[%s1381_s25 + $0x180] sm:$0xff] }
  0x1d   : > { %273 = vst [vmem:[%s1386_s26 + $0xb0] sm:$0xff] %v272_v22  ;;  %275 = vst [vmem:[%s1386_s26 + $0xb8] sm:$0xff] %v274_v23  ;;  %v278_v25 = vld [vmem:[%s1381_s25 + $0x188] sm:$0xff]  ;;  %v280_v26 = vld [vmem:[%s1381_s25 + $0x190] sm:$0xff] }
  0x1e   : > { %277 = vst [vmem:[%s1386_s26 + $0xc0] sm:$0xff] %v276_v24  ;;  %279 = vst [vmem:[%s1386_s26 + $0xc8] sm:$0xff] %v278_v25  ;;  %v282_v27 = vld [vmem:[%s1381_s25 + $0x198] sm:$0xff]  ;;  %v284_v28 = vld [vmem:[%s1381_s25 + $0x1a0] sm:$0xff] }
  0x1f   : > { %281 = vst [vmem:[%s1386_s26 + $0xd0] sm:$0xff] %v280_v26  ;;  %v286_v29 = vld [vmem:[%s1381_s25 + $0x1a8] sm:$0xff]  ;;  %283 = vst [vmem:[%s1386_s26 + $0xd8] sm:$0xff] %v282_v27  ;;  %v288_v30 = vld [vmem:[%s1381_s25 + $0x1b0] sm:$0xff] }
  0x20   : > { %285 = vst [vmem:[%s1386_s26 + $0xe0] sm:$0xff] %v284_v28  ;;  %287 = vst [vmem:[%s1386_s26 + $0xe8] sm:$0xff] %v286_v29  ;;  %v290_v31 = vld [vmem:[%s1381_s25 + $0x1b8] sm:$0xff] }
  0x21   : > { %289 = vst [vmem:[%s1386_s26 + $0xf0] sm:$0xff] %v288_v30  ;;  %291 = vst [vmem:[%s1386_s26 + $0xf8] sm:$0xff] %v290_v31 }
  0x22 PF: > { %p1083_p5 = scmp.ge.s32.totalorder %s1324_s14, 1  ;;  %p296_p6 = scmp.lt.s32.totalorder %s1324_s14, 3 }
  0x24   : > { %p297_p7 = pnand %p1083_p5, %p296_p6 }
  0x25   : > { %v1454_v32 = vld [vmem:[%s1742_s1] sm:$0xff] (!%p297_p7)   ;;  %v1326_v33 = vmov (!%p297_p7), 0   ;;  %v1463_v34 = vld [vmem:[%s1742_s1 + $0x8] sm:$0xff] (!%p297_p7)   ;;  %s303_s4 = sand.u32 (!%p297_p7), 1, %s1316_s12   ;;  %v1473_v35 = vld [vmem:[%s1742_s1 + $0x10] sm:$0xff] (!%p297_p7)   ;;  %vm478_vm0 = vcmask (!%p297_p7), 588800  }
  0x26   : > { %300 = sbr.rel (%p297_p7) target bundleno = 391 (0x187), region = 66  ;;  %495 = vmatprep.subr.bf16.mxu0 (!%p297_p7), %v1326_v33  ;;  %617 = vmatprep.subr.bf16.mxu1 (!%p297_p7), %v1326_v33  ;;  %s1084_s7 = sshll.u32 (!%p297_p7), %s303_s4, 8  ;;  %v1482_v36 = vld [vmem:[%s1742_s1 + $0x18] sm:$0xff] (!%p297_p7)   ;;  %v1494_v38 = vld [vmem:[%s1742_s1 + $0x20] sm:$0xff] (!%p297_p7)   ;;  %v1506_v40 = vld [vmem:[%s1742_s1 + $0x28] sm:$0xff] (!%p297_p7)   ;;  %vm491_vm1 = vcmask (!%p297_p7), 1043456  }
  0x27   : > { %496 = vmatpush1.bf16.msra.mxu0 (!%p297_p7), %v1454_v32  ;;  %618 = vmatpush1.bf16.msra.mxu1 (!%p297_p7), %v1454_v32  ;;  %s1486_s10 = scalar_lea.vmem (!%p297_p7), [#allocation2], %s1084_s7  ;;  %v1515_v41 = vld [vmem:[%s1742_s1 + $0x30] sm:$0xff] (!%p297_p7)   ;;  %v1524_v42 = vld [vmem:[%s1742_s1 + $0x38] sm:$0xff] (!%p297_p7)   ;;  %v1533_v43 = vld [vmem:[%s1742_s1 + $0x40] sm:$0xff] (!%p297_p7)   ;;  %s1085_s7 = sshll.u32 (!%p297_p7), %s1075_s15, 3 }
  0x28   : > { %497 = vmatprep.subr.bf16.mxu0 (!%p297_p7), %v1326_v33  ;;  %619 = vmatprep.subr.bf16.mxu1 (!%p297_p7), %v1326_v33  ;;  %v1256_v37 = vld [vmem:[%s1486_s10 + $0x4] ss:$8 sps:$4 sm:$0xff] (!%p297_p7)   ;;  %v1551_v45 = vld [vmem:[%s1742_s1 + $0x50] sm:$0xff] (!%p297_p7)   ;;  %v1560_v46 = vld [vmem:[%s1742_s1 + $0x58] sm:$0xff] (!%p297_p7)   ;;  %p328_p8 = scmp.lt.s32.totalorder (!%p297_p7), %s1085_s7, 15 }
  0x29   : > { %v1259_v39 = vld [vmem:[%s1486_s10 + $0x44] ss:$8 sps:$4 sm:$0xff] (!%p297_p7)   ;;  %1108 = vmatprep.mubr.msk.bf16.mxu0 (!%p297_p7), %vm478_vm0, %v1256_v37  ;;  %v1253_v47 = vld [vmem:[%s1742_s1 + $0x60] ss:$0 sps:$4 sm:$0xff] (!%p297_p7)   ;;  %v1260_v51 = vld [vmem:[%s1486_s10 + $0x14] ss:$8 sps:$4 sm:$0xff] (!%p297_p7)  }
  0x2a   : > { %1128 = vmatprep.mubr.msk.bf16.mxu1 (!%p297_p7), %vm478_vm0, %v1259_v39  ;;  %v1542_v44 = vld [vmem:[%s1742_s1 + $0x48] sm:$0xff] (!%p297_p7)   ;;  %v1571_v48 = vsel (!%p297_p7), %vm491_vm1, %v1253_v47, 0  ;;  %v1262_v52 = vld [vmem:[%s1486_s10 + $0x54] ss:$8 sps:$4 sm:$0xff] (!%p297_p7)   ;;  %v1264_v53 = vld [vmem:[%s1486_s10 + $0x10] ss:$8 sps:$4 sm:$0xff] (!%p297_p7)  }
  0x2b   : > { %498 = vmatpush1.bf16.msra.mxu0 (!%p297_p7), %v1463_v34  ;;  %620 = vmatpush1.bf16.msra.mxu1 (!%p297_p7), %v1463_v34  ;;  %v1254_v49 = vld [vmem:[%s1486_s10] ss:$8 sps:$4 sm:$0xff] (!%p297_p7)   ;;  %v1265_v54 = vld [vmem:[%s1486_s10 + $0x50] ss:$8 sps:$4 sm:$0xff] (!%p297_p7)   ;;  %v1266_v55 = vld [vmem:[%s1486_s10 + $0x24] ss:$8 sps:$4 sm:$0xff] (!%p297_p7)  }
  0x2c   : > { %499 = vmatprep.subr.bf16.mxu0 (!%p297_p7), %v1326_v33  ;;  %621 = vmatprep.subr.bf16.mxu1 (!%p297_p7), %v1326_v33  ;;  %v1257_v50 = vld [vmem:[%s1486_s10 + $0x40] ss:$8 sps:$4 sm:$0xff] (!%p297_p7)   ;;  %v1268_v56 = vld [vmem:[%s1486_s10 + $0x64] ss:$8 sps:$4 sm:$0xff] (!%p297_p7)   ;;  %v1272_v59 = vld [vmem:[%s1486_s10 + $0x34] ss:$8 sps:$4 sm:$0xff] (!%p297_p7)  }
  0x2d   : > { %v1270_v57 = vld [vmem:[%s1486_s10 + $0x20] ss:$8 sps:$4 sm:$0xff]   ;;  %v1274_v60 = vld [vmem:[%s1486_s10 + $0x74] ss:$8 sps:$4 sm:$0xff]   ;;  %v1276_v61 = vld [vmem:[%s1486_s10 + $0x30] ss:$8 sps:$4 sm:$0xff]  }
  0x2e   : > { %v1271_v58 = vld [vmem:[%s1486_s10 + $0x60] ss:$8 sps:$4 sm:$0xff]   ;;  %v1277_v62 = vld [vmem:[%s1486_s10 + $0x70] ss:$8 sps:$4 sm:$0xff]   ;;  %v1280_v63 = vld [vmem:[%s1486_s10 + $0x84] ss:$8 sps:$4 sm:$0xff]  }
  0x2f   : > { %500 = vmatpush1.bf16.msra.mxu0 %v1473_v35  ;;  %622 = vmatpush1.bf16.msra.mxu1 %v1473_v35  ;;  %v1283_v0 = vld [vmem:[%s1486_s10 + $0xc4] ss:$8 sps:$4 sm:$0xff]   ;;  %v1278_v1 = vld [vmem:[%s1486_s10 + $0x80] ss:$8 sps:$4 sm:$0xff]   ;;  %v1284_v3 = vld [vmem:[%s1486_s10 + $0x94] ss:$8 sps:$4 sm:$0xff]  }
  0x30   : > { %501 = vmatprep.subr.bf16.mxu0 %v1326_v33  ;;  %623 = vmatprep.subr.bf16.mxu1 %v1326_v33  ;;  %v1281_v2 = vld [vmem:[%s1486_s10 + $0xc0] ss:$8 sps:$4 sm:$0xff]   ;;  %v1286_v4 = vld [vmem:[%s1486_s10 + $0xd4] ss:$8 sps:$4 sm:$0xff]   ;;  %v1288_v5 = vld [vmem:[%s1486_s10 + $0x90] ss:$8 sps:$4 sm:$0xff]  }
  0x31   : > { %v1289_v6 = vld [vmem:[%s1486_s10 + $0xd0] ss:$8 sps:$4 sm:$0xff]   ;;  %v1290_v7 = vld [vmem:[%s1486_s10 + $0xa4] ss:$8 sps:$4 sm:$0xff]   ;;  %v1294_v9 = vld [vmem:[%s1486_s10 + $0xa0] ss:$8 sps:$4 sm:$0xff]  }
  0x32   : > { %v1292_v8 = vld [vmem:[%s1486_s10 + $0xe4] ss:$8 sps:$4 sm:$0xff]   ;;  %v1295_v10 = vld [vmem:[%s1486_s10 + $0xe0] ss:$8 sps:$4 sm:$0xff]   ;;  %v1296_v11 = vld [vmem:[%s1486_s10 + $0xb4] ss:$8 sps:$4 sm:$0xff]  }
  0x33   : > { %502 = vmatpush1.bf16.msra.mxu0 %v1482_v36  ;;  %624 = vmatpush1.bf16.msra.mxu1 %v1482_v36  ;;  %v1298_v12 = vld [vmem:[%s1486_s10 + $0xf4] ss:$8 sps:$4 sm:$0xff]   ;;  %v1300_v13 = vld [vmem:[%s1486_s10 + $0xb0] ss:$8 sps:$4 sm:$0xff]   ;;  %s1749_s7 = smov (!%p328_p8, %s1085_s7), 15 }
  0x34   : > { %503 = vmatprep.subr.bf16.mxu0 %v1326_v33  ;;  %625 = vmatprep.subr.bf16.mxu1 %v1326_v33  ;;  %v1301_v14 = vld [vmem:[%s1486_s10 + $0xf0] ss:$8 sps:$4 sm:$0xff]   ;;  %s1086_s14 = sshll.u32 %s1749_s7, 2 }
  0x35   : > { %s1707_s11 = scalar_lea.vmem %s1744_s3, %s1086_s14 }
  0x37   : > { %504 = vmatpush1.bf16.msra.mxu0 %v1494_v38  ;;  %626 = vmatpush1.bf16.msra.mxu1 %v1494_v38 }
  0x38   : > { %505 = vmatprep.subr.bf16.mxu0 %v1326_v33  ;;  %627 = vmatprep.subr.bf16.mxu1 %v1326_v33 }
  0x3b   : > { %506 = vmatpush1.bf16.msra.mxu0 %v1506_v40  ;;  %628 = vmatpush1.bf16.msra.mxu1 %v1506_v40 }
  0x3c   : > { %507 = vmatprep.subr.bf16.mxu0 %v1326_v33  ;;  %629 = vmatprep.subr.bf16.mxu1 %v1326_v33 }
  0x3f   : > { %508 = vmatpush1.bf16.msra.mxu0 %v1515_v41  ;;  %630 = vmatpush1.bf16.msra.mxu1 %v1515_v41 }
  0x40   : > { %509 = vmatprep.subr.bf16.mxu0 %v1326_v33  ;;  %631 = vmatprep.subr.bf16.mxu1 %v1326_v33 }
  0x43   : > { %510 = vmatpush1.bf16.msra.mxu0 %v1524_v42  ;;  %632 = vmatpush1.bf16.msra.mxu1 %v1524_v42 }
  0x44   : > { %511 = vmatprep.subr.bf16.mxu0 %v1326_v33  ;;  %633 = vmatprep.subr.bf16.mxu1 %v1326_v33 }
  0x47   : > { %512 = vmatpush1.bf16.msra.mxu0 %v1533_v43  ;;  %634 = vmatpush1.bf16.msra.mxu1 %v1533_v43 }
  0x48   : > { %513 = vmatprep.subr.bf16.mxu0 %v1326_v33  ;;  %635 = vmatprep.subr.bf16.mxu1 %v1326_v33 }
  0x4b   : > { %514 = vmatpush1.bf16.msra.mxu0 %v1542_v44  ;;  %636 = vmatpush1.bf16.msra.mxu1 %v1542_v44 }
  0x4c   : > { %515 = vmatprep.subr.bf16.mxu0 %v1326_v33  ;;  %637 = vmatprep.subr.bf16.mxu1 %v1326_v33 }
  0x4f   : > { %516 = vmatpush1.bf16.msra.mxu0 %v1551_v45  ;;  %638 = vmatpush1.bf16.msra.mxu1 %v1551_v45 }
  0x50   : > { %517 = vmatprep.subr.bf16.mxu0 %v1326_v33  ;;  %639 = vmatprep.subr.bf16.mxu1 %v1326_v33 }
  0x53   : > { %518 = vmatpush1.bf16.msra.mxu0 %v1560_v46  ;;  %640 = vmatpush1.bf16.msra.mxu1 %v1560_v46 }
  0x54   : > { %519 = vmatprep.subr.bf16.mxu0 %v1326_v33  ;;  %641 = vmatprep.subr.bf16.mxu1 %v1326_v33 }
  0x57   : > { %520 = vmatpush1.bf16.msra.mxu0 %v1571_v48  ;;  %642 = vmatpush1.bf16.msra.mxu1 %v1571_v48 }
  0x58   : > { %739 = vmatprep.subr.bf16.mxu0 %v1326_v33  ;;  %861 = vmatprep.subr.bf16.mxu1 %v1326_v33 }
  0x5a   : > { %528 = vmatmul.mubr.bf16.vlgmr.msra.gmra.mrb[0].mxu0 %v1254_v49  ;;  %650 = vmatmul.mubr.bf16.vlgmr.msra.gmra.mrb[0].mxu1 %v1257_v50 }
  0x5b   : > { %740 = vmatpush1.bf16.msra.mxu0 %v1454_v32  ;;  %862 = vmatpush1.bf16.msra.mxu1 %v1454_v32 }
  0x5c   : > { %741 = vmatprep.subr.bf16.mxu0 %v1326_v33  ;;  %863 = vmatprep.subr.bf16.mxu1 %v1326_v33 }
  0x5d   : > { %1109 = vmatprep.mubr.msk.bf16.mxu0 %vm478_vm0, %v1260_v51  ;;  %1129 = vmatprep.mubr.msk.bf16.mxu1 %vm478_vm0, %v1262_v52 }
  0x5f   : > { %742 = vmatpush1.bf16.msra.mxu0 %v1463_v34  ;;  %864 = vmatpush1.bf16.msra.mxu1 %v1463_v34 }
  0x60   : > { %743 = vmatprep.subr.bf16.mxu0 %v1326_v33  ;;  %865 = vmatprep.subr.bf16.mxu1 %v1326_v33 }
  0x62   : > { %536 = vmatmul.mubr.bf16.gmra.mrb[4].mxu0 %v1264_v53  ;;  %658 = vmatmul.mubr.bf16.gmra.mrb[4].mxu1 %v1265_v54 }
  0x63   : > { %744 = vmatpush1.bf16.msra.mxu0 %v1473_v35  ;;  %866 = vmatpush1.bf16.msra.mxu1 %v1473_v35 }
  0x64   : > { %745 = vmatprep.subr.bf16.mxu0 %v1326_v33  ;;  %867 = vmatprep.subr.bf16.mxu1 %v1326_v33 }
  0x65   : > { %1110 = vmatprep.mubr.msk.bf16.mxu0 %vm478_vm0, %v1266_v55  ;;  %1130 = vmatprep.mubr.msk.bf16.mxu1 %vm478_vm0, %v1268_v56 }
  0x67   : > { %746 = vmatpush1.bf16.msra.mxu0 %v1482_v36  ;;  %868 = vmatpush1.bf16.msra.mxu1 %v1482_v36 }
  0x68   : > { %747 = vmatprep.subr.bf16.mxu0 %v1326_v33  ;;  %869 = vmatprep.subr.bf16.mxu1 %v1326_v33 }
  0x6a   : > { %544 = vmatmul.mubr.bf16.gmra.mrb[8].mxu0 %v1270_v57  ;;  %666 = vmatmul.mubr.bf16.gmra.mrb[8].mxu1 %v1271_v58 }
  0x6b   : > { %748 = vmatpush1.bf16.msra.mxu0 %v1494_v38  ;;  %870 = vmatpush1.bf16.msra.mxu1 %v1494_v38 }
  0x6c   : > { %749 = vmatprep.subr.bf16.mxu0 %v1326_v33  ;;  %871 = vmatprep.subr.bf16.mxu1 %v1326_v33 }
  0x6d   : > { %1111 = vmatprep.mubr.msk.bf16.mxu0 %vm478_vm0, %v1272_v59  ;;  %1131 = vmatprep.mubr.msk.bf16.mxu1 %vm478_vm0, %v1274_v60  ;;  %v1700_v60 = vld [vmem:[%s1743_s2] ss:$0 sm:$0xff] }
  0x6f   : > { %750 = vmatpush1.bf16.msra.mxu0 %v1506_v40  ;;  %872 = vmatpush1.bf16.msra.mxu1 %v1506_v40 }
  0x70   : > { %751 = vmatprep.subr.bf16.mxu0 %v1326_v33  ;;  %873 = vmatprep.subr.bf16.mxu1 %v1326_v33 }
  0x72   : > { %552 = vmatmul.mubr.bf16.gmra.mrb[12].mxu0 %v1276_v61  ;;  %674 = vmatmul.mubr.bf16.gmra.mrb[12].mxu1 %v1277_v62 }
  0x73   : > { %752 = vmatpush1.bf16.msra.mxu0 %v1515_v41  ;;  %874 = vmatpush1.bf16.msra.mxu1 %v1515_v41 }
  0x74   : > { %753 = vmatprep.subr.bf16.mxu0 %v1326_v33  ;;  %875 = vmatprep.subr.bf16.mxu1 %v1326_v33 }
  0x75   : > { %1148 = vmatprep.mubr.msk.bf16.mxu0 %vm478_vm0, %v1280_v63  ;;  %1168 = vmatprep.mubr.msk.bf16.mxu1 %vm478_vm0, %v1283_v0 }
  0x77   : > { %754 = vmatpush1.bf16.msra.mxu0 %v1524_v42  ;;  %876 = vmatpush1.bf16.msra.mxu1 %v1524_v42 }
  0x78   : > { %755 = vmatprep.subr.bf16.mxu0 %v1326_v33  ;;  %877 = vmatprep.subr.bf16.mxu1 %v1326_v33 }
  0x7b   : > { %756 = vmatpush1.bf16.msra.mxu0 %v1533_v43  ;;  %878 = vmatpush1.bf16.msra.mxu1 %v1533_v43 }
  0x7c   : > { %757 = vmatprep.subr.bf16.mxu0 %v1326_v33  ;;  %879 = vmatprep.subr.bf16.mxu1 %v1326_v33 }
  0x7f   : > { %758 = vmatpush1.bf16.msra.mxu0 %v1542_v44  ;;  %880 = vmatpush1.bf16.msra.mxu1 %v1542_v44 }
  0x80   : > { %759 = vmatprep.subr.bf16.mxu0 %v1326_v33  ;;  %881 = vmatprep.subr.bf16.mxu1 %v1326_v33 }
  0x83   : > { %760 = vmatpush1.bf16.msra.mxu0 %v1551_v45  ;;  %882 = vmatpush1.bf16.msra.mxu1 %v1551_v45 }
  0x84   : > { %761 = vmatprep.subr.bf16.mxu0 %v1326_v33  ;;  %883 = vmatprep.subr.bf16.mxu1 %v1326_v33 }
  0x87   : > { %762 = vmatpush1.bf16.msra.mxu0 %v1560_v46  ;;  %884 = vmatpush1.bf16.msra.mxu1 %v1560_v46 }
  0x88   : > { %763 = vmatprep.subr.bf16.mxu0 %v1326_v33  ;;  %885 = vmatprep.subr.bf16.mxu1 %v1326_v33 }
  0x8b   : > { %764 = vmatpush1.bf16.msra.mxu0 %v1571_v48  ;;  %886 = vmatpush1.bf16.msra.mxu1 %v1571_v48 }
  0x8e   : > { %772 = vmatmul.mubr.bf16.vlgmr.msra.gmra.mrb[16].mxu0 %v1278_v1  ;;  %894 = vmatmul.mubr.bf16.vlgmr.msra.gmra.mrb[16].mxu1 %v1281_v2 }
  0x8f   : > { %1149 = vmatprep.mubr.msk.bf16.mxu0 %vm478_vm0, %v1284_v3  ;;  %1169 = vmatprep.mubr.msk.bf16.mxu1 %vm478_vm0, %v1286_v4 }
  0x96   : > { %780 = vmatmul.mubr.bf16.gmra.mrb[20].mxu0 %v1288_v5  ;;  %902 = vmatmul.mubr.bf16.gmra.mrb[20].mxu1 %v1289_v6 }
  0x97   : > { %1150 = vmatprep.mubr.msk.bf16.mxu0 %vm478_vm0, %v1290_v7  ;;  %1170 = vmatprep.mubr.msk.bf16.mxu1 %vm478_vm0, %v1292_v8 }
  0x9e   : > { %788 = vmatmul.mubr.bf16.gmra.mrb[24].mxu0 %v1294_v9  ;;  %910 = vmatmul.mubr.bf16.gmra.mrb[24].mxu1 %v1295_v10 }
  0x9f   : > { %1151 = vmatprep.mubr.msk.bf16.mxu0 %vm478_vm0, %v1296_v11  ;;  %1171 = vmatprep.mubr.msk.bf16.mxu1 %vm478_vm0, %v1298_v12 }
  0xa6   : > { %796 = vmatmul.mubr.bf16.gmra.mrb[28].mxu0 %v1300_v13  ;;  %918 = vmatmul.mubr.bf16.gmra.mrb[28].mxu1 %v1301_v14 }
 0x12d   : > { %v529_v15 = vpop.f32.mrb[0].mxu0  ;;  %v651_v16 = vpop.f32.mrb[0].mxu1 }
 0x12e   : > { %v926_v17 = vmax.f32 %v529_v15, %v651_v16  ;;  %v531_v18 = vpop.f32.mrb[1].mxu0  ;;  %v653_v19 = vpop.f32.mrb[1].mxu1 }
 0x12f   : > { %v532_v20 = vpop.f32.mrb[2].mxu0  ;;  %v654_v21 = vpop.f32.mrb[2].mxu1 }
 0x130   : > { %v927_v22 = vmax.f32 %v532_v20, %v654_v21  ;;  %v534_v23 = vpop.f32.mrb[3].mxu0  ;;  %v656_v24 = vpop.f32.mrb[3].mxu1 }
 0x135   : > { %v537_v25 = vpop.f32.mrb[4].mxu0  ;;  %v659_v26 = vpop.f32.mrb[4].mxu1 }
 0x136   : > { %v928_v27 = vmax.f32 %v537_v25, %v659_v26  ;;  %v539_v28 = vpop.f32.mrb[5].mxu0  ;;  %v661_v29 = vpop.f32.mrb[5].mxu1 }
 0x137   : > { %v540_v30 = vpop.f32.mrb[6].mxu0  ;;  %v662_v31 = vpop.f32.mrb[6].mxu1 }
 0x138   : > { %v929_v32 = vmax.f32 %v540_v30, %v662_v31  ;;  %v542_v33 = vpop.f32.mrb[7].mxu0  ;;  %v664_v34 = vpop.f32.mrb[7].mxu1 }
 0x13d   : > { %v1671_v35 = vpop.f32.mrb[8].mxu0  ;;  %v1673_v36 = vpop.f32.mrb[8].mxu1 }
 0x13e   : > { %v930_v37 = vmax.f32 %v1671_v35, %v1673_v36  ;;  %v547_v38 = vpop.f32.mrb[9].mxu0  ;;  %v669_v39 = vpop.f32.mrb[9].mxu1 }
 0x13f   : > { %v1677_v40 = vpop.f32.mrb[10].mxu0  ;;  %v1679_v41 = vpop.f32.mrb[10].mxu1 }
 0x140   : > { %v931_v42 = vmax.f32 %v1677_v40, %v1679_v41  ;;  %v550_v43 = vpop.f32.mrb[11].mxu0  ;;  %v672_v44 = vpop.f32.mrb[11].mxu1 }
 0x145   : > { %v1683_v45 = vpop.f32.mrb[12].mxu0  ;;  %v1685_v46 = vpop.f32.mrb[12].mxu1 }
 0x146   : > { %v932_v47 = vmax.f32 %v1683_v45, %v1685_v46  ;;  %v555_v48 = vpop.f32.mrb[13].mxu0  ;;  %v677_v49 = vpop.f32.mrb[13].mxu1 }
 0x147   : > { %v1689_v50 = vpop.f32.mrb[14].mxu0  ;;  %v1691_v51 = vpop.f32.mrb[14].mxu1 }
 0x148   : > { %v933_v52 = vmax.f32 %v1689_v50, %v1691_v51  ;;  %v558_v53 = vpop.f32.mrb[15].mxu0  ;;  %v680_v54 = vpop.f32.mrb[15].mxu1 }
 0x161   : > { %v773_v55 = vpop.f32.mrb[16].mxu0  ;;  %v895_v56 = vpop.f32.mrb[16].mxu1 }
 0x162   : > { %v934_v57 = vmax.f32 %v773_v55, %v895_v56  ;;  %v775_v58 = vpop.f32.mrb[17].mxu0  ;;  %v897_v59 = vpop.f32.mrb[17].mxu1 }
 0x163   : > { %v776_v61 = vpop.f32.mrb[18].mxu0  ;;  %v898_v62 = vpop.f32.mrb[18].mxu1 }
 0x164   : > { %v942_v63 = vmax.f32 %v926_v17, %v934_v57  ;;  %v935_v0 = vmax.f32 %v776_v61, %v898_v62  ;;  %v778_v1 = vpop.f32.mrb[19].mxu0  ;;  %v900_v2 = vpop.f32.mrb[19].mxu1 }
 0x166   : > { %v957_v3 = vadd.f32 %v1700_v60, %v942_v63  ;;  %v943_v4 = vmax.f32 %v927_v22, %v935_v0 }
 0x168   : > { %v958_v5 = vadd.f32 %v1700_v60, %v943_v4  ;;  %v965_v8 = vmax.f32 %v957_v3, 0.0 }
 0x169   : > { %v781_v6 = vpop.f32.mrb[20].mxu0  ;;  %v903_v7 = vpop.f32.mrb[20].mxu1 }
 0x16a   : > { %v966_v9 = vmax.f32 %v958_v5, 0.0  ;;  %v936_v10 = vmax.f32 %v781_v6, %v903_v7  ;;  %v783_v11 = vpop.f32.mrb[21].mxu0  ;;  %v905_v12 = vpop.f32.mrb[21].mxu1 }
 0x16b   : > { %v784_v13 = vpop.f32.mrb[22].mxu0  ;;  %v906_v14 = vpop.f32.mrb[22].mxu1 }
 0x16c   : > { %v1196_v15 = vpack.c.bf16 %v966_v9, %v965_v8  ;;  %v944_v16 = vmax.f32 %v928_v27, %v936_v10  ;;  %v937_v17 = vmax.f32 %v784_v13, %v906_v14  ;;  %v786_v18 = vpop.f32.mrb[23].mxu0  ;;  %v908_v19 = vpop.f32.mrb[23].mxu1 }
 0x16e   : > { %1197 = vst [vmem:[%s1707_s11] sm:$0xff] %v1196_v15   ;;  %v959_v20 = vadd.f32 %v1700_v60, %v944_v16  ;;  %v945_v21 = vmax.f32 %v929_v32, %v937_v17 }
 0x170   : > { %v960_v22 = vadd.f32 %v1700_v60, %v945_v21  ;;  %v967_v25 = vmax.f32 %v959_v20, 0.0 }
 0x171   : > { %v789_v23 = vpop.f32.mrb[24].mxu0  ;;  %v911_v24 = vpop.f32.mrb[24].mxu1 }
 0x172   : > { %v968_v26 = vmax.f32 %v960_v22, 0.0  ;;  %v938_v28 = vmax.f32 %v789_v23, %v911_v24  ;;  %v791_v29 = vpop.f32.mrb[25].mxu0  ;;  %v913_v30 = vpop.f32.mrb[25].mxu1 }
 0x173   : > { %v792_v31 = vpop.f32.mrb[26].mxu0  ;;  %v914_v33 = vpop.f32.mrb[26].mxu1 }
 0x174   : > { %v1201_v27 = vpack.c.bf16 %v968_v26, %v967_v25  ;;  %v946_v34 = vmax.f32 %v930_v37, %v938_v28  ;;  %v939_v38 = vmax.f32 %v792_v31, %v914_v33  ;;  %v794_v39 = vpop.f32.mrb[27].mxu0  ;;  %v916_v32 = vpop.f32.mrb[27].mxu1 }
 0x176   : > { %1213 = vst [vmem:[%s1707_s11 + $0x8] sm:$0xff] %v1201_v27   ;;  %v961_v43 = vadd.f32 %v1700_v60, %v946_v34  ;;  %v947_v44 = vmax.f32 %v931_v42, %v939_v38 }
 0x178   : > { %v962_v48 = vadd.f32 %v1700_v60, %v947_v44  ;;  %v969_v54 = vmax.f32 %v961_v43, 0.0 }
 0x179   : > { %v797_v49 = vpop.f32.mrb[28].mxu0  ;;  %v919_v53 = vpop.f32.mrb[28].mxu1 }
 0x17a   : > { %v970_v55 = vmax.f32 %v962_v48, 0.0  ;;  %v940_v56 = vmax.f32 %v797_v49, %v919_v53  ;;  %v799_v35 = vpop.f32.mrb[29].mxu0  ;;  %v921_v36 = vpop.f32.mrb[29].mxu1 }
 0x17b   : > { %v800_v37 = vpop.f32.mrb[30].mxu0  ;;  %v922_v57 = vpop.f32.mrb[30].mxu1 }
 0x17c   : > { %v1206_v58 = vpack.c.bf16 %v970_v55, %v969_v54  ;;  %v948_v59 = vmax.f32 %v932_v47, %v940_v56  ;;  %v941_v40 = vmax.f32 %v800_v37, %v922_v57  ;;  %v802_v41 = vpop.f32.mrb[31].mxu0  ;;  %v924_v42 = vpop.f32.mrb[31].mxu1 }
 0x17e   : > { %1214 = vst [vmem:[%s1707_s11 + $0x10] sm:$0xff] %v1206_v58   ;;  %v963_v61 = vadd.f32 %v1700_v60, %v948_v59  ;;  %v949_v62 = vmax.f32 %v933_v52, %v941_v40 }
 0x180   : > { %v964_v63 = vadd.f32 %v1700_v60, %v949_v62  ;;  %v971_v0 = vmax.f32 %v963_v61, 0.0 }
 0x182   : > { %v972_v1 = vmax.f32 %v964_v63, 0.0 }
 0x184   : > { %v1211_v2 = vpack.c.bf16 %v972_v1, %v971_v0 }
 0x186   : > { %1215 = vst [vmem:[%s1707_s11 + $0x18] sm:$0xff] %v1211_v2  }
 0x187 PF: > { %p10_p9 = scmp.ge.s32.totalorder %s1364_s16, 4   ;;  %s1745_s12 = smov %s1320_s13 }
 0x188   : > { %s1746_s13 = smov %s1373_s19  ;;  %s1747_s14 = smov %s1364_s16 }
 0x189   :  { %12 = sbr.rel (!%p10_p9) target bundleno = 2 (0x2), region = 108 }

// kernel: net_forward.6
= control target key start
LH: loop header
LB: loop body
LE: loop exit
PB: predicated region body
PF: predicated region fallthrough
CT: control target
= control target key end

     0   :  { %s1216_s12 = smov 0   ;;  %s1218_s13 = smov 0   ;;  %s1485_s0 = inlined_call_operand.vmem [shape: bf16[4,32,288], index: 0, kind: input, shape index: {}]   ;;  %s1486_s1 = inlined_call_operand.vmem [shape: bf16[288,128], index: 1, kind: input, shape index: {}]   ;;  %s1487_s2 = inlined_call_operand.vmem [shape: f32[1,128], index: 2, kind: input, shape index: {}]   ;;  %s1488_s3 = inlined_call_operand.vmem [shape: bf16[32,128], index: 3, kind: output, shape index: {}]  }
   0x1   :  { %s1220_s14 = smov 0  }
   0x2 LB: > { %s891_s15 = sadd.s32 4294967295, %s1192_s14   ;;  %s1233_s16 = sadd.s32 1, %s1192_s14   ;;  %s1192_s14 = sphi %s1220_s14, %s1491_s14   ;;  %s1188_s13 = sphi %s1218_s13, %s1490_s13   ;;  %s1184_s12 = sphi %s1216_s12, %s1489_s12  }
   0x3   : > { %s17_s17 = ssub.s32 %s1192_s14, %s1233_s16  ;;  %s20_s18 = sadd.s32 1, %s1188_s13 }
   0x4   : > { %p18_p0 = scmp.eq.s32.totalorder %s17_s17, 0  ;;  %p27_p1 = scmp.ne.s32.totalorder %s1188_s13, %s1184_s12 }
   0x5   : > { %p28_p2 = scmp.eq.s32.totalorder %s1192_s14, 0  ;;  %p894_p4 = scmp.ge.s32.totalorder %s1192_s14, 2 }
   0x6   : > { %s1242_s19 = scalar_select %p18_p0, %s1188_s13, %s20_s18  }
   0x7   : > { %p29_p3 = por %p28_p2, %p27_p1  ;;  %127 = sbr.rel (%p894_p4) target bundleno = 28 (0x1c), region = 24 }
   0xe   : > { %130 = sbr.rel (!%p29_p3) target bundleno = 28 (0x1c), region = 28  ;;  %s132_s20 = sand.u32 (%p29_p3), 1, %s1188_s13  }
   0xf   : > { %s1108_s21 = smul.u32 (%p29_p3), 24, %s1192_s14 }
  0x10   : > { %s1107_s22 = smul.u32 (%p29_p3), 96, %s132_s20 }
  0x11   : > { %s1250_s25 = scalar_lea.vmem (%p29_p3), %s1485_s0, %s1108_s21 }
  0x12   : > { %v153_v0 = vld [vmem:[%s1250_s25] sm:$0xff] (%p29_p3)  ;;  %v155_v1 = vld [vmem:[%s1250_s25 + $0xc] sm:$0xff] (%p29_p3)  ;;  %s134_s26 = scalar_lea.vmem (%p29_p3), [#allocation2], %s1107_s22  ;;  %v898_v8 = vld [vmem:[%s1250_s25 + $0x8] sm:$0xf] (%p29_p3) }
  0x13   : > { %v157_v2 = vld [vmem:[%s1250_s25 + $0x30] sm:$0xff] (%p29_p3)  ;;  %154 = vst [vmem:[%s134_s26] sm:$0xff] (%p29_p3), %v153_v0  ;;  %156 = vst [vmem:[%s134_s26 + $0xc] sm:$0xff] (%p29_p3), %v155_v1  ;;  %v159_v3 = vld [vmem:[%s1250_s25 + $0x3c] sm:$0xff] (%p29_p3) }
  0x14   : > { %158 = vst [vmem:[%s134_s26 + $0x18] sm:$0xff] (%p29_p3), %v157_v2  ;;  %v161_v4 = vld [vmem:[%s1250_s25 + $0x60] sm:$0xff] (%p29_p3)  ;;  %v163_v5 = vld [vmem:[%s1250_s25 + $0x6c] sm:$0xff] (%p29_p3)  ;;  %160 = vst [vmem:[%s134_s26 + $0x24] sm:$0xff] (%p29_p3), %v159_v3 }
  0x15   : > { %162 = vst [vmem:[%s134_s26 + $0x30] sm:$0xff] %v161_v4  ;;  %164 = vst [vmem:[%s134_s26 + $0x3c] sm:$0xff] %v163_v5  ;;  %v165_v6 = vld [vmem:[%s1250_s25 + $0x90] sm:$0xff]  ;;  %v167_v7 = vld [vmem:[%s1250_s25 + $0x9c] sm:$0xff] }
  0x16   : > { %166 = vst [vmem:[%s134_s26 + $0x48] sm:$0xff] %v165_v6  ;;  %168 = vst [vmem:[%s134_s26 + $0x54] sm:$0xff] %v167_v7  ;;  %v900_v9 = vld [vmem:[%s1250_s25 + $0x14] sm:$0xf]  ;;  %v902_v10 = vld [vmem:[%s1250_s25 + $0x38] sm:$0xf] }
  0x17   : > { %899 = vst [vmem:[%s134_s26 + $0x8] sm:$0xf] %v898_v8  ;;  %v904_v11 = vld [vmem:[%s1250_s25 + $0x44] sm:$0xf]  ;;  %901 = vst [vmem:[%s134_s26 + $0x14] sm:$0xf] %v900_v9 }
  0x18   : > { %903 = vst [vmem:[%s134_s26 + $0x20] sm:$0xf] %v902_v10  ;;  %905 = vst [vmem:[%s134_s26 + $0x2c] sm:$0xf] %v904_v11  ;;  %v906_v12 = vld [vmem:[%s1250_s25 + $0x68] sm:$0xf] }
  0x19   : > { %v908_v13 = vld [vmem:[%s1250_s25 + $0x74] sm:$0xf]  ;;  %v910_v14 = vld [vmem:[%s1250_s25 + $0x98] sm:$0xf]  ;;  %907 = vst [vmem:[%s134_s26 + $0x38] sm:$0xf] %v906_v12 }
  0x1a   : > { %909 = vst [vmem:[%s134_s26 + $0x44] sm:$0xf] %v908_v13  ;;  %911 = vst [vmem:[%s134_s26 + $0x50] sm:$0xf] %v910_v14  ;;  %v912_v15 = vld [vmem:[%s1250_s25 + $0xa4] sm:$0xf] }
  0x1b   : > { %913 = vst [vmem:[%s134_s26 + $0x5c] sm:$0xf] %v912_v15 }
  0x1c PF: > { %p914_p5 = scmp.ge.s32.totalorder %s1192_s14, 1  ;;  %p196_p6 = scmp.lt.s32.totalorder %s1192_s14, 3 }
  0x1e   : > { %p197_p7 = pnand %p914_p5, %p196_p6 }
  0x1f   : > { %v1273_v16 = vld [vmem:[%s1486_s1 + $0x40] sm:$0xff] (!%p197_p7)   ;;  %v1194_v17 = vmov (!%p197_p7), 0.0   ;;  %vm1195_vm0 = vmmov (!%p197_p7), 0   ;;  %s203_s6 = sand.u32 (!%p197_p7), 1, %s1184_s12   ;;  %v1294_v20 = vld [vmem:[%s1486_s1 + $0x48] sm:$0xff] (!%p197_p7)   ;;  %vm397_vm1 = vcmask (!%p197_p7), 261120  }
  0x20   : > { %200 = sbr.rel (%p197_p7) target bundleno = 342 (0x156), region = 54  ;;  %1075 = vmatprep.subr.bf16.mxu1 (!%p197_p7), %v1194_v17  ;;  %v1279_v18 = vld [vmem:[%s1486_s1 + $0x80] sm:$0xff] (!%p197_p7)   ;;  %975 = vmatprep.subr.bf16.mxu0 (!%p197_p7), %v1273_v16  ;;  %v1301_v21 = vld [vmem:[%s1486_s1 + $0x88] sm:$0xff] (!%p197_p7)   ;;  %v1316_v24 = vld [vmem:[%s1486_s1 + $0x50] sm:$0xff] (!%p197_p7)  }
  0x21   : > { %v1285_v19 = vld [vmem:[%s1486_s1] sm:$0xff] (!%p197_p7)   ;;  %1079 = vmatprep.mubr.msk.bf16.mxu1 (!%p197_p7), %vm1195_vm0, %v1194_v17  ;;  %1076 = vmatpush3.bf16.msra.mxu1 (!%p197_p7), %v1279_v18  ;;  %s1109_s9 = smul.u32 (!%p197_p7), 96, %s203_s6  ;;  %v1307_v22 = vld [vmem:[%s1486_s1 + $0x8] sm:$0xff] (!%p197_p7)   ;;  %v1323_v25 = vld [vmem:[%s1486_s1 + $0x10] sm:$0xff] (!%p197_p7)  }
  0x22   : > { %976 = vmatpush3.bf16.msra.mxu0 (!%p197_p7), %v1285_v19  ;;  %1077 = vmatprep.subr.bf16.mxu1 (!%p197_p7), %v1194_v17  ;;  %v1329_v26 = vld [vmem:[%s1486_s1 + $0x58] sm:$0xff] (!%p197_p7)   ;;  %v1344_v28 = vld [vmem:[%s1486_s1 + $0x60] sm:$0xff] (!%p197_p7)   ;;  %v1358_v30 = vld [vmem:[%s1486_s1 + $0x68] sm:$0xff] (!%p197_p7)  }
  0x23   : > { %977 = vmatprep.subr.bf16.mxu0 (!%p197_p7), %v1294_v20  ;;  %s1309_s18 = scalar_lea.vmem (!%p197_p7), [#allocation2], %s1109_s9  ;;  %v1338_v27 = vld [vmem:[%s1486_s1 + $0x18] sm:$0xff] (!%p197_p7)   ;;  %v1352_v29 = vld [vmem:[%s1486_s1 + $0x20] sm:$0xff] (!%p197_p7)   ;;  %v1364_v31 = vld [vmem:[%s1486_s1 + $0x28] sm:$0xff] (!%p197_p7)  }
  0x24   : > { %v1142_v23 = vld [vmem:[%s1309_s18 + $0x8] ss:$12 sps:$4 sm:$0xff] (!%p197_p7)   ;;  %v1157_v32 = vld [vmem:[%s1309_s18 + $0x4] ss:$12 sps:$4 sm:$0xff] (!%p197_p7)   ;;  %v1388_v36 = vld [vmem:[%s1486_s1 + $0x78] sm:$0xff] (!%p197_p7)  }
  0x25   : > { %1078 = vmatpush3.bf16.msra.mxu1 (!%p197_p7), %v1301_v21  ;;  %v1373_v33 = vld [vmem:[%s1486_s1 + $0x70] sm:$0xff] (!%p197_p7)   ;;  %v1160_v34 = vld [vmem:[%s1309_s18 + $0x1c] ss:$12 sps:$4 sm:$0xff] (!%p197_p7)   ;;  %433 = vmatprep.mubr.bf16.mxu0 (!%p197_p7), %v1157_v32  ;;  %v1155_v38 = vld [vmem:[%s1309_s18] ss:$12 sps:$4 sm:$0xff] (!%p197_p7)  }
  0x26   : > { %978 = vmatpush3.bf16.msra.mxu0 (!%p197_p7), %v1307_v22  ;;  %1000 = vmatprep.subr.bf16.mxu1 (!%p197_p7), %v1273_v16  ;;  %v1382_v35 = vld [vmem:[%s1486_s1 + $0x30] sm:$0xff] (!%p197_p7)   ;;  %v1396_v37 = vld [vmem:[%s1486_s1 + $0x38] sm:$0xff] (!%p197_p7)   ;;  %v1161_v40 = vld [vmem:[%s1309_s18 + $0x20] ss:$12 sps:$4 sm:$0xff] (!%p197_p7)  }
  0x27   : > { %979 = vmatprep.subr.bf16.mxu0 %v1316_v24  ;;  %v1158_v39 = vld [vmem:[%s1309_s18 + $0x18] ss:$12 sps:$4 sm:$0xff]   ;;  %v1165_v41 = vld [vmem:[%s1309_s18 + $0x34] ss:$12 sps:$4 sm:$0xff]   ;;  %v1163_v44 = vld [vmem:[%s1309_s18 + $0x30] ss:$12 sps:$4 sm:$0xff]  }
  0x28   : > { %1080 = vmatmul.mubr.msk.bf16.vlgmr.msra.gmra.mrb[0].mxu1 %vm397_vm1, %v1142_v23  ;;  %v1162_v42 = vld [vmem:[%s1309_s18 + $0x38] ss:$12 sps:$4 sm:$0xff]   ;;  %v1166_v45 = vld [vmem:[%s1309_s18 + $0x48] ss:$12 sps:$4 sm:$0xff]   ;;  %v1169_v46 = vld [vmem:[%s1309_s18 + $0x50] ss:$12 sps:$4 sm:$0xff]  }
  0x29   : > { %1001 = vmatpush3.bf16.msra.mxu1 %v1285_v19  ;;  %538 = vmatprep.mubr.bf16.mxu1 %v1160_v34  ;;  %v1168_v43 = vld [vmem:[%s1309_s18 + $0x4c] ss:$12 sps:$4 sm:$0xff]   ;;  %s915_s18 = sshll.u32 %s891_s15, 1  ;;  %v963_v34 = vld [vmem:[%s1487_s2] ss:$0 sm:$0xff] }
  0x2a   : > { %980 = vmatpush3.bf16.msra.mxu0 %v1323_v25  ;;  %1002 = vmatprep.subr.bf16.mxu1 %v1294_v20  ;;  %p228_p8 = scmp.lt.s32.totalorder %s915_s18, 3 }
  0x2b   : > { %981 = vmatprep.subr.bf16.mxu0 %v1329_v26 }
  0x2c   : > { %s1493_s18 = smov (!%p228_p8, %s915_s18), 3 }
  0x2d   : > { %1003 = vmatpush3.bf16.msra.mxu1 %v1307_v22  ;;  %s916_s14 = sshll.u32 %s1493_s18, 2 }
  0x2e   : > { %982 = vmatpush3.bf16.msra.mxu0 %v1338_v27  ;;  %1004 = vmatprep.subr.bf16.mxu1 %v1316_v24  ;;  %s231_s26 = scalar_lea.vmem %s1488_s3, %s916_s14 }
  0x2f   : > { %983 = vmatprep.subr.bf16.mxu0 %v1344_v28 }
  0x31   : > { %1005 = vmatpush3.bf16.msra.mxu1 %v1323_v25 }
  0x32   : > { %984 = vmatpush3.bf16.msra.mxu0 %v1352_v29  ;;  %1006 = vmatprep.subr.bf16.mxu1 %v1329_v26 }
  0x33   : > { %985 = vmatprep.subr.bf16.mxu0 %v1358_v30 }
  0x35   : > { %1007 = vmatpush3.bf16.msra.mxu1 %v1338_v27 }
  0x36   : > { %986 = vmatpush3.bf16.msra.mxu0 %v1364_v31  ;;  %1008 = vmatprep.subr.bf16.mxu1 %v1344_v28 }
  0x37   : > { %987 = vmatprep.subr.bf16.mxu0 %v1373_v33 }
  0x39   : > { %1009 = vmatpush3.bf16.msra.mxu1 %v1352_v29 }
  0x3a   : > { %988 = vmatpush3.bf16.msra.mxu0 %v1382_v35  ;;  %1010 = vmatprep.subr.bf16.mxu1 %v1358_v30 }
  0x3b   : > { %989 = vmatprep.subr.bf16.mxu0 %v1388_v36 }
  0x3d   : > { %1011 = vmatpush3.bf16.msra.mxu1 %v1364_v31 }
  0x3e   : > { %990 = vmatpush3.bf16.msra.mxu0 %v1396_v37  ;;  %1012 = vmatprep.subr.bf16.mxu1 %v1373_v33 }
  0x3f   : > { %1083 = vmatprep.subr.bf16.mxu0 %v1194_v17 }
  0x41   : > { %434 = vmatmul.mubr.bf16.vlgmr.msra.gmra.mrb[0].mxu0 %v1155_v38  ;;  %1013 = vmatpush3.bf16.msra.mxu1 %v1382_v35 }
  0x42   : > { %1084 = vmatpush3.bf16.msra.mxu0 %v1279_v18  ;;  %1014 = vmatprep.subr.bf16.mxu1 %v1388_v36 }
  0x43   : > { %1085 = vmatprep.subr.bf16.mxu0 %v1194_v17  ;;  %1087 = vmatprep.mubr.msk.bf16.mxu0 %vm1195_vm0, %v1194_v17 }
  0x45   : > { %1015 = vmatpush3.bf16.msra.mxu1 %v1396_v37 }
  0x46   : > { %1086 = vmatpush3.bf16.msra.mxu0 %v1301_v21  ;;  %1091 = vmatprep.subr.bf16.mxu1 %v1194_v17 }
  0x47   : > { %1025 = vmatprep.subr.bf16.mxu0 %v1273_v16 }
  0x48   : > { %539 = vmatmul.mubr.bf16.vlgmr.msra.gmra.mrb[4].mxu1 %v1158_v39 }
  0x49   : > { %1088 = vmatmul.mubr.msk.bf16.vlgmr.msra.gmra.mrb[4].mxu0 %vm397_vm1, %v1161_v40  ;;  %1092 = vmatpush3.bf16.msra.mxu1 %v1279_v18 }
  0x4a   : > { %1026 = vmatpush3.bf16.msra.mxu0 %v1285_v19  ;;  %1093 = vmatprep.subr.bf16.mxu1 %v1194_v17 }
  0x4b   : > { %1027 = vmatprep.subr.bf16.mxu0 %v1294_v20  ;;  %1095 = vmatprep.mubr.msk.bf16.mxu1 %vm1195_vm0, %v1194_v17 }
  0x4c   : > { %643 = vmatprep.mubr.bf16.mxu0 %v1165_v41 }
  0x4d   : > { %1094 = vmatpush3.bf16.msra.mxu1 %v1301_v21 }
  0x4e   : > { %1028 = vmatpush3.bf16.msra.mxu0 %v1307_v22  ;;  %1050 = vmatprep.subr.bf16.mxu1 %v1273_v16 }
  0x4f   : > { %1029 = vmatprep.subr.bf16.mxu0 %v1316_v24 }
  0x50   : > { %1096 = vmatmul.mubr.msk.bf16.vlgmr.msra.gmra.mrb[8].mxu1 %vm397_vm1, %v1162_v42 }
  0x51   : > { %1051 = vmatpush3.bf16.msra.mxu1 %v1285_v19  ;;  %748 = vmatprep.mubr.bf16.mxu1 %v1168_v43 }
  0x52   : > { %1030 = vmatpush3.bf16.msra.mxu0 %v1323_v25  ;;  %1052 = vmatprep.subr.bf16.mxu1 %v1294_v20 }
  0x53   : > { %1031 = vmatprep.subr.bf16.mxu0 %v1329_v26 }
  0x55   : > { %1053 = vmatpush3.bf16.msra.mxu1 %v1307_v22 }
  0x56   : > { %1032 = vmatpush3.bf16.msra.mxu0 %v1338_v27  ;;  %1054 = vmatprep.subr.bf16.mxu1 %v1316_v24 }
  0x57   : > { %1033 = vmatprep.subr.bf16.mxu0 %v1344_v28 }
  0x59   : > { %1055 = vmatpush3.bf16.msra.mxu1 %v1323_v25 }
  0x5a   : > { %1034 = vmatpush3.bf16.msra.mxu0 %v1352_v29  ;;  %1056 = vmatprep.subr.bf16.mxu1 %v1329_v26 }
  0x5b   : > { %1035 = vmatprep.subr.bf16.mxu0 %v1358_v30 }
  0x5d   : > { %1057 = vmatpush3.bf16.msra.mxu1 %v1338_v27 }
  0x5e   : > { %1036 = vmatpush3.bf16.msra.mxu0 %v1364_v31  ;;  %1058 = vmatprep.subr.bf16.mxu1 %v1344_v28 }
  0x5f   : > { %1037 = vmatprep.subr.bf16.mxu0 %v1373_v33 }
  0x61   : > { %1059 = vmatpush3.bf16.msra.mxu1 %v1352_v29 }
  0x62   : > { %1038 = vmatpush3.bf16.msra.mxu0 %v1382_v35  ;;  %1060 = vmatprep.subr.bf16.mxu1 %v1358_v30 }
  0x63   : > { %1039 = vmatprep.subr.bf16.mxu0 %v1388_v36 }
  0x65   : > { %1061 = vmatpush3.bf16.msra.mxu1 %v1364_v31 }
  0x66   : > { %1040 = vmatpush3.bf16.msra.mxu0 %v1396_v37  ;;  %1062 = vmatprep.subr.bf16.mxu1 %v1373_v33 }
  0x67   : > { %1099 = vmatprep.subr.bf16.mxu0 %v1194_v17 }
  0x69   : > { %644 = vmatmul.mubr.bf16.vlgmr.msra.gmra.mrb[8].mxu0 %v1163_v44  ;;  %1063 = vmatpush3.bf16.msra.mxu1 %v1382_v35 }
  0x6a   : > { %1100 = vmatpush3.bf16.msra.mxu0 %v1279_v18  ;;  %1064 = vmatprep.subr.bf16.mxu1 %v1388_v36 }
  0x6b   : > { %1101 = vmatprep.subr.bf16.mxu0 %v1194_v17  ;;  %1103 = vmatprep.mubr.msk.bf16.mxu0 %vm1195_vm0, %v1194_v17 }
  0x6d   : > { %1065 = vmatpush3.bf16.msra.mxu1 %v1396_v37 }
  0x6e   : > { %1102 = vmatpush3.bf16.msra.mxu0 %v1301_v21 }
  0x70   : > { %749 = vmatmul.mubr.bf16.vlgmr.msra.gmra.mrb[12].mxu1 %v1166_v45 }
  0x71   : > { %1104 = vmatmul.mubr.msk.bf16.vlgmr.msra.gmra.mrb[12].mxu0 %vm397_vm1, %v1169_v46 }
  0xfb   : > { %v476_v47 = vpop.f32.mrb[0].mxu1 }
  0xfc   : > { %v1081_v48 = vpop.f32.mrb[1].mxu1 }
  0xfd   : > { %v479_v49 = vpop.f32.mrb[2].mxu1 }
  0xfe   : > { %v1082_v50 = vpop.f32.mrb[3].mxu1 }
 0x114   : > { %v991_v51 = vpop.f32.mrb[0].mxu0 }
 0x115   : > { %v992_v52 = vpop.f32.mrb[1].mxu0 }
 0x116   : > { %v993_v53 = vadd.f32 %v992_v52, %v991_v51  ;;  %v994_v54 = vpop.f32.mrb[2].mxu0 }
 0x117   : > { %v995_v55 = vpop.f32.mrb[3].mxu0 }
 0x118   : > { %v477_v56 = vadd.f32 %v993_v53, %v476_v47  ;;  %v996_v57 = vadd.f32 %v995_v55, %v994_v54 }
 0x11a   : > { %v480_v58 = vadd.f32 %v996_v57, %v479_v49 }
 0x11b   : > { %v1016_v59 = vpop.f32.mrb[4].mxu1 }
 0x11c   : > { %v1017_v60 = vpop.f32.mrb[5].mxu1  ;;  %v581_v61 = vpop.f32.mrb[4].mxu0 }
 0x11d   : > { %v1018_v62 = vadd.f32 %v1017_v60, %v1016_v59  ;;  %v1019_v63 = vpop.f32.mrb[6].mxu1  ;;  %v1089_v0 = vpop.f32.mrb[5].mxu0 }
 0x11e   : > { %v1020_v1 = vpop.f32.mrb[7].mxu1  ;;  %v584_v2 = vpop.f32.mrb[6].mxu0 }
 0x11f   : > { %v582_v3 = vadd.f32 %v1018_v62, %v581_v61  ;;  %v1021_v4 = vadd.f32 %v1020_v1, %v1019_v63  ;;  %v1090_v5 = vpop.f32.mrb[7].mxu0 }
 0x121   : > { %v798_v6 = vmax.f32 %v477_v56, %v582_v3  ;;  %v585_v7 = vadd.f32 %v1021_v4, %v584_v2 }
 0x123   : > { %v799_v8 = vmax.f32 %v480_v58, %v585_v7  ;;  %v686_v9 = vpop.f32.mrb[8].mxu1 }
 0x124   : > { %v1097_v10 = vpop.f32.mrb[9].mxu1 }
 0x125   : > { %v689_v11 = vpop.f32.mrb[10].mxu1 }
 0x126   : > { %v1098_v12 = vpop.f32.mrb[11].mxu1 }
 0x13c   : > { %v1041_v13 = vpop.f32.mrb[8].mxu0 }
 0x13d   : > { %v1042_v14 = vpop.f32.mrb[9].mxu0 }
 0x13e   : > { %v1043_v15 = vadd.f32 %v1042_v14, %v1041_v13  ;;  %v1044_v16 = vpop.f32.mrb[10].mxu0 }
 0x13f   : > { %v1045_v17 = vpop.f32.mrb[11].mxu0 }
 0x140   : > { %v687_v18 = vadd.f32 %v1043_v15, %v686_v9  ;;  %v1046_v19 = vadd.f32 %v1045_v17, %v1044_v16 }
 0x142   : > { %v690_v20 = vadd.f32 %v1046_v19, %v689_v11 }
 0x143   : > { %v1066_v21 = vpop.f32.mrb[12].mxu1 }
 0x144   : > { %v1067_v22 = vpop.f32.mrb[13].mxu1  ;;  %v791_v23 = vpop.f32.mrb[12].mxu0 }
 0x145   : > { %v1068_v24 = vadd.f32 %v1067_v22, %v1066_v21  ;;  %v1069_v25 = vpop.f32.mrb[14].mxu1  ;;  %v1105_v26 = vpop.f32.mrb[13].mxu0 }
 0x146   : > { %v1070_v27 = vpop.f32.mrb[15].mxu1  ;;  %v794_v28 = vpop.f32.mrb[14].mxu0 }
 0x147   : > { %v792_v29 = vadd.f32 %v1068_v24, %v791_v23  ;;  %v1071_v30 = vadd.f32 %v1070_v27, %v1069_v25  ;;  %v1106_v31 = vpop.f32.mrb[15].mxu0 }
 0x149   : > { %v800_v32 = vmax.f32 %v687_v18, %v792_v29  ;;  %v795_v33 = vadd.f32 %v1071_v30, %v794_v28 }
 0x14b   : > { %v802_v35 = vmax.f32 %v798_v6, %v800_v32  ;;  %v801_v36 = vmax.f32 %v690_v20, %v795_v33 }
 0x14d   : > { %v811_v37 = vadd.f32 %v963_v34, %v802_v35  ;;  %v803_v38 = vmax.f32 %v799_v8, %v801_v36 }
 0x14f   : > { %v812_v39 = vadd.f32 %v963_v34, %v803_v38  ;;  %v813_v40 = vmax.f32 %v811_v37, 0.0 }
 0x151   : > { %v814_v41 = vmax.f32 %v812_v39, 0.0 }
 0x153   : > { %v973_v42 = vpack.c.bf16 %v814_v41, %v813_v40 }
 0x155   : > { %974 = vst [vmem:[%s231_s26] sm:$0xff] %v973_v42  }
 0x156 PF: > { %p10_p9 = scmp.ge.s32.totalorder %s1233_s16, 4   ;;  %s1489_s12 = smov %s1188_s13 }
 0x157   : > { %s1490_s13 = smov %s1242_s19  ;;  %s1491_s14 = smov %s1233_s16 }
 0x158   :  { %12 = sbr.rel (!%p10_p9) target bundleno = 2 (0x2), region = 102 }

// kernel: net_forward.7
= control target key start
LH: loop header
LB: loop body
LE: loop exit
PB: predicated region body
PF: predicated region fallthrough
CT: control target
= control target key end

     0   :  { %s2122_s1 = inlined_call_operand.vmem [shape: bf16[1024,256], index: 1, kind: input, shape index: {}]   ;;  %s2123_s0 = inlined_call_operand.vmem [shape: bf16[16,1024], index: 0, kind: input, shape index: {}]   ;;  %s2124_s3 = inlined_call_operand.vmem [shape: bf16[256,128], index: 3, kind: input, shape index: {}]   ;;  %s2125_s2 = inlined_call_operand.vmem [shape: f32[1,256], index: 2, kind: input, shape index: {}]   ;;  %s2126_s4 = inlined_call_operand.vmem [shape: f32[1,128], index: 4, kind: input, shape index: {}]   ;;  %s2127_s5 = inlined_call_operand.vmem [shape: f32[16,128], index: 5, kind: output, shape index: {}]  }
   0x1   :  { %v1400_v0 = vld [vmem:[%s2122_s1 + $0x4] ss:$8 sps:$4 sm:$0xff]   ;;  %v1404_v2 = vld [vmem:[%s2122_s1] ss:$8 sps:$4 sm:$0xff]   ;;  %v1406_v4 = vld [vmem:[%s2122_s1 + $0x14] ss:$8 sps:$4 sm:$0xff]  }
   0x2   :  { %v1402_v1 = vld [vmem:[%s2122_s1 + $0x204] ss:$8 sps:$4 sm:$0xff]   ;;  %849 = vmatprep.subr.bf16.mxu1 %v1400_v0  ;;  %v1405_v3 = vld [vmem:[%s2122_s1 + $0x200] ss:$8 sps:$4 sm:$0xff]   ;;  %v1408_v5 = vld [vmem:[%s2122_s1 + $0x214] ss:$8 sps:$4 sm:$0xff]  }
   0x3   :  { %935 = vmatprep.subr.bf16.mxu0 %v1402_v1  ;;  %850 = vmatpush1.bf16.msra.mxu1 %v1404_v2  ;;  %v1410_v6 = vld [vmem:[%s2122_s1 + $0x10] ss:$8 sps:$4 sm:$0xff]   ;;  %v1412_v8 = vld [vmem:[%s2122_s1 + $0x24] ss:$8 sps:$4 sm:$0xff]   ;;  %v1416_v10 = vld [vmem:[%s2122_s1 + $0x20] ss:$8 sps:$4 sm:$0xff]  }
   0x4   :  { %936 = vmatpush1.bf16.msra.mxu0 %v1405_v3  ;;  %851 = vmatprep.subr.bf16.mxu1 %v1406_v4  ;;  %v1411_v7 = vld [vmem:[%s2122_s1 + $0x210] ss:$8 sps:$4 sm:$0xff]   ;;  %v1414_v9 = vld [vmem:[%s2122_s1 + $0x224] ss:$8 sps:$4 sm:$0xff]   ;;  %v1417_v11 = vld [vmem:[%s2122_s1 + $0x220] ss:$8 sps:$4 sm:$0xff]  }
   0x5   :  { %937 = vmatprep.subr.bf16.mxu0 %v1408_v5  ;;  %v1418_v12 = vld [vmem:[%s2122_s1 + $0x34] ss:$8 sps:$4 sm:$0xff]   ;;  %v1422_v14 = vld [vmem:[%s2122_s1 + $0x30] ss:$8 sps:$4 sm:$0xff]   ;;  %v1424_v16 = vld [vmem:[%s2122_s1 + $0x44] ss:$8 sps:$4 sm:$0xff]  }
   0x6   :  { %v1420_v13 = vld [vmem:[%s2122_s1 + $0x234] ss:$8 sps:$4 sm:$0xff]   ;;  %v1423_v15 = vld [vmem:[%s2122_s1 + $0x230] ss:$8 sps:$4 sm:$0xff]   ;;  %v1426_v17 = vld [vmem:[%s2122_s1 + $0x244] ss:$8 sps:$4 sm:$0xff]  }
   0x7   :  { %852 = vmatpush1.bf16.msra.mxu1 %v1410_v6  ;;  %v1428_v18 = vld [vmem:[%s2122_s1 + $0x40] ss:$8 sps:$4 sm:$0xff]   ;;  %v1430_v20 = vld [vmem:[%s2122_s1 + $0x54] ss:$8 sps:$4 sm:$0xff]   ;;  %v1434_v22 = vld [vmem:[%s2122_s1 + $0x50] ss:$8 sps:$4 sm:$0xff]  }
   0x8   :  { %938 = vmatpush1.bf16.msra.mxu0 %v1411_v7  ;;  %853 = vmatprep.subr.bf16.mxu1 %v1412_v8  ;;  %v1429_v19 = vld [vmem:[%s2122_s1 + $0x240] ss:$8 sps:$4 sm:$0xff]   ;;  %v1432_v21 = vld [vmem:[%s2122_s1 + $0x254] ss:$8 sps:$4 sm:$0xff]   ;;  %v1435_v23 = vld [vmem:[%s2122_s1 + $0x250] ss:$8 sps:$4 sm:$0xff]  }
   0x9   :  { %939 = vmatprep.subr.bf16.mxu0 %v1414_v9  ;;  %v1436_v24 = vld [vmem:[%s2122_s1 + $0x64] ss:$8 sps:$4 sm:$0xff]   ;;  %v1440_v26 = vld [vmem:[%s2122_s1 + $0x60] ss:$8 sps:$4 sm:$0xff]   ;;  %v1442_v28 = vld [vmem:[%s2122_s1 + $0x74] ss:$8 sps:$4 sm:$0xff]  }
   0xa   :  { %v1438_v25 = vld [vmem:[%s2122_s1 + $0x264] ss:$8 sps:$4 sm:$0xff]   ;;  %v1441_v27 = vld [vmem:[%s2122_s1 + $0x260] ss:$8 sps:$4 sm:$0xff]   ;;  %v1444_v29 = vld [vmem:[%s2122_s1 + $0x274] ss:$8 sps:$4 sm:$0xff]  }
   0xb   :  { %854 = vmatpush1.bf16.msra.mxu1 %v1416_v10  ;;  %v1446_v30 = vld [vmem:[%s2122_s1 + $0x70] ss:$8 sps:$4 sm:$0xff]   ;;  %v1448_v32 = vld [vmem:[%s2122_s1 + $0x84] ss:$8 sps:$4 sm:$0xff]   ;;  %v1452_v34 = vld [vmem:[%s2122_s1 + $0x80] ss:$8 sps:$4 sm:$0xff]  }
   0xc   :  { %940 = vmatpush1.bf16.msra.mxu0 %v1417_v11  ;;  %855 = vmatprep.subr.bf16.mxu1 %v1418_v12  ;;  %v1447_v31 = vld [vmem:[%s2122_s1 + $0x270] ss:$8 sps:$4 sm:$0xff]   ;;  %v1450_v33 = vld [vmem:[%s2122_s1 + $0x284] ss:$8 sps:$4 sm:$0xff]   ;;  %v1453_v35 = vld [vmem:[%s2122_s1 + $0x280] ss:$8 sps:$4 sm:$0xff]  }
   0xd   :  { %941 = vmatprep.subr.bf16.mxu0 %v1420_v13  ;;  %v1454_v36 = vld [vmem:[%s2122_s1 + $0x94] ss:$8 sps:$4 sm:$0xff]   ;;  %v1458_v38 = vld [vmem:[%s2122_s1 + $0x90] ss:$8 sps:$4 sm:$0xff]   ;;  %v1460_v40 = vld [vmem:[%s2122_s1 + $0xa4] ss:$8 sps:$4 sm:$0xff]  }
   0xe   :  { %v1456_v37 = vld [vmem:[%s2122_s1 + $0x294] ss:$8 sps:$4 sm:$0xff]   ;;  %v1459_v39 = vld [vmem:[%s2122_s1 + $0x290] ss:$8 sps:$4 sm:$0xff]   ;;  %v1462_v41 = vld [vmem:[%s2122_s1 + $0x2a4] ss:$8 sps:$4 sm:$0xff]  }
   0xf   :  { %856 = vmatpush1.bf16.msra.mxu1 %v1422_v14  ;;  %v1464_v42 = vld [vmem:[%s2122_s1 + $0xa0] ss:$8 sps:$4 sm:$0xff]   ;;  %v1466_v44 = vld [vmem:[%s2122_s1 + $0xb4] ss:$8 sps:$4 sm:$0xff]   ;;  %v1470_v46 = vld [vmem:[%s2122_s1 + $0xb0] ss:$8 sps:$4 sm:$0xff]  }
  0x10   :  { %942 = vmatpush1.bf16.msra.mxu0 %v1423_v15  ;;  %857 = vmatprep.subr.bf16.mxu1 %v1424_v16  ;;  %v1465_v43 = vld [vmem:[%s2122_s1 + $0x2a0] ss:$8 sps:$4 sm:$0xff]   ;;  %v1468_v45 = vld [vmem:[%s2122_s1 + $0x2b4] ss:$8 sps:$4 sm:$0xff]   ;;  %v1471_v47 = vld [vmem:[%s2122_s1 + $0x2b0] ss:$8 sps:$4 sm:$0xff]  }
  0x11   :  { %943 = vmatprep.subr.bf16.mxu0 %v1426_v17  ;;  %v21_v48 = vld [vmem:[%s2123_s0] sm:$0xff]  ;;  %v23_v53 = vld [vmem:[%s2123_s0 + $0x10] sm:$0xff] }
  0x12   :  { %v25_v49 = vld [vmem:[%s2123_s0 + $0x20] sm:$0xff]  ;;  %v27_v54 = vld [vmem:[%s2123_s0 + $0x30] sm:$0xff] }
  0x13   :  { %858 = vmatpush1.bf16.msra.mxu1 %v1428_v18  ;;  %v1472_v50 = vld [vmem:[%s2122_s1 + $0xc4] ss:$8 sps:$4 sm:$0xff]   ;;  %v1210_v52 = vcombine.high %v21_v48, %v25_v49  ;;  %v1214_v55 = vcombine.high %v23_v53, %v27_v54  ;;  %v1476_v56 = vld [vmem:[%s2122_s1 + $0xc0] ss:$8 sps:$4 sm:$0xff]   ;;  %v1478_v58 = vld [vmem:[%s2122_s1 + $0xd4] ss:$8 sps:$4 sm:$0xff]   ;;  %v1209_v8 = vcombine.low %v21_v48, %v25_v49  ;;  %v1213_v10 = vcombine.low %v23_v53, %v27_v54 }
  0x14   :  { %944 = vmatpush1.bf16.msra.mxu0 %v1429_v19  ;;  %859 = vmatprep.subr.bf16.mxu1 %v1430_v20  ;;  %v1474_v51 = vld [vmem:[%s2122_s1 + $0x2c4] ss:$8 sps:$4 sm:$0xff]   ;;  %v1477_v57 = vld [vmem:[%s2122_s1 + $0x2c0] ss:$8 sps:$4 sm:$0xff]   ;;  %v1480_v59 = vld [vmem:[%s2122_s1 + $0x2d4] ss:$8 sps:$4 sm:$0xff]  }
  0x15   :  { %945 = vmatprep.subr.bf16.mxu0 %v1432_v21  ;;  %881 = vmatprep.mubr.bf16.mxu1 %v1210_v52  ;;  %v1482_v60 = vld [vmem:[%s2122_s1 + $0xd0] ss:$8 sps:$4 sm:$0xff]   ;;  %v1484_v62 = vld [vmem:[%s2122_s1 + $0xe4] ss:$8 sps:$4 sm:$0xff]   ;;  %v1488_v0 = vld [vmem:[%s2122_s1 + $0xe0] ss:$8 sps:$4 sm:$0xff]  }
  0x16   :  { %967 = vmatprep.mubr.bf16.mxu0 %v1214_v55  ;;  %v1483_v61 = vld [vmem:[%s2122_s1 + $0x2d0] ss:$8 sps:$4 sm:$0xff]   ;;  %v1486_v63 = vld [vmem:[%s2122_s1 + $0x2e4] ss:$8 sps:$4 sm:$0xff]   ;;  %v1489_v1 = vld [vmem:[%s2122_s1 + $0x2e0] ss:$8 sps:$4 sm:$0xff]  }
  0x17   :  { %860 = vmatpush1.bf16.msra.mxu1 %v1434_v22  ;;  %v1490_v2 = vld [vmem:[%s2122_s1 + $0xf4] ss:$8 sps:$4 sm:$0xff]   ;;  %v1494_v4 = vld [vmem:[%s2122_s1 + $0xf0] ss:$8 sps:$4 sm:$0xff]   ;;  %v1498_v6 = vld [vmem:[%s2122_s1 + $0x104] ss:$8 sps:$4 sm:$0xff]  }
  0x18   :  { %946 = vmatpush1.bf16.msra.mxu0 %v1435_v23  ;;  %861 = vmatprep.subr.bf16.mxu1 %v1436_v24  ;;  %v1492_v3 = vld [vmem:[%s2122_s1 + $0x2f4] ss:$8 sps:$4 sm:$0xff]   ;;  %v1495_v5 = vld [vmem:[%s2122_s1 + $0x2f0] ss:$8 sps:$4 sm:$0xff]   ;;  %v1501_v7 = vld [vmem:[%s2122_s1 + $0x304] ss:$8 sps:$4 sm:$0xff]  }
  0x19   :  { %947 = vmatprep.subr.bf16.mxu0 %v1438_v25  ;;  %v1496_v9 = vld [vmem:[%s2122_s1 + $0x100] ss:$8 sps:$4 sm:$0xff]   ;;  %v1504_v12 = vld [vmem:[%s2122_s1 + $0x114] ss:$8 sps:$4 sm:$0xff]   ;;  %v1502_v14 = vld [vmem:[%s2122_s1 + $0x110] ss:$8 sps:$4 sm:$0xff]  }
  0x1a   :  { %v1499_v11 = vld [vmem:[%s2122_s1 + $0x300] ss:$8 sps:$4 sm:$0xff]   ;;  %v1507_v13 = vld [vmem:[%s2122_s1 + $0x314] ss:$8 sps:$4 sm:$0xff]   ;;  %v1505_v15 = vld [vmem:[%s2122_s1 + $0x310] ss:$8 sps:$4 sm:$0xff]  }
  0x1b   :  { %862 = vmatpush1.bf16.msra.mxu1 %v1440_v26  ;;  %v1510_v16 = vld [vmem:[%s2122_s1 + $0x124] ss:$8 sps:$4 sm:$0xff]   ;;  %v1508_v18 = vld [vmem:[%s2122_s1 + $0x120] ss:$8 sps:$4 sm:$0xff]   ;;  %v1516_v20 = vld [vmem:[%s2122_s1 + $0x134] ss:$8 sps:$4 sm:$0xff]  }
  0x1c   :  { %948 = vmatpush1.bf16.msra.mxu0 %v1441_v27  ;;  %863 = vmatprep.subr.bf16.mxu1 %v1442_v28  ;;  %v1513_v17 = vld [vmem:[%s2122_s1 + $0x324] ss:$8 sps:$4 sm:$0xff]   ;;  %v1511_v19 = vld [vmem:[%s2122_s1 + $0x320] ss:$8 sps:$4 sm:$0xff]   ;;  %v1519_v21 = vld [vmem:[%s2122_s1 + $0x334] ss:$8 sps:$4 sm:$0xff]  }
  0x1d   :  { %949 = vmatprep.subr.bf16.mxu0 %v1444_v29  ;;  %v1514_v22 = vld [vmem:[%s2122_s1 + $0x130] ss:$8 sps:$4 sm:$0xff]   ;;  %v1522_v24 = vld [vmem:[%s2122_s1 + $0x144] ss:$8 sps:$4 sm:$0xff]   ;;  %v1520_v26 = vld [vmem:[%s2122_s1 + $0x140] ss:$8 sps:$4 sm:$0xff]  }
  0x1e   :  { %v1517_v23 = vld [vmem:[%s2122_s1 + $0x330] ss:$8 sps:$4 sm:$0xff]   ;;  %v1525_v25 = vld [vmem:[%s2122_s1 + $0x344] ss:$8 sps:$4 sm:$0xff]   ;;  %v1523_v27 = vld [vmem:[%s2122_s1 + $0x340] ss:$8 sps:$4 sm:$0xff]  }
  0x1f   :  { %864 = vmatpush1.bf16.msra.mxu1 %v1446_v30  ;;  %v1528_v28 = vld [vmem:[%s2122_s1 + $0x154] ss:$8 sps:$4 sm:$0xff]   ;;  %v1526_v30 = vld [vmem:[%s2122_s1 + $0x150] ss:$8 sps:$4 sm:$0xff]   ;;  %v1544_v48 = vld [vmem:[%s2122_s1 + $0x180] ss:$8 sps:$4 sm:$0xff]  }
  0x20   :  { %950 = vmatpush1.bf16.msra.mxu0 %v1447_v31  ;;  %865 = vmatprep.subr.bf16.mxu1 %v1448_v32  ;;  %v1531_v29 = vld [vmem:[%s2122_s1 + $0x354] ss:$8 sps:$4 sm:$0xff]   ;;  %v1529_v31 = vld [vmem:[%s2122_s1 + $0x350] ss:$8 sps:$4 sm:$0xff]   ;;  %v1534_v32 = vld [vmem:[%s2122_s1 + $0x164] ss:$8 sps:$4 sm:$0xff]  }
  0x21   :  { %951 = vmatprep.subr.bf16.mxu0 %v1450_v33  ;;  %v1537_v33 = vld [vmem:[%s2122_s1 + $0x364] ss:$8 sps:$4 sm:$0xff]   ;;  %v1547_v49 = vld [vmem:[%s2122_s1 + $0x380] ss:$8 sps:$4 sm:$0xff]   ;;  %v1550_v52 = vld [vmem:[%s2122_s1 + $0x190] ss:$8 sps:$4 sm:$0xff]  }
  0x22   :  { %v1553_v53 = vld [vmem:[%s2122_s1 + $0x390] ss:$8 sps:$4 sm:$0xff]   ;;  %v1558_v54 = vld [vmem:[%s2122_s1 + $0x1a4] ss:$8 sps:$4 sm:$0xff]  }
  0x23   :  { %866 = vmatpush1.bf16.msra.mxu1 %v1452_v34  ;;  %v1532_v34 = vld [vmem:[%s2122_s1 + $0x160] ss:$8 sps:$4 sm:$0xff]   ;;  %v1561_v55 = vld [vmem:[%s2122_s1 + $0x3a4] ss:$8 sps:$4 sm:$0xff]  }
  0x24   :  { %952 = vmatpush1.bf16.msra.mxu0 %v1453_v35  ;;  %867 = vmatprep.subr.bf16.mxu1 %v1454_v36  ;;  %v1535_v35 = vld [vmem:[%s2122_s1 + $0x360] ss:$8 sps:$4 sm:$0xff]  }
  0x25   :  { %953 = vmatprep.subr.bf16.mxu0 %v1456_v37  ;;  %v1929_v36 = vld [vmem:[%s2123_s0 + $0x8] sm:$0xff] }
  0x26   :  { %v1934_v37 = vld [vmem:[%s2123_s0 + $0x28] sm:$0xff] }
  0x27   :  { %868 = vmatpush1.bf16.msra.mxu1 %v1458_v38  ;;  %v1939_v38 = vld [vmem:[%s2123_s0 + $0x18] sm:$0xff] }
  0x28   :  { %954 = vmatpush1.bf16.msra.mxu0 %v1459_v39  ;;  %869 = vmatprep.subr.bf16.mxu1 %v1460_v40  ;;  %v1944_v39 = vld [vmem:[%s2123_s0 + $0x38] sm:$0xff] }
  0x29   :  { %955 = vmatprep.subr.bf16.mxu0 %v1462_v41  ;;  %v1540_v40 = vld [vmem:[%s2122_s1 + $0x174] ss:$8 sps:$4 sm:$0xff]   ;;  %v1212_v41 = vcombine.high %v1929_v36, %v1934_v37 }
  0x2b   :  { %870 = vmatpush1.bf16.msra.mxu1 %v1464_v42  ;;  %v1543_v42 = vld [vmem:[%s2122_s1 + $0x374] ss:$8 sps:$4 sm:$0xff]  }
  0x2c   :  { %956 = vmatpush1.bf16.msra.mxu0 %v1465_v43  ;;  %871 = vmatprep.subr.bf16.mxu1 %v1466_v44  ;;  %v1216_v43 = vcombine.high %v1939_v38, %v1944_v39  ;;  %v1538_v44 = vld [vmem:[%s2122_s1 + $0x170] ss:$8 sps:$4 sm:$0xff]  }
  0x2d   :  { %957 = vmatprep.subr.bf16.mxu0 %v1468_v45  ;;  %v1541_v45 = vld [vmem:[%s2122_s1 + $0x370] ss:$8 sps:$4 sm:$0xff]  }
  0x2f   :  { %872 = vmatpush1.bf16.msra.mxu1 %v1470_v46  ;;  %v1546_v46 = vld [vmem:[%s2122_s1 + $0x184] ss:$8 sps:$4 sm:$0xff]  }
  0x30   :  { %958 = vmatpush1.bf16.msra.mxu0 %v1471_v47  ;;  %873 = vmatprep.subr.bf16.mxu1 %v1472_v50  ;;  %v1549_v47 = vld [vmem:[%s2122_s1 + $0x384] ss:$8 sps:$4 sm:$0xff]   ;;  %v1552_v50 = vld [vmem:[%s2122_s1 + $0x194] ss:$8 sps:$4 sm:$0xff]  }
  0x31   :  { %959 = vmatprep.subr.bf16.mxu0 %v1474_v51  ;;  %v1555_v51 = vld [vmem:[%s2122_s1 + $0x394] ss:$8 sps:$4 sm:$0xff]  }
  0x33   :  { %874 = vmatpush1.bf16.msra.mxu1 %v1476_v56  ;;  %v1556_v56 = vld [vmem:[%s2122_s1 + $0x1a0] ss:$8 sps:$4 sm:$0xff]  }
  0x34   :  { %960 = vmatpush1.bf16.msra.mxu0 %v1477_v57  ;;  %875 = vmatprep.subr.bf16.mxu1 %v1478_v58  ;;  %v1559_v57 = vld [vmem:[%s2122_s1 + $0x3a0] ss:$8 sps:$4 sm:$0xff]   ;;  %v1564_v58 = vld [vmem:[%s2122_s1 + $0x1b4] ss:$8 sps:$4 sm:$0xff]  }
  0x35   :  { %961 = vmatprep.subr.bf16.mxu0 %v1480_v59  ;;  %v1567_v59 = vld [vmem:[%s2122_s1 + $0x3b4] ss:$8 sps:$4 sm:$0xff]  }
  0x37   :  { %876 = vmatpush1.bf16.msra.mxu1 %v1482_v60  ;;  %v1562_v60 = vld [vmem:[%s2122_s1 + $0x1b0] ss:$8 sps:$4 sm:$0xff]  }
  0x38   :  { %962 = vmatpush1.bf16.msra.mxu0 %v1483_v61  ;;  %877 = vmatprep.subr.bf16.mxu1 %v1484_v62  ;;  %v1565_v61 = vld [vmem:[%s2122_s1 + $0x3b0] ss:$8 sps:$4 sm:$0xff]   ;;  %v1570_v62 = vld [vmem:[%s2122_s1 + $0x1c4] ss:$8 sps:$4 sm:$0xff]  }
  0x39   :  { %963 = vmatprep.subr.bf16.mxu0 %v1486_v63  ;;  %v1573_v63 = vld [vmem:[%s2122_s1 + $0x3c4] ss:$8 sps:$4 sm:$0xff]  }
  0x3b   :  { %878 = vmatpush1.bf16.msra.mxu1 %v1488_v0  ;;  %v1568_v0 = vld [vmem:[%s2122_s1 + $0x1c0] ss:$8 sps:$4 sm:$0xff]  }
  0x3c   :  { %964 = vmatpush1.bf16.msra.mxu0 %v1489_v1  ;;  %879 = vmatprep.subr.bf16.mxu1 %v1490_v2  ;;  %v1571_v1 = vld [vmem:[%s2122_s1 + $0x3c0] ss:$8 sps:$4 sm:$0xff]   ;;  %v1576_v2 = vld [vmem:[%s2122_s1 + $0x1d4] ss:$8 sps:$4 sm:$0xff]  }
  0x3d   :  { %965 = vmatprep.subr.bf16.mxu0 %v1492_v3  ;;  %v1579_v3 = vld [vmem:[%s2122_s1 + $0x3d4] ss:$8 sps:$4 sm:$0xff]  }
  0x3f   :  { %880 = vmatpush1.bf16.msra.mxu1 %v1494_v4  ;;  %v1574_v4 = vld [vmem:[%s2122_s1 + $0x1d0] ss:$8 sps:$4 sm:$0xff]  }
  0x40   :  { %966 = vmatpush1.bf16.msra.mxu0 %v1495_v5  ;;  %892 = vmatprep.subr.bf16.mxu1 %v1498_v6  ;;  %v1577_v5 = vld [vmem:[%s2122_s1 + $0x3d0] ss:$8 sps:$4 sm:$0xff]   ;;  %v1582_v6 = vld [vmem:[%s2122_s1 + $0x1e4] ss:$8 sps:$4 sm:$0xff]  }
  0x41   :  { %978 = vmatprep.subr.bf16.mxu0 %v1501_v7  ;;  %v1585_v7 = vld [vmem:[%s2122_s1 + $0x3e4] ss:$8 sps:$4 sm:$0xff]  }
  0x42   :  { %882 = vmatmul.mubr.bf16.vlgmr.msra.gmra.mrb[0].mxu1 %v1209_v8  ;;  %v1580_v8 = vld [vmem:[%s2122_s1 + $0x1e0] ss:$8 sps:$4 sm:$0xff]  }
  0x43   :  { %968 = vmatmul.mubr.bf16.vlgmr.msra.gmra.mrb[0].mxu0 %v1213_v10  ;;  %893 = vmatpush1.bf16.msra.mxu1 %v1496_v9  ;;  %v1583_v9 = vld [vmem:[%s2122_s1 + $0x3e0] ss:$8 sps:$4 sm:$0xff]   ;;  %v1588_v10 = vld [vmem:[%s2122_s1 + $0x1f4] ss:$8 sps:$4 sm:$0xff]  }
  0x44   :  { %979 = vmatpush1.bf16.msra.mxu0 %v1499_v11  ;;  %894 = vmatprep.subr.bf16.mxu1 %v1504_v12  ;;  %v1591_v11 = vld [vmem:[%s2122_s1 + $0x3f4] ss:$8 sps:$4 sm:$0xff]   ;;  %v1586_v12 = vld [vmem:[%s2122_s1 + $0x1f0] ss:$8 sps:$4 sm:$0xff]  }
  0x45   :  { %980 = vmatprep.subr.bf16.mxu0 %v1507_v13  ;;  %924 = vmatprep.mubr.bf16.mxu1 %v1212_v41  ;;  %v1589_v13 = vld [vmem:[%s2122_s1 + $0x3f0] ss:$8 sps:$4 sm:$0xff]  }
  0x46   :  { %1010 = vmatprep.mubr.bf16.mxu0 %v1216_v43 }
  0x47   :  { %895 = vmatpush1.bf16.msra.mxu1 %v1502_v14  ;;  %v1592_v14 = vld [vmem:[%s2124_s3 + $0x40] sm:$0xff]  }
  0x48   :  { %981 = vmatpush1.bf16.msra.mxu0 %v1505_v15  ;;  %896 = vmatprep.subr.bf16.mxu1 %v1510_v16  ;;  %v1211_v15 = vcombine.low %v1929_v36, %v1934_v37  ;;  %v1215_v16 = vcombine.low %v1939_v38, %v1944_v39 }
  0x49   :  { %982 = vmatprep.subr.bf16.mxu0 %v1513_v17  ;;  %v1593_v17 = vld [vmem:[%s2124_s3] sm:$0xff]  }
  0x4b   :  { %897 = vmatpush1.bf16.msra.mxu1 %v1508_v18  ;;  %v1594_v18 = vld [vmem:[%s2124_s3 + $0x48] sm:$0xff]  }
  0x4c   :  { %983 = vmatpush1.bf16.msra.mxu0 %v1511_v19  ;;  %898 = vmatprep.subr.bf16.mxu1 %v1516_v20  ;;  %v1595_v19 = vld [vmem:[%s2124_s3 + $0x8] sm:$0xff]   ;;  %v1596_v20 = vld [vmem:[%s2124_s3 + $0x50] sm:$0xff]  }
  0x4d   :  { %984 = vmatprep.subr.bf16.mxu0 %v1519_v21  ;;  %v1597_v21 = vld [vmem:[%s2124_s3 + $0x10] sm:$0xff]  }
  0x4f   :  { %899 = vmatpush1.bf16.msra.mxu1 %v1514_v22  ;;  %v1598_v22 = vld [vmem:[%s2124_s3 + $0x58] sm:$0xff]  }
  0x50   :  { %985 = vmatpush1.bf16.msra.mxu0 %v1517_v23  ;;  %900 = vmatprep.subr.bf16.mxu1 %v1522_v24  ;;  %v1599_v23 = vld [vmem:[%s2124_s3 + $0x18] sm:$0xff]   ;;  %v1600_v24 = vld [vmem:[%s2124_s3 + $0x60] sm:$0xff]  }
  0x51   :  { %986 = vmatprep.subr.bf16.mxu0 %v1525_v25  ;;  %v1601_v25 = vld [vmem:[%s2124_s3 + $0x20] sm:$0xff]  }
  0x53   :  { %901 = vmatpush1.bf16.msra.mxu1 %v1520_v26  ;;  %v1602_v26 = vld [vmem:[%s2124_s3 + $0x68] sm:$0xff]  }
  0x54   :  { %987 = vmatpush1.bf16.msra.mxu0 %v1523_v27  ;;  %902 = vmatprep.subr.bf16.mxu1 %v1528_v28  ;;  %v1603_v27 = vld [vmem:[%s2124_s3 + $0x28] sm:$0xff]   ;;  %v1604_v28 = vld [vmem:[%s2124_s3 + $0x70] sm:$0xff]  }
  0x55   :  { %988 = vmatprep.subr.bf16.mxu0 %v1531_v29  ;;  %v1605_v29 = vld [vmem:[%s2124_s3 + $0x30] sm:$0xff]  }
  0x57   :  { %903 = vmatpush1.bf16.msra.mxu1 %v1526_v30  ;;  %v1606_v30 = vld [vmem:[%s2124_s3 + $0x78] sm:$0xff]  }
  0x58   :  { %989 = vmatpush1.bf16.msra.mxu0 %v1529_v31  ;;  %904 = vmatprep.subr.bf16.mxu1 %v1534_v32  ;;  %v1607_v31 = vld [vmem:[%s2124_s3 + $0x38] sm:$0xff]   ;;  %v159_v32 = vlaneseq }
  0x59   :  { %990 = vmatprep.subr.bf16.mxu0 %v1537_v33 }
  0x5a   :  { %v160_v33 = vshrl.u32 %v159_v32, 7 }
  0x5b   :  { %905 = vmatpush1.bf16.msra.mxu1 %v1532_v34 }
  0x5c   :  { %991 = vmatpush1.bf16.msra.mxu0 %v1535_v35  ;;  %906 = vmatprep.subr.bf16.mxu1 %v1540_v40  ;;  %v161_v34 = vsub.s32 0, %v160_v33  ;;  %v157_v35 = vld [vmem:[%s2125_s2] sm:$0x3]  ;;  %v165_v36 = vsub.s32 1, %v160_v33 }
  0x5d   :  { %992 = vmatprep.subr.bf16.mxu0 %v1543_v42 }
  0x5e   :  { %v162_v37 = vrot.slane %v157_v35, %v161_v34  ;;  %v166_v38 = vrot.slane %v157_v35, %v165_v36 }
  0x5f   :  { %907 = vmatpush1.bf16.msra.mxu1 %v1538_v44 }
  0x60   :  { %993 = vmatpush1.bf16.msra.mxu0 %v1541_v45  ;;  %908 = vmatprep.subr.bf16.mxu1 %v1546_v46 }
  0x61   :  { %994 = vmatprep.subr.bf16.mxu0 %v1549_v47 }
  0x63   :  { %909 = vmatpush1.bf16.msra.mxu1 %v1544_v48 }
  0x64   :  { %995 = vmatpush1.bf16.msra.mxu0 %v1547_v49  ;;  %910 = vmatprep.subr.bf16.mxu1 %v1552_v50 }
  0x65   :  { %996 = vmatprep.subr.bf16.mxu0 %v1555_v51 }
  0x67   :  { %911 = vmatpush1.bf16.msra.mxu1 %v1550_v52 }
  0x68   :  { %997 = vmatpush1.bf16.msra.mxu0 %v1553_v53  ;;  %912 = vmatprep.subr.bf16.mxu1 %v1558_v54 }
  0x69   :  { %998 = vmatprep.subr.bf16.mxu0 %v1561_v55 }
  0x6b   :  { %913 = vmatpush1.bf16.msra.mxu1 %v1556_v56 }
  0x6c   :  { %999 = vmatpush1.bf16.msra.mxu0 %v1559_v57  ;;  %914 = vmatprep.subr.bf16.mxu1 %v1564_v58 }
  0x6d   :  { %1000 = vmatprep.subr.bf16.mxu0 %v1567_v59 }
  0x6f   :  { %915 = vmatpush1.bf16.msra.mxu1 %v1562_v60 }
  0x70   :  { %1001 = vmatpush1.bf16.msra.mxu0 %v1565_v61  ;;  %916 = vmatprep.subr.bf16.mxu1 %v1570_v62  ;;  %v1345_v62 = vld [vmem:[%s2126_s4] ss:$0 sm:$0xff] }
  0x71   :  { %1002 = vmatprep.subr.bf16.mxu0 %v1573_v63 }
  0x73   :  { %917 = vmatpush1.bf16.msra.mxu1 %v1568_v0 }
  0x74   :  { %1003 = vmatpush1.bf16.msra.mxu0 %v1571_v1  ;;  %918 = vmatprep.subr.bf16.mxu1 %v1576_v2 }
  0x75   :  { %1004 = vmatprep.subr.bf16.mxu0 %v1579_v3 }
  0x77   :  { %919 = vmatpush1.bf16.msra.mxu1 %v1574_v4 }
  0x78   :  { %1005 = vmatpush1.bf16.msra.mxu0 %v1577_v5  ;;  %920 = vmatprep.subr.bf16.mxu1 %v1582_v6 }
  0x79   :  { %1006 = vmatprep.subr.bf16.mxu0 %v1585_v7 }
  0x7b   :  { %921 = vmatpush1.bf16.msra.mxu1 %v1580_v8 }
  0x7c   :  { %1007 = vmatpush1.bf16.msra.mxu0 %v1583_v9  ;;  %922 = vmatprep.subr.bf16.mxu1 %v1588_v10 }
  0x7d   :  { %1008 = vmatprep.subr.bf16.mxu0 %v1591_v11 }
  0x7f   :  { %923 = vmatpush1.bf16.msra.mxu1 %v1586_v12 }
  0x80   :  { %1009 = vmatpush1.bf16.msra.mxu0 %v1589_v13  ;;  %1362 = vmatprep.subr.bf16.mxu1 %v1592_v14 }
  0x82   :  { %925 = vmatmul.mubr.bf16.vlgmr.msra.gmra.mrb[0].mxu1 %v1211_v15 }
  0x83   :  { %1011 = vmatmul.mubr.bf16.vlgmr.msra.gmra.mrb[0].mxu0 %v1215_v16  ;;  %1363 = vmatpush3.bf16.msra.mxu1 %v1593_v17 }
  0x84   :  { %1364 = vmatprep.subr.bf16.mxu1 %v1594_v18 }
  0x87   :  { %1365 = vmatpush3.bf16.msra.mxu1 %v1595_v19 }
  0x88   :  { %1366 = vmatprep.subr.bf16.mxu1 %v1596_v20 }
  0x8b   :  { %1367 = vmatpush3.bf16.msra.mxu1 %v1597_v21 }
  0x8c   :  { %1368 = vmatprep.subr.bf16.mxu1 %v1598_v22 }
  0x8f   :  { %1369 = vmatpush3.bf16.msra.mxu1 %v1599_v23 }
  0x90   :  { %1370 = vmatprep.subr.bf16.mxu1 %v1600_v24 }
  0x93   :  { %1371 = vmatpush3.bf16.msra.mxu1 %v1601_v25 }
  0x94   :  { %1372 = vmatprep.subr.bf16.mxu1 %v1602_v26 }
  0x97   :  { %1373 = vmatpush3.bf16.msra.mxu1 %v1603_v27 }
  0x98   :  { %1374 = vmatprep.subr.bf16.mxu1 %v1604_v28 }
  0x9b   :  { %1375 = vmatpush3.bf16.msra.mxu1 %v1605_v29 }
  0x9c   :  { %1376 = vmatprep.subr.bf16.mxu1 %v1606_v30 }
  0x9f   :  { %1377 = vmatpush3.bf16.msra.mxu1 %v1607_v31 }
 0x155   :  { %v926_v39 = vpop.f32.mrb[0].mxu1 }
 0x156   :  { %v1012_v40 = vpop.f32.mrb[0].mxu0  ;;  %v1384_v41 = vadd.f32 %v926_v39, %v162_v37  ;;  %v928_v42 = vpop.f32.mrb[1].mxu1 }
 0x157   :  { %v1014_v43 = vpop.f32.mrb[1].mxu0  ;;  %v1386_v44 = vadd.f32 %v928_v42, %v166_v38  ;;  %v930_v45 = vpop.f32.mrb[2].mxu1 }
 0x158   :  { %v1016_v46 = vpop.f32.mrb[2].mxu0  ;;  %v1385_v47 = vadd.f32 %v1384_v41, %v1012_v40  ;;  %v1388_v48 = vadd.f32 %v930_v45, %v162_v37  ;;  %v932_v49 = vpop.f32.mrb[3].mxu1 }
 0x159   :  { %v1018_v50 = vpop.f32.mrb[3].mxu0  ;;  %v1387_v51 = vadd.f32 %v1386_v44, %v1014_v43  ;;  %v1390_v52 = vadd.f32 %v932_v49, %v166_v38 }
 0x15a   :  { %v1389_v53 = vadd.f32 %v1388_v48, %v1016_v46  ;;  %v1021_v55 = vmax.f32 %v1385_v47, 0.0 }
 0x15b   :  { %v1391_v54 = vadd.f32 %v1390_v52, %v1018_v50  ;;  %v1022_v57 = vmax.f32 %v1387_v51, 0.0 }
 0x15c   :  { %v1023_v56 = vmax.f32 %v1389_v53, 0.0 }
 0x15d   :  { %v1024_v58 = vmax.f32 %v1391_v54, 0.0 }
 0x15e   :  { %v1025_v59 = vpack.c.bf16 %v1023_v56, %v1021_v55 }
 0x15f   :  { %v1026_v60 = vpack.c.bf16 %v1024_v58, %v1022_v57 }
 0x161   :  { %1194 = vmatprep.mubr.bf16.mxu1 %v1026_v60 }
 0x162   :  { %1195 = vmatmul.mubr.bf16.vlgmr.msra.gmra.mrb[4].mxu1 %v1025_v59 }
 0x235   :  { %v1378_v61 = vpop.f32.mrb[4].mxu1 }
 0x236   :  { %v1379_v63 = vpop.f32.mrb[5].mxu1 }
 0x237   :  { %v1380_v0 = vadd.f32 %v1379_v63, %v1378_v61  ;;  %v1381_v1 = vpop.f32.mrb[6].mxu1 }
 0x238   :  { %v1382_v2 = vpop.f32.mrb[7].mxu1 }
 0x239   :  { %v1197_v3 = vadd.f32 %v1380_v0, %v1345_v62  ;;  %v1383_v4 = vadd.f32 %v1382_v2, %v1381_v1 }
 0x23b   :  { %1203 = vst [vmem:[%s2127_s5] sm:$0xff] %v1197_v3  ;;  %v1200_v5 = vadd.f32 %v1383_v4, %v1345_v62 }
 0x23d   :  { %1204 = vst [vmem:[%s2127_s5 + $0x8] sm:$0xff] %v1200_v5 }

</bundles_post_ra>
